<compile_context>
chip_gen: v5e
topology: v5e:2x2
jax: 0.10.0
libtpu: 0.0.40
codegen_flags: <defaults>
</compile_context>

<pallas_src>
import functools

import numpy as np

import jax
import jax.numpy as jnp
from jax import lax
from jax.experimental import pallas as pl
from jax.experimental.pallas import tpu as pltpu


# --------------------------- host-side weight packing ---------------------------
def _pack_weights(weights, W, C, residual_scale=1.0):
    """OIHW conv weights -> per-lane shifted-MAC weight table.

    Returns (num_blocks, 2*3*(4C-1), W*C) float32.  Row
      t = (conv_idx*3 + kh)*(4C-1) + (j-1)
    holds, for output lane l = w*C + co, the weight that multiplies the padded
    activation read at [h + kh, l + j].  `residual_scale` is folded into the
    second conv of every block (x + s*conv2(relu(conv1(x))) == x + (s*conv2)(...)).
    """
    WC = W * C
    nj = 4 * C - 1
    table = np.zeros((len(weights), 2 * 3 * nj, WC), np.float32)
    for blk, pair in enumerate(weights):
        for conv_idx, wt in enumerate(pair):
            wt = np.asarray(wt)                      # (out_c, in_c, 3, 3) OIHW
            fac = residual_scale if conv_idx == 1 else 1.0
            for kh in range(3):
                for j in range(1, 4 * C):
                    row = np.zeros((WC,), np.float32)
                    for co in range(C):
                        s = co + j
                        kw = s // C - 1              # lane shift j -> x col w + kw - 1
                        if 0 <= kw <= 2:
                            row[co::C] = wt[co, s % C, kh, kw]
                    table[blk, (conv_idx * 3 + kh) * nj + (j - 1)] = fac * row
    return jnp.asarray(table)


# --------------------------------- the kernel ----------------------------------
def _resnet_stack_kernel(x_ref, wv_ref, o_ref, xcur, xpad, hpad, *, C):
    # x_ref : (1, H, W*C)  one image, channels interleaved on the lane axis
    # wv_ref: (1, 2*3*(4C-1), W*C) packed weight rows for the current block
    # o_ref : (1, H, W*C)
    # xcur  : VMEM (H, W*C)            unpadded current activation (aligned carry)
    # xpad  : VMEM (H+2, W*C + 4C)     padded current activation
    # hpad  : VMEM (H+2, W*C + 4C)     padded conv1 output
    H = x_ref.shape[1]
    WC = x_ref.shape[2]
    nj = 4 * C - 1
    b = pl.program_id(1)

    @pl.when(b == 0)
    def _init():
        # Zero once per image; borders / guard lanes stay zero afterwards and
        # only the interiors are rewritten below (no per-step full-slab zero).
        xpad[...] = jnp.zeros_like(xpad)
        hpad[...] = jnp.zeros_like(hpad)
        x0 = x_ref[0].astype(jnp.float32)
        xcur[...] = x0
        xpad[pl.ds(1, H), pl.ds(2 * C, WC)] = x0

    def conv3x3(src, conv_idx):
        # out[h, w*C+co] = sum_{kh, j} src[h+kh, w*C+co+j] * wrow(kh, j)[w*C+co]
        acc = jnp.zeros((H, WC), jnp.float32)
        for kh in range(3):
            for j in range(1, 4 * C):
                t = (conv_idx * 3 + kh) * nj + (j - 1)
                w_row = wv_ref[0, pl.ds(t, 1)]                  # (1, WC)
                acc = acc + src[pl.ds(kh, H), pl.ds(j, WC)] * w_row
        return acc

    h = jnp.maximum(conv3x3(xpad, 0), 0.0)                      # conv1 + ReLU
    hpad[pl.ds(1, H), pl.ds(2 * C, WC)] = h
    y = conv3x3(hpad, 1)                                        # conv2 (0.1 pre-folded)
    new_x = xcur[...] + y                                       # residual
    xcur[...] = new_x                                           # aligned carry
    xpad[pl.ds(1, H), pl.ds(2 * C, WC)] = new_x                 # padded carry for conv1

    @pl.when(b == pl.num_programs(1) - 1)
    def _store():
        o_ref[0] = new_x.astype(o_ref.dtype)


def _resnet_stack_pallas(x_pack, wv_pack, C):
    N, H, WC = x_pack.shape
    num_blocks, T, _ = wv_pack.shape
    kernel = functools.partial(_resnet_stack_kernel, C=C)
    flops = int(N * num_blocks * 2 * 3 * (4 * C - 1) * H * WC * 2)
    bytes_accessed = int(2 * N * H * WC * 4 + N * num_blocks * T * WC * 4)
    return pl.pallas_call(
        kernel,
        out_shape=jax.ShapeDtypeStruct((N, H, WC), x_pack.dtype),
        grid_spec=pltpu.PrefetchScalarGridSpec(
            num_scalar_prefetch=0,
            grid=(N, num_blocks),
            in_specs=[
                pl.BlockSpec((1, H, WC), lambda n, b: (n, 0, 0)),   # image (const in b)
                pl.BlockSpec((1, T, WC), lambda n, b: (b, 0, 0)),   # per-block weights
            ],
            out_specs=pl.BlockSpec((1, H, WC), lambda n, b: (n, 0, 0)),
            scratch_shapes=[
                pltpu.VMEM((H, WC), jnp.float32),
                pltpu.VMEM((H + 2, WC + 4 * C), jnp.float32),
                pltpu.VMEM((H + 2, WC + 4 * C), jnp.float32),
            ],
        ),
        compiler_params=pltpu.CompilerParams(
            dimension_semantics=("parallel", "arbitrary")),
        cost_estimate=pl.CostEstimate(
            flops=flops, transcendentals=0, bytes_accessed=bytes_accessed),
    )(x_pack, wv_pack)


@functools.partial(jax.jit, static_argnames=("C",))
def _run(x_nchw, wv_pack, *, C):
    # Layout plumbing fused around the kernel: NCHW -> (N, H, W*C) -> NCHW.
    N, _, H, W = x_nchw.shape
    x_pack = jnp.transpose(x_nchw, (0, 2, 3, 1)).reshape(N, H, W * C)
    out = _resnet_stack_pallas(x_pack, wv_pack, C)
    return jnp.transpose(out.reshape(N, H, W, C), (0, 3, 1, 2))


# ------------------------------- public wrapper ---------------------------------
def resnet_blocks_forward(x_nchw, weights):
    """Pallas implementation of ResNetBlocksModule.forward.

    x_nchw : (N, C, H, W) float32 (PyTorch layout)
    weights: list of (w1, w2) pairs, each in PyTorch OIHW layout (C, C, 3, 3).
    """
    N, C, H, W = x_nchw.shape
    wv_pack = _pack_weights(weights, W, C, residual_scale=0.1)   # packed once, all blocks
    return _run(x_nchw, wv_pack, C=C)


# ---------------- pure-JAX reference (for verification) ----------------
def _ref_forward(x_nchw, weights):
    dn = ("NCHW", "OIHW", "NCHW")
    x = x_nchw
    for (w1, w2) in weights:
        y = lax.conv_general_dilated(x, w1, (1, 1), "SAME", dimension_numbers=dn)
        y = jnp.maximum(y, 0.0)
        y = lax.conv_general_dilated(y, w2, (1, 1), "SAME", dimension_numbers=dn)
        x = x + 0.1 * y
    return x


if __name__ == "__main__":
    # filter_size = (kernel_size=3, in_c=4, out_c=4), num_blocks=2
    N, C, H, W = 2, 4, 16, 16
    num_blocks = 2

    key = jax.random.PRNGKey(0)
    kx, kw = jax.random.split(key)
    x = jax.random.normal(kx, (N, C, H, W), dtype=jnp.float32)

    # Deterministic synthetic weights (PyTorch Conv2d weight shape: OIHW).
    weights = []
    wkeys = jax.random.split(kw, num_blocks * 2)
    for blk in range(num_blocks):
        w1 = 0.1 * jax.random.normal(wkeys[2 * blk], (C, C, 3, 3), jnp.float32)
        w2 = 0.1 * jax.random.normal(wkeys[2 * blk + 1], (C, C, 3, 3), jnp.float32)
        weights.append((w1, w2))

    out = jax.block_until_ready(resnet_blocks_forward(x, weights))
    ref = _ref_forward(x, weights)

    assert out.shape == (N, C, H, W)
    assert jnp.allclose(out, ref, atol=1e-4, rtol=1e-4), "mismatch vs reference"

    print("KERNEL_OK")
</pallas_src>

<mosaic_0001>
module attributes {stable_mosaic.version = 11 : i64} {
  func.func @_resnet_stack_kernel(%arg0: i32, %arg1: i32, %arg2: memref<1x16x64xf32, #tpu.memory_space<vmem>>, %arg3: memref<1x90x64xf32, #tpu.memory_space<vmem>>, %arg4: memref<1x16x64xf32, #tpu.memory_space<vmem>>, %arg5: memref<16x64xf32, #tpu.memory_space<vmem>>, %arg6: memref<18x80xf32, #tpu.memory_space<vmem>>, %arg7: memref<18x80xf32, #tpu.memory_space<vmem>>) attributes {dimension_semantics = [#tpu.dimension_semantics<parallel>, #tpu.dimension_semantics<arbitrary>], iteration_bounds = array<i64: 2, 2>, scalar_prefetch = 0 : i64, scratch_operands = 3 : i64, tpu.core_type = #tpu.core_type<tc>, window_params = [{transform_indices = @transform_0, window_bounds = array<i64: 1, 16, 64>}, {transform_indices = @transform_1, window_bounds = array<i64: 1, 90, 64>}, {transform_indices = @transform_2, window_bounds = array<i64: 1, 16, 64>}]} {
    %c0_i32 = arith.constant 0 : i32
    %0 = arith.cmpi eq, %arg1, %c0_i32 : i32
    %1 = arith.extui %0 : i1 to i32
    %c0_i32_0 = arith.constant 0 : i32
    %2 = arith.cmpi ne, %1, %c0_i32_0 : i32
    scf.if %2 {
      %cst_372 = arith.constant 0.000000e+00 : f32
      %555 = vector.broadcast %cst_372 : f32 to vector<18x80xf32>
      %c0_373 = arith.constant 0 : index
      %c0_374 = arith.constant 0 : index
      %556 = vector.load %arg6[%c0_373, %c0_374] : memref<18x80xf32, #tpu.memory_space<vmem>>, vector<18x80xf32>
      tpu.vector_store %arg6[%c0_373, %c0_374], %555 {strides = array<i32>} : memref<18x80xf32, #tpu.memory_space<vmem>>, vector<18x80xf32>,
      %cst_375 = arith.constant 0.000000e+00 : f32
      %557 = vector.broadcast %cst_375 : f32 to vector<18x80xf32>
      %c0_376 = arith.constant 0 : index
      %c0_377 = arith.constant 0 : index
      %558 = vector.load %arg7[%c0_376, %c0_377] : memref<18x80xf32, #tpu.memory_space<vmem>>, vector<18x80xf32>
      tpu.vector_store %arg7[%c0_376, %c0_377], %557 {strides = array<i32>} : memref<18x80xf32, #tpu.memory_space<vmem>>, vector<18x80xf32>,
      %c0_378 = arith.constant 0 : index
      %c0_379 = arith.constant 0 : index
      %c0_380 = arith.constant 0 : index
      %559 = vector.load %arg2[%c0_378, %c0_379, %c0_380] : memref<1x16x64xf32, #tpu.memory_space<vmem>>, vector<1x16x64xf32>
      %560 = vector.shape_cast %559 : vector<1x16x64xf32> to vector<16x64xf32>
      %c0_381 = arith.constant 0 : index
      %c0_382 = arith.constant 0 : index
      %561 = vector.load %arg5[%c0_381, %c0_382] : memref<16x64xf32, #tpu.memory_space<vmem>>, vector<16x64xf32>
      tpu.vector_store %arg5[%c0_381, %c0_382], %560 {strides = array<i32>} : memref<16x64xf32, #tpu.memory_space<vmem>>, vector<16x64xf32>,
      %c1_383 = arith.constant 1 : index
      %c8_384 = arith.constant 8 : index
      %562 = vector.load %arg6[%c1_383, %c8_384] : memref<18x80xf32, #tpu.memory_space<vmem>>, vector<16x64xf32>
      tpu.vector_store %arg6[%c1_383, %c8_384], %560 {strides = array<i32>} : memref<18x80xf32, #tpu.memory_space<vmem>>, vector<16x64xf32>,
    } else {
    }
    %cst = arith.constant 0.000000e+00 : f32
    %3 = vector.broadcast %cst : f32 to vector<16x64xf32>
    %c0 = arith.constant 0 : index
    %c0_1 = arith.constant 0 : index
    %c0_2 = arith.constant 0 : index
    %4 = vector.load %arg3[%c0, %c0_1, %c0_2] : memref<1x90x64xf32, #tpu.memory_space<vmem>>, vector<1x1x64xf32>
    %5 = vector.shape_cast %4 : vector<1x1x64xf32> to vector<1x64xf32>
    %c0_3 = arith.constant 0 : index
    %c1 = arith.constant 1 : index
    %6 = vector.load %arg6[%c0_3, %c1] : memref<18x80xf32, #tpu.memory_space<vmem>>, vector<16x64xf32>
    %7 = vector.broadcast %5 : vector<1x64xf32> to vector<16x64xf32>
    %8 = arith.mulf %6, %7 : vector<16x64xf32>
    %9 = arith.addf %3, %8 : vector<16x64xf32>
    %c0_4 = arith.constant 0 : index
    %c1_5 = arith.constant 1 : index
    %c0_6 = arith.constant 0 : index
    %10 = vector.load %arg3[%c0_4, %c1_5, %c0_6] : memref<1x90x64xf32, #tpu.memory_space<vmem>>, vector<1x1x64xf32>
    %11 = vector.shape_cast %10 : vector<1x1x64xf32> to vector<1x64xf32>
    %c0_7 = arith.constant 0 : index
    %c2 = arith.constant 2 : index
    %12 = vector.load %arg6[%c0_7, %c2] : memref<18x80xf32, #tpu.memory_space<vmem>>, vector<16x64xf32>
    %13 = vector.broadcast %11 : vector<1x64xf32> to vector<16x64xf32>
    %14 = arith.mulf %12, %13 : vector<16x64xf32>
    %15 = arith.addf %9, %14 : vector<16x64xf32>
    %c0_8 = arith.constant 0 : index
    %c2_9 = arith.constant 2 : index
    %c0_10 = arith.constant 0 : index
    %16 = vector.load %arg3[%c0_8, %c2_9, %c0_10] : memref<1x90x64xf32, #tpu.memory_space<vmem>>, vector<1x1x64xf32>
    %17 = vector.shape_cast %16 : vector<1x1x64xf32> to vector<1x64xf32>
    %c0_11 = arith.constant 0 : index
    %c3 = arith.constant 3 : index
    %18 = vector.load %arg6[%c0_11, %c3] : memref<18x80xf32, #tpu.memory_space<vmem>>, vector<16x64xf32>
    %19 = vector.broadcast %17 : vector<1x64xf32> to vector<16x64xf32>
    %20 = arith.mulf %18, %19 : vector<16x64xf32>
    %21 = arith.addf %15, %20 : vector<16x64xf32>
    %c0_12 = arith.constant 0 : index
    %c3_13 = arith.constant 3 : index
    %c0_14 = arith.constant 0 : index
    %22 = vector.load %arg3[%c0_12, %c3_13, %c0_14] : memref<1x90x64xf32, #tpu.memory_space<vmem>>, vector<1x1x64xf32>
    %23 = vector.shape_cast %22 : vector<1x1x64xf32> to vector<1x64xf32>
    %c0_15 = arith.constant 0 : index
    %c4 = arith.constant 4 : index
    %24 = vector.load %arg6[%c0_15, %c4] : memref<18x80xf32, #tpu.memory_space<vmem>>, vector<16x64xf32>
    %25 = vector.broadcast %23 : vector<1x64xf32> to vector<16x64xf32>
    %26 = arith.mulf %24, %25 : vector<16x64xf32>
    %27 = arith.addf %21, %26 : vector<16x64xf32>
    %c0_16 = arith.constant 0 : index
    %c4_17 = arith.constant 4 : index
    %c0_18 = arith.constant 0 : index
    %28 = vector.load %arg3[%c0_16, %c4_17, %c0_18] : memref<1x90x64xf32, #tpu.memory_space<vmem>>, vector<1x1x64xf32>
    %29 = vector.shape_cast %28 : vector<1x1x64xf32> to vector<1x64xf32>
    %c0_19 = arith.constant 0 : index
    %c5 = arith.constant 5 : index
    %30 = vector.load %arg6[%c0_19, %c5] : memref<18x80xf32, #tpu.memory_space<vmem>>, vector<16x64xf32>
    %31 = vector.broadcast %29 : vector<1x64xf32> to vector<16x64xf32>
    %32 = arith.mulf %30, %31 : vector<16x64xf32>
    %33 = arith.addf %27, %32 : vector<16x64xf32>
    %c0_20 = arith.constant 0 : index
    %c5_21 = arith.constant 5 : index
    %c0_22 = arith.constant 0 : index
    %34 = vector.load %arg3[%c0_20, %c5_21, %c0_22] : memref<1x90x64xf32, #tpu.memory_space<vmem>>, vector<1x1x64xf32>
    %35 = vector.shape_cast %34 : vector<1x1x64xf32> to vector<1x64xf32>
    %c0_23 = arith.constant 0 : index
    %c6 = arith.constant 6 : index
    %36 = vector.load %arg6[%c0_23, %c6] : memref<18x80xf32, #tpu.memory_space<vmem>>, vector<16x64xf32>
    %37 = vector.broadcast %35 : vector<1x64xf32> to vector<16x64xf32>
    %38 = arith.mulf %36, %37 : vector<16x64xf32>
    %39 = arith.addf %33, %38 : vector<16x64xf32>
    %c0_24 = arith.constant 0 : index
    %c6_25 = arith.constant 6 : index
    %c0_26 = arith.constant 0 : index
    %40 = vector.load %arg3[%c0_24, %c6_25, %c0_26] : memref<1x90x64xf32, #tpu.memory_space<vmem>>, vector<1x1x64xf32>
    %41 = vector.shape_cast %40 : vector<1x1x64xf32> to vector<1x64xf32>
    %c0_27 = arith.constant 0 : index
    %c7 = arith.constant 7 : index
    %42 = vector.load %arg6[%c0_27, %c7] : memref<18x80xf32, #tpu.memory_space<vmem>>, vector<16x64xf32>
    %43 = vector.broadcast %41 : vector<1x64xf32> to vector<16x64xf32>
    %44 = arith.mulf %42, %43 : vector<16x64xf32>
    %45 = arith.addf %39, %44 : vector<16x64xf32>
    %c0_28 = arith.constant 0 : index
    %c7_29 = arith.constant 7 : index
    %c0_30 = arith.constant 0 : index
    %46 = vector.load %arg3[%c0_28, %c7_29, %c0_30] : memref<1x90x64xf32, #tpu.memory_space<vmem>>, vector<1x1x64xf32>
    %47 = vector.shape_cast %46 : vector<1x1x64xf32> to vector<1x64xf32>
    %c0_31 = arith.constant 0 : index
    %c8 = arith.constant 8 : index
    %48 = vector.load %arg6[%c0_31, %c8] : memref<18x80xf32, #tpu.memory_space<vmem>>, vector<16x64xf32>
    %49 = vector.broadcast %47 : vector<1x64xf32> to vector<16x64xf32>
    %50 = arith.mulf %48, %49 : vector<16x64xf32>
    %51 = arith.addf %45, %50 : vector<16x64xf32>
    %c0_32 = arith.constant 0 : index
    %c8_33 = arith.constant 8 : index
    %c0_34 = arith.constant 0 : index
    %52 = vector.load %arg3[%c0_32, %c8_33, %c0_34] : memref<1x90x64xf32, #tpu.memory_space<vmem>>, vector<1x1x64xf32>
    %53 = vector.shape_cast %52 : vector<1x1x64xf32> to vector<1x64xf32>
    %c0_35 = arith.constant 0 : index
    %c9 = arith.constant 9 : index
    %54 = vector.load %arg6[%c0_35, %c9] : memref<18x80xf32, #tpu.memory_space<vmem>>, vector<16x64xf32>
    %55 = vector.broadcast %53 : vector<1x64xf32> to vector<16x64xf32>
    %56 = arith.mulf %54, %55 : vector<16x64xf32>
    %57 = arith.addf %51, %56 : vector<16x64xf32>
    %c0_36 = arith.constant 0 : index
    %c9_37 = arith.constant 9 : index
    %c0_38 = arith.constant 0 : index
    %58 = vector.load %arg3[%c0_36, %c9_37, %c0_38] : memref<1x90x64xf32, #tpu.memory_space<vmem>>, vector<1x1x64xf32>
    %59 = vector.shape_cast %58 : vector<1x1x64xf32> to vector<1x64xf32>
    %c0_39 = arith.constant 0 : index
    %c10 = arith.constant 10 : index
    %60 = vector.load %arg6[%c0_39, %c10] : memref<18x80xf32, #tpu.memory_space<vmem>>, vector<16x64xf32>
    %61 = vector.broadcast %59 : vector<1x64xf32> to vector<16x64xf32>
    %62 = arith.mulf %60, %61 : vector<16x64xf32>
    %63 = arith.addf %57, %62 : vector<16x64xf32>
    %c0_40 = arith.constant 0 : index
    %c10_41 = arith.constant 10 : index
    %c0_42 = arith.constant 0 : index
    %64 = vector.load %arg3[%c0_40, %c10_41, %c0_42] : memref<1x90x64xf32, #tpu.memory_space<vmem>>, vector<1x1x64xf32>
    %65 = vector.shape_cast %64 : vector<1x1x64xf32> to vector<1x64xf32>
    %c0_43 = arith.constant 0 : index
    %c11 = arith.constant 11 : index
    %66 = vector.load %arg6[%c0_43, %c11] : memref<18x80xf32, #tpu.memory_space<vmem>>, vector<16x64xf32>
    %67 = vector.broadcast %65 : vector<1x64xf32> to vector<16x64xf32>
    %68 = arith.mulf %66, %67 : vector<16x64xf32>
    %69 = arith.addf %63, %68 : vector<16x64xf32>
    %c0_44 = arith.constant 0 : index
    %c11_45 = arith.constant 11 : index
    %c0_46 = arith.constant 0 : index
    %70 = vector.load %arg3[%c0_44, %c11_45, %c0_46] : memref<1x90x64xf32, #tpu.memory_space<vmem>>, vector<1x1x64xf32>
    %71 = vector.shape_cast %70 : vector<1x1x64xf32> to vector<1x64xf32>
    %c0_47 = arith.constant 0 : index
    %c12 = arith.constant 12 : index
    %72 = vector.load %arg6[%c0_47, %c12] : memref<18x80xf32, #tpu.memory_space<vmem>>, vector<16x64xf32>
    %73 = vector.broadcast %71 : vector<1x64xf32> to vector<16x64xf32>
    %74 = arith.mulf %72, %73 : vector<16x64xf32>
    %75 = arith.addf %69, %74 : vector<16x64xf32>
    %c0_48 = arith.constant 0 : index
    %c12_49 = arith.constant 12 : index
    %c0_50 = arith.constant 0 : index
    %76 = vector.load %arg3[%c0_48, %c12_49, %c0_50] : memref<1x90x64xf32, #tpu.memory_space<vmem>>, vector<1x1x64xf32>
    %77 = vector.shape_cast %76 : vector<1x1x64xf32> to vector<1x64xf32>
    %c0_51 = arith.constant 0 : index
    %c13 = arith.constant 13 : index
    %78 = vector.load %arg6[%c0_51, %c13] : memref<18x80xf32, #tpu.memory_space<vmem>>, vector<16x64xf32>
    %79 = vector.broadcast %77 : vector<1x64xf32> to vector<16x64xf32>
    %80 = arith.mulf %78, %79 : vector<16x64xf32>
    %81 = arith.addf %75, %80 : vector<16x64xf32>
    %c0_52 = arith.constant 0 : index
    %c13_53 = arith.constant 13 : index
    %c0_54 = arith.constant 0 : index
    %82 = vector.load %arg3[%c0_52, %c13_53, %c0_54] : memref<1x90x64xf32, #tpu.memory_space<vmem>>, vector<1x1x64xf32>
    %83 = vector.shape_cast %82 : vector<1x1x64xf32> to vector<1x64xf32>
    %c0_55 = arith.constant 0 : index
    %c14 = arith.constant 14 : index
    %84 = vector.load %arg6[%c0_55, %c14] : memref<18x80xf32, #tpu.memory_space<vmem>>, vector<16x64xf32>
    %85 = vector.broadcast %83 : vector<1x64xf32> to vector<16x64xf32>
    %86 = arith.mulf %84, %85 : vector<16x64xf32>
    %87 = arith.addf %81, %86 : vector<16x64xf32>
    %c0_56 = arith.constant 0 : index
    %c14_57 = arith.constant 14 : index
    %c0_58 = arith.constant 0 : index
    %88 = vector.load %arg3[%c0_56, %c14_57, %c0_58] : memref<1x90x64xf32, #tpu.memory_space<vmem>>, vector<1x1x64xf32>
    %89 = vector.shape_cast %88 : vector<1x1x64xf32> to vector<1x64xf32>
    %c0_59 = arith.constant 0 : index
    %c15 = arith.constant 15 : index
    %90 = vector.load %arg6[%c0_59, %c15] : memref<18x80xf32, #tpu.memory_space<vmem>>, vector<16x64xf32>
    %91 = vector.broadcast %89 : vector<1x64xf32> to vector<16x64xf32>
    %92 = arith.mulf %90, %91 : vector<16x64xf32>
    %93 = arith.addf %87, %92 : vector<16x64xf32>
    %c0_60 = arith.constant 0 : index
    %c15_61 = arith.constant 15 : index
    %c0_62 = arith.constant 0 : index
    %94 = vector.load %arg3[%c0_60, %c15_61, %c0_62] : memref<1x90x64xf32, #tpu.memory_space<vmem>>, vector<1x1x64xf32>
    %95 = vector.shape_cast %94 : vector<1x1x64xf32> to vector<1x64xf32>
    %c1_63 = arith.constant 1 : index
    %c1_64 = arith.constant 1 : index
    %96 = vector.load %arg6[%c1_63, %c1_64] : memref<18x80xf32, #tpu.memory_space<vmem>>, vector<16x64xf32>
    %97 = vector.broadcast %95 : vector<1x64xf32> to vector<16x64xf32>
    %98 = arith.mulf %96, %97 : vector<16x64xf32>
    %99 = arith.addf %93, %98 : vector<16x64xf32>
    %c0_65 = arith.constant 0 : index
    %c16 = arith.constant 16 : index
    %c0_66 = arith.constant 0 : index
    %100 = vector.load %arg3[%c0_65, %c16, %c0_66] : memref<1x90x64xf32, #tpu.memory_space<vmem>>, vector<1x1x64xf32>
    %101 = vector.shape_cast %100 : vector<1x1x64xf32> to vector<1x64xf32>
    %c1_67 = arith.constant 1 : index
    %c2_68 = arith.constant 2 : index
    %102 = vector.load %arg6[%c1_67, %c2_68] : memref<18x80xf32, #tpu.memory_space<vmem>>, vector<16x64xf32>
    %103 = vector.broadcast %101 : vector<1x64xf32> to vector<16x64xf32>
    %104 = arith.mulf %102, %103 : vector<16x64xf32>
    %105 = arith.addf %99, %104 : vector<16x64xf32>
    %c0_69 = arith.constant 0 : index
    %c17 = arith.constant 17 : index
    %c0_70 = arith.constant 0 : index
    %106 = vector.load %arg3[%c0_69, %c17, %c0_70] : memref<1x90x64xf32, #tpu.memory_space<vmem>>, vector<1x1x64xf32>
    %107 = vector.shape_cast %106 : vector<1x1x64xf32> to vector<1x64xf32>
    %c1_71 = arith.constant 1 : index
    %c3_72 = arith.constant 3 : index
    %108 = vector.load %arg6[%c1_71, %c3_72] : memref<18x80xf32, #tpu.memory_space<vmem>>, vector<16x64xf32>
    %109 = vector.broadcast %107 : vector<1x64xf32> to vector<16x64xf32>
    %110 = arith.mulf %108, %109 : vector<16x64xf32>
    %111 = arith.addf %105, %110 : vector<16x64xf32>
    %c0_73 = arith.constant 0 : index
    %c18 = arith.constant 18 : index
    %c0_74 = arith.constant 0 : index
    %112 = vector.load %arg3[%c0_73, %c18, %c0_74] : memref<1x90x64xf32, #tpu.memory_space<vmem>>, vector<1x1x64xf32>
    %113 = vector.shape_cast %112 : vector<1x1x64xf32> to vector<1x64xf32>
    %c1_75 = arith.constant 1 : index
    %c4_76 = arith.constant 4 : index
    %114 = vector.load %arg6[%c1_75, %c4_76] : memref<18x80xf32, #tpu.memory_space<vmem>>, vector<16x64xf32>
    %115 = vector.broadcast %113 : vector<1x64xf32> to vector<16x64xf32>
    %116 = arith.mulf %114, %115 : vector<16x64xf32>
    %117 = arith.addf %111, %116 : vector<16x64xf32>
    %c0_77 = arith.constant 0 : index
    %c19 = arith.constant 19 : index
    %c0_78 = arith.constant 0 : index
    %118 = vector.load %arg3[%c0_77, %c19, %c0_78] : memref<1x90x64xf32, #tpu.memory_space<vmem>>, vector<1x1x64xf32>
    %119 = vector.shape_cast %118 : vector<1x1x64xf32> to vector<1x64xf32>
    %c1_79 = arith.constant 1 : index
    %c5_80 = arith.constant 5 : index
    %120 = vector.load %arg6[%c1_79, %c5_80] : memref<18x80xf32, #tpu.memory_space<vmem>>, vector<16x64xf32>
    %121 = vector.broadcast %119 : vector<1x64xf32> to vector<16x64xf32>
    %122 = arith.mulf %120, %121 : vector<16x64xf32>
    %123 = arith.addf %117, %122 : vector<16x64xf32>
    %c0_81 = arith.constant 0 : index
    %c20 = arith.constant 20 : index
    %c0_82 = arith.constant 0 : index
    %124 = vector.load %arg3[%c0_81, %c20, %c0_82] : memref<1x90x64xf32, #tpu.memory_space<vmem>>, vector<1x1x64xf32>
    %125 = vector.shape_cast %124 : vector<1x1x64xf32> to vector<1x64xf32>
    %c1_83 = arith.constant 1 : index
    %c6_84 = arith.constant 6 : index
    %126 = vector.load %arg6[%c1_83, %c6_84] : memref<18x80xf32, #tpu.memory_space<vmem>>, vector<16x64xf32>
    %127 = vector.broadcast %125 : vector<1x64xf32> to vector<16x64xf32>
    %128 = arith.mulf %126, %127 : vector<16x64xf32>
    %129 = arith.addf %123, %128 : vector<16x64xf32>
    %c0_85 = arith.constant 0 : index
    %c21 = arith.constant 21 : index
    %c0_86 = arith.constant 0 : index
    %130 = vector.load %arg3[%c0_85, %c21, %c0_86] : memref<1x90x64xf32, #tpu.memory_space<vmem>>, vector<1x1x64xf32>
    %131 = vector.shape_cast %130 : vector<1x1x64xf32> to vector<1x64xf32>
    %c1_87 = arith.constant 1 : index
    %c7_88 = arith.constant 7 : index
    %132 = vector.load %arg6[%c1_87, %c7_88] : memref<18x80xf32, #tpu.memory_space<vmem>>, vector<16x64xf32>
    %133 = vector.broadcast %131 : vector<1x64xf32> to vector<16x64xf32>
    %134 = arith.mulf %132, %133 : vector<16x64xf32>
    %135 = arith.addf %129, %134 : vector<16x64xf32>
    %c0_89 = arith.constant 0 : index
    %c22 = arith.constant 22 : index
    %c0_90 = arith.constant 0 : index
    %136 = vector.load %arg3[%c0_89, %c22, %c0_90] : memref<1x90x64xf32, #tpu.memory_space<vmem>>, vector<1x1x64xf32>
    %137 = vector.shape_cast %136 : vector<1x1x64xf32> to vector<1x64xf32>
    %c1_91 = arith.constant 1 : index
    %c8_92 = arith.constant 8 : index
    %138 = vector.load %arg6[%c1_91, %c8_92] : memref<18x80xf32, #tpu.memory_space<vmem>>, vector<16x64xf32>
    %139 = vector.broadcast %137 : vector<1x64xf32> to vector<16x64xf32>
    %140 = arith.mulf %138, %139 : vector<16x64xf32>
    %141 = arith.addf %135, %140 : vector<16x64xf32>
    %c0_93 = arith.constant 0 : index
    %c23 = arith.constant 23 : index
    %c0_94 = arith.constant 0 : index
    %142 = vector.load %arg3[%c0_93, %c23, %c0_94] : memref<1x90x64xf32, #tpu.memory_space<vmem>>, vector<1x1x64xf32>
    %143 = vector.shape_cast %142 : vector<1x1x64xf32> to vector<1x64xf32>
    %c1_95 = arith.constant 1 : index
    %c9_96 = arith.constant 9 : index
    %144 = vector.load %arg6[%c1_95, %c9_96] : memref<18x80xf32, #tpu.memory_space<vmem>>, vector<16x64xf32>
    %145 = vector.broadcast %143 : vector<1x64xf32> to vector<16x64xf32>
    %146 = arith.mulf %144, %145 : vector<16x64xf32>
    %147 = arith.addf %141, %146 : vector<16x64xf32>
    %c0_97 = arith.constant 0 : index
    %c24 = arith.constant 24 : index
    %c0_98 = arith.constant 0 : index
    %148 = vector.load %arg3[%c0_97, %c24, %c0_98] : memref<1x90x64xf32, #tpu.memory_space<vmem>>, vector<1x1x64xf32>
    %149 = vector.shape_cast %148 : vector<1x1x64xf32> to vector<1x64xf32>
    %c1_99 = arith.constant 1 : index
    %c10_100 = arith.constant 10 : index
    %150 = vector.load %arg6[%c1_99, %c10_100] : memref<18x80xf32, #tpu.memory_space<vmem>>, vector<16x64xf32>
    %151 = vector.broadcast %149 : vector<1x64xf32> to vector<16x64xf32>
    %152 = arith.mulf %150, %151 : vector<16x64xf32>
    %153 = arith.addf %147, %152 : vector<16x64xf32>
    %c0_101 = arith.constant 0 : index
    %c25 = arith.constant 25 : index
    %c0_102 = arith.constant 0 : index
    %154 = vector.load %arg3[%c0_101, %c25, %c0_102] : memref<1x90x64xf32, #tpu.memory_space<vmem>>, vector<1x1x64xf32>
    %155 = vector.shape_cast %154 : vector<1x1x64xf32> to vector<1x64xf32>
    %c1_103 = arith.constant 1 : index
    %c11_104 = arith.constant 11 : index
    %156 = vector.load %arg6[%c1_103, %c11_104] : memref<18x80xf32, #tpu.memory_space<vmem>>, vector<16x64xf32>
    %157 = vector.broadcast %155 : vector<1x64xf32> to vector<16x64xf32>
    %158 = arith.mulf %156, %157 : vector<16x64xf32>
    %159 = arith.addf %153, %158 : vector<16x64xf32>
    %c0_105 = arith.constant 0 : index
    %c26 = arith.constant 26 : index
    %c0_106 = arith.constant 0 : index
    %160 = vector.load %arg3[%c0_105, %c26, %c0_106] : memref<1x90x64xf32, #tpu.memory_space<vmem>>, vector<1x1x64xf32>
    %161 = vector.shape_cast %160 : vector<1x1x64xf32> to vector<1x64xf32>
    %c1_107 = arith.constant 1 : index
    %c12_108 = arith.constant 12 : index
    %162 = vector.load %arg6[%c1_107, %c12_108] : memref<18x80xf32, #tpu.memory_space<vmem>>, vector<16x64xf32>
    %163 = vector.broadcast %161 : vector<1x64xf32> to vector<16x64xf32>
    %164 = arith.mulf %162, %163 : vector<16x64xf32>
    %165 = arith.addf %159, %164 : vector<16x64xf32>
    %c0_109 = arith.constant 0 : index
    %c27 = arith.constant 27 : index
    %c0_110 = arith.constant 0 : index
    %166 = vector.load %arg3[%c0_109, %c27, %c0_110] : memref<1x90x64xf32, #tpu.memory_space<vmem>>, vector<1x1x64xf32>
    %167 = vector.shape_cast %166 : vector<1x1x64xf32> to vector<1x64xf32>
    %c1_111 = arith.constant 1 : index
    %c13_112 = arith.constant 13 : index
    %168 = vector.load %arg6[%c1_111, %c13_112] : memref<18x80xf32, #tpu.memory_space<vmem>>, vector<16x64xf32>
    %169 = vector.broadcast %167 : vector<1x64xf32> to vector<16x64xf32>
    %170 = arith.mulf %168, %169 : vector<16x64xf32>
    %171 = arith.addf %165, %170 : vector<16x64xf32>
    %c0_113 = arith.constant 0 : index
    %c28 = arith.constant 28 : index
    %c0_114 = arith.constant 0 : index
    %172 = vector.load %arg3[%c0_113, %c28, %c0_114] : memref<1x90x64xf32, #tpu.memory_space<vmem>>, vector<1x1x64xf32>
    %173 = vector.shape_cast %172 : vector<1x1x64xf32> to vector<1x64xf32>
    %c1_115 = arith.constant 1 : index
    %c14_116 = arith.constant 14 : index
    %174 = vector.load %arg6[%c1_115, %c14_116] : memref<18x80xf32, #tpu.memory_space<vmem>>, vector<16x64xf32>
    %175 = vector.broadcast %173 : vector<1x64xf32> to vector<16x64xf32>
    %176 = arith.mulf %174, %175 : vector<16x64xf32>
    %177 = arith.addf %171, %176 : vector<16x64xf32>
    %c0_117 = arith.constant 0 : index
    %c29 = arith.constant 29 : index
    %c0_118 = arith.constant 0 : index
    %178 = vector.load %arg3[%c0_117, %c29, %c0_118] : memref<1x90x64xf32, #tpu.memory_space<vmem>>, vector<1x1x64xf32>
    %179 = vector.shape_cast %178 : vector<1x1x64xf32> to vector<1x64xf32>
    %c1_119 = arith.constant 1 : index
    %c15_120 = arith.constant 15 : index
    %180 = vector.load %arg6[%c1_119, %c15_120] : memref<18x80xf32, #tpu.memory_space<vmem>>, vector<16x64xf32>
    %181 = vector.broadcast %179 : vector<1x64xf32> to vector<16x64xf32>
    %182 = arith.mulf %180, %181 : vector<16x64xf32>
    %183 = arith.addf %177, %182 : vector<16x64xf32>
    %c0_121 = arith.constant 0 : index
    %c30 = arith.constant 30 : index
    %c0_122 = arith.constant 0 : index
    %184 = vector.load %arg3[%c0_121, %c30, %c0_122] : memref<1x90x64xf32, #tpu.memory_space<vmem>>, vector<1x1x64xf32>
    %185 = vector.shape_cast %184 : vector<1x1x64xf32> to vector<1x64xf32>
    %c2_123 = arith.constant 2 : index
    %c1_124 = arith.constant 1 : index
    %186 = vector.load %arg6[%c2_123, %c1_124] : memref<18x80xf32, #tpu.memory_space<vmem>>, vector<16x64xf32>
    %187 = vector.broadcast %185 : vector<1x64xf32> to vector<16x64xf32>
    %188 = arith.mulf %186, %187 : vector<16x64xf32>
    %189 = arith.addf %183, %188 : vector<16x64xf32>
    %c0_125 = arith.constant 0 : index
    %c31 = arith.constant 31 : index
    %c0_126 = arith.constant 0 : index
    %190 = vector.load %arg3[%c0_125, %c31, %c0_126] : memref<1x90x64xf32, #tpu.memory_space<vmem>>, vector<1x1x64xf32>
    %191 = vector.shape_cast %190 : vector<1x1x64xf32> to vector<1x64xf32>
    %c2_127 = arith.constant 2 : index
    %c2_128 = arith.constant 2 : index
    %192 = vector.load %arg6[%c2_127, %c2_128] : memref<18x80xf32, #tpu.memory_space<vmem>>, vector<16x64xf32>
    %193 = vector.broadcast %191 : vector<1x64xf32> to vector<16x64xf32>
    %194 = arith.mulf %192, %193 : vector<16x64xf32>
    %195 = arith.addf %189, %194 : vector<16x64xf32>
    %c0_129 = arith.constant 0 : index
    %c32 = arith.constant 32 : index
    %c0_130 = arith.constant 0 : index
    %196 = vector.load %arg3[%c0_129, %c32, %c0_130] : memref<1x90x64xf32, #tpu.memory_space<vmem>>, vector<1x1x64xf32>
    %197 = vector.shape_cast %196 : vector<1x1x64xf32> to vector<1x64xf32>
    %c2_131 = arith.constant 2 : index
    %c3_132 = arith.constant 3 : index
    %198 = vector.load %arg6[%c2_131, %c3_132] : memref<18x80xf32, #tpu.memory_space<vmem>>, vector<16x64xf32>
    %199 = vector.broadcast %197 : vector<1x64xf32> to vector<16x64xf32>
    %200 = arith.mulf %198, %199 : vector<16x64xf32>
    %201 = arith.addf %195, %200 : vector<16x64xf32>
    %c0_133 = arith.constant 0 : index
    %c33 = arith.constant 33 : index
    %c0_134 = arith.constant 0 : index
    %202 = vector.load %arg3[%c0_133, %c33, %c0_134] : memref<1x90x64xf32, #tpu.memory_space<vmem>>, vector<1x1x64xf32>
    %203 = vector.shape_cast %202 : vector<1x1x64xf32> to vector<1x64xf32>
    %c2_135 = arith.constant 2 : index
    %c4_136 = arith.constant 4 : index
    %204 = vector.load %arg6[%c2_135, %c4_136] : memref<18x80xf32, #tpu.memory_space<vmem>>, vector<16x64xf32>
    %205 = vector.broadcast %203 : vector<1x64xf32> to vector<16x64xf32>
    %206 = arith.mulf %204, %205 : vector<16x64xf32>
    %207 = arith.addf %201, %206 : vector<16x64xf32>
    %c0_137 = arith.constant 0 : index
    %c34 = arith.constant 34 : index
    %c0_138 = arith.constant 0 : index
    %208 = vector.load %arg3[%c0_137, %c34, %c0_138] : memref<1x90x64xf32, #tpu.memory_space<vmem>>, vector<1x1x64xf32>
    %209 = vector.shape_cast %208 : vector<1x1x64xf32> to vector<1x64xf32>
    %c2_139 = arith.constant 2 : index
    %c5_140 = arith.constant 5 : index
    %210 = vector.load %arg6[%c2_139, %c5_140] : memref<18x80xf32, #tpu.memory_space<vmem>>, vector<16x64xf32>
    %211 = vector.broadcast %209 : vector<1x64xf32> to vector<16x64xf32>
    %212 = arith.mulf %210, %211 : vector<16x64xf32>
    %213 = arith.addf %207, %212 : vector<16x64xf32>
    %c0_141 = arith.constant 0 : index
    %c35 = arith.constant 35 : index
    %c0_142 = arith.constant 0 : index
    %214 = vector.load %arg3[%c0_141, %c35, %c0_142] : memref<1x90x64xf32, #tpu.memory_space<vmem>>, vector<1x1x64xf32>
    %215 = vector.shape_cast %214 : vector<1x1x64xf32> to vector<1x64xf32>
    %c2_143 = arith.constant 2 : index
    %c6_144 = arith.constant 6 : index
    %216 = vector.load %arg6[%c2_143, %c6_144] : memref<18x80xf32, #tpu.memory_space<vmem>>, vector<16x64xf32>
    %217 = vector.broadcast %215 : vector<1x64xf32> to vector<16x64xf32>
    %218 = arith.mulf %216, %217 : vector<16x64xf32>
    %219 = arith.addf %213, %218 : vector<16x64xf32>
    %c0_145 = arith.constant 0 : index
    %c36 = arith.constant 36 : index
    %c0_146 = arith.constant 0 : index
    %220 = vector.load %arg3[%c0_145, %c36, %c0_146] : memref<1x90x64xf32, #tpu.memory_space<vmem>>, vector<1x1x64xf32>
    %221 = vector.shape_cast %220 : vector<1x1x64xf32> to vector<1x64xf32>
    %c2_147 = arith.constant 2 : index
    %c7_148 = arith.constant 7 : index
    %222 = vector.load %arg6[%c2_147, %c7_148] : memref<18x80xf32, #tpu.memory_space<vmem>>, vector<16x64xf32>
    %223 = vector.broadcast %221 : vector<1x64xf32> to vector<16x64xf32>
    %224 = arith.mulf %222, %223 : vector<16x64xf32>
    %225 = arith.addf %219, %224 : vector<16x64xf32>
    %c0_149 = arith.constant 0 : index
    %c37 = arith.constant 37 : index
    %c0_150 = arith.constant 0 : index
    %226 = vector.load %arg3[%c0_149, %c37, %c0_150] : memref<1x90x64xf32, #tpu.memory_space<vmem>>, vector<1x1x64xf32>
    %227 = vector.shape_cast %226 : vector<1x1x64xf32> to vector<1x64xf32>
    %c2_151 = arith.constant 2 : index
    %c8_152 = arith.constant 8 : index
    %228 = vector.load %arg6[%c2_151, %c8_152] : memref<18x80xf32, #tpu.memory_space<vmem>>, vector<16x64xf32>
    %229 = vector.broadcast %227 : vector<1x64xf32> to vector<16x64xf32>
    %230 = arith.mulf %228, %229 : vector<16x64xf32>
    %231 = arith.addf %225, %230 : vector<16x64xf32>
    %c0_153 = arith.constant 0 : index
    %c38 = arith.constant 38 : index
    %c0_154 = arith.constant 0 : index
    %232 = vector.load %arg3[%c0_153, %c38, %c0_154] : memref<1x90x64xf32, #tpu.memory_space<vmem>>, vector<1x1x64xf32>
    %233 = vector.shape_cast %232 : vector<1x1x64xf32> to vector<1x64xf32>
    %c2_155 = arith.constant 2 : index
    %c9_156 = arith.constant 9 : index
    %234 = vector.load %arg6[%c2_155, %c9_156] : memref<18x80xf32, #tpu.memory_space<vmem>>, vector<16x64xf32>
    %235 = vector.broadcast %233 : vector<1x64xf32> to vector<16x64xf32>
    %236 = arith.mulf %234, %235 : vector<16x64xf32>
    %237 = arith.addf %231, %236 : vector<16x64xf32>
    %c0_157 = arith.constant 0 : index
    %c39 = arith.constant 39 : index
    %c0_158 = arith.constant 0 : index
    %238 = vector.load %arg3[%c0_157, %c39, %c0_158] : memref<1x90x64xf32, #tpu.memory_space<vmem>>, vector<1x1x64xf32>
    %239 = vector.shape_cast %238 : vector<1x1x64xf32> to vector<1x64xf32>
    %c2_159 = arith.constant 2 : index
    %c10_160 = arith.constant 10 : index
    %240 = vector.load %arg6[%c2_159, %c10_160] : memref<18x80xf32, #tpu.memory_space<vmem>>, vector<16x64xf32>
    %241 = vector.broadcast %239 : vector<1x64xf32> to vector<16x64xf32>
    %242 = arith.mulf %240, %241 : vector<16x64xf32>
    %243 = arith.addf %237, %242 : vector<16x64xf32>
    %c0_161 = arith.constant 0 : index
    %c40 = arith.constant 40 : index
    %c0_162 = arith.constant 0 : index
    %244 = vector.load %arg3[%c0_161, %c40, %c0_162] : memref<1x90x64xf32, #tpu.memory_space<vmem>>, vector<1x1x64xf32>
    %245 = vector.shape_cast %244 : vector<1x1x64xf32> to vector<1x64xf32>
    %c2_163 = arith.constant 2 : index
    %c11_164 = arith.constant 11 : index
    %246 = vector.load %arg6[%c2_163, %c11_164] : memref<18x80xf32, #tpu.memory_space<vmem>>, vector<16x64xf32>
    %247 = vector.broadcast %245 : vector<1x64xf32> to vector<16x64xf32>
    %248 = arith.mulf %246, %247 : vector<16x64xf32>
    %249 = arith.addf %243, %248 : vector<16x64xf32>
    %c0_165 = arith.constant 0 : index
    %c41 = arith.constant 41 : index
    %c0_166 = arith.constant 0 : index
    %250 = vector.load %arg3[%c0_165, %c41, %c0_166] : memref<1x90x64xf32, #tpu.memory_space<vmem>>, vector<1x1x64xf32>
    %251 = vector.shape_cast %250 : vector<1x1x64xf32> to vector<1x64xf32>
    %c2_167 = arith.constant 2 : index
    %c12_168 = arith.constant 12 : index
    %252 = vector.load %arg6[%c2_167, %c12_168] : memref<18x80xf32, #tpu.memory_space<vmem>>, vector<16x64xf32>
    %253 = vector.broadcast %251 : vector<1x64xf32> to vector<16x64xf32>
    %254 = arith.mulf %252, %253 : vector<16x64xf32>
    %255 = arith.addf %249, %254 : vector<16x64xf32>
    %c0_169 = arith.constant 0 : index
    %c42 = arith.constant 42 : index
    %c0_170 = arith.constant 0 : index
    %256 = vector.load %arg3[%c0_169, %c42, %c0_170] : memref<1x90x64xf32, #tpu.memory_space<vmem>>, vector<1x1x64xf32>
    %257 = vector.shape_cast %256 : vector<1x1x64xf32> to vector<1x64xf32>
    %c2_171 = arith.constant 2 : index
    %c13_172 = arith.constant 13 : index
    %258 = vector.load %arg6[%c2_171, %c13_172] : memref<18x80xf32, #tpu.memory_space<vmem>>, vector<16x64xf32>
    %259 = vector.broadcast %257 : vector<1x64xf32> to vector<16x64xf32>
    %260 = arith.mulf %258, %259 : vector<16x64xf32>
    %261 = arith.addf %255, %260 : vector<16x64xf32>
    %c0_173 = arith.constant 0 : index
    %c43 = arith.constant 43 : index
    %c0_174 = arith.constant 0 : index
    %262 = vector.load %arg3[%c0_173, %c43, %c0_174] : memref<1x90x64xf32, #tpu.memory_space<vmem>>, vector<1x1x64xf32>
    %263 = vector.shape_cast %262 : vector<1x1x64xf32> to vector<1x64xf32>
    %c2_175 = arith.constant 2 : index
    %c14_176 = arith.constant 14 : index
    %264 = vector.load %arg6[%c2_175, %c14_176] : memref<18x80xf32, #tpu.memory_space<vmem>>, vector<16x64xf32>
    %265 = vector.broadcast %263 : vector<1x64xf32> to vector<16x64xf32>
    %266 = arith.mulf %264, %265 : vector<16x64xf32>
    %267 = arith.addf %261, %266 : vector<16x64xf32>
    %c0_177 = arith.constant 0 : index
    %c44 = arith.constant 44 : index
    %c0_178 = arith.constant 0 : index
    %268 = vector.load %arg3[%c0_177, %c44, %c0_178] : memref<1x90x64xf32, #tpu.memory_space<vmem>>, vector<1x1x64xf32>
    %269 = vector.shape_cast %268 : vector<1x1x64xf32> to vector<1x64xf32>
    %c2_179 = arith.constant 2 : index
    %c15_180 = arith.constant 15 : index
    %270 = vector.load %arg6[%c2_179, %c15_180] : memref<18x80xf32, #tpu.memory_space<vmem>>, vector<16x64xf32>
    %271 = vector.broadcast %269 : vector<1x64xf32> to vector<16x64xf32>
    %272 = arith.mulf %270, %271 : vector<16x64xf32>
    %273 = arith.addf %267, %272 : vector<16x64xf32>
    %cst_181 = arith.constant 0.000000e+00 : f32
    %274 = vector.broadcast %cst_181 : f32 to vector<16x64xf32>
    %275 = arith.maximumf %273, %274 : vector<16x64xf32>
    %c1_182 = arith.constant 1 : index
    %c8_183 = arith.constant 8 : index
    %276 = vector.load %arg7[%c1_182, %c8_183] : memref<18x80xf32, #tpu.memory_space<vmem>>, vector<16x64xf32>
    tpu.vector_store %arg7[%c1_182, %c8_183], %275 {strides = array<i32>} : memref<18x80xf32, #tpu.memory_space<vmem>>, vector<16x64xf32>,
    %cst_184 = arith.constant 0.000000e+00 : f32
    %277 = vector.broadcast %cst_184 : f32 to vector<16x64xf32>
    %c0_185 = arith.constant 0 : index
    %c45 = arith.constant 45 : index
    %c0_186 = arith.constant 0 : index
    %278 = vector.load %arg3[%c0_185, %c45, %c0_186] : memref<1x90x64xf32, #tpu.memory_space<vmem>>, vector<1x1x64xf32>
    %279 = vector.shape_cast %278 : vector<1x1x64xf32> to vector<1x64xf32>
    %c0_187 = arith.constant 0 : index
    %c1_188 = arith.constant 1 : index
    %280 = vector.load %arg7[%c0_187, %c1_188] : memref<18x80xf32, #tpu.memory_space<vmem>>, vector<16x64xf32>
    %281 = vector.broadcast %279 : vector<1x64xf32> to vector<16x64xf32>
    %282 = arith.mulf %280, %281 : vector<16x64xf32>
    %283 = arith.addf %277, %282 : vector<16x64xf32>
    %c0_189 = arith.constant 0 : index
    %c46 = arith.constant 46 : index
    %c0_190 = arith.constant 0 : index
    %284 = vector.load %arg3[%c0_189, %c46, %c0_190] : memref<1x90x64xf32, #tpu.memory_space<vmem>>, vector<1x1x64xf32>
    %285 = vector.shape_cast %284 : vector<1x1x64xf32> to vector<1x64xf32>
    %c0_191 = arith.constant 0 : index
    %c2_192 = arith.constant 2 : index
    %286 = vector.load %arg7[%c0_191, %c2_192] : memref<18x80xf32, #tpu.memory_space<vmem>>, vector<16x64xf32>
    %287 = vector.broadcast %285 : vector<1x64xf32> to vector<16x64xf32>
    %288 = arith.mulf %286, %287 : vector<16x64xf32>
    %289 = arith.addf %283, %288 : vector<16x64xf32>
    %c0_193 = arith.constant 0 : index
    %c47 = arith.constant 47 : index
    %c0_194 = arith.constant 0 : index
    %290 = vector.load %arg3[%c0_193, %c47, %c0_194] : memref<1x90x64xf32, #tpu.memory_space<vmem>>, vector<1x1x64xf32>
    %291 = vector.shape_cast %290 : vector<1x1x64xf32> to vector<1x64xf32>
    %c0_195 = arith.constant 0 : index
    %c3_196 = arith.constant 3 : index
    %292 = vector.load %arg7[%c0_195, %c3_196] : memref<18x80xf32, #tpu.memory_space<vmem>>, vector<16x64xf32>
    %293 = vector.broadcast %291 : vector<1x64xf32> to vector<16x64xf32>
    %294 = arith.mulf %292, %293 : vector<16x64xf32>
    %295 = arith.addf %289, %294 : vector<16x64xf32>
    %c0_197 = arith.constant 0 : index
    %c48 = arith.constant 48 : index
    %c0_198 = arith.constant 0 : index
    %296 = vector.load %arg3[%c0_197, %c48, %c0_198] : memref<1x90x64xf32, #tpu.memory_space<vmem>>, vector<1x1x64xf32>
    %297 = vector.shape_cast %296 : vector<1x1x64xf32> to vector<1x64xf32>
    %c0_199 = arith.constant 0 : index
    %c4_200 = arith.constant 4 : index
    %298 = vector.load %arg7[%c0_199, %c4_200] : memref<18x80xf32, #tpu.memory_space<vmem>>, vector<16x64xf32>
    %299 = vector.broadcast %297 : vector<1x64xf32> to vector<16x64xf32>
    %300 = arith.mulf %298, %299 : vector<16x64xf32>
    %301 = arith.addf %295, %300 : vector<16x64xf32>
    %c0_201 = arith.constant 0 : index
    %c49 = arith.constant 49 : index
    %c0_202 = arith.constant 0 : index
    %302 = vector.load %arg3[%c0_201, %c49, %c0_202] : memref<1x90x64xf32, #tpu.memory_space<vmem>>, vector<1x1x64xf32>
    %303 = vector.shape_cast %302 : vector<1x1x64xf32> to vector<1x64xf32>
    %c0_203 = arith.constant 0 : index
    %c5_204 = arith.constant 5 : index
    %304 = vector.load %arg7[%c0_203, %c5_204] : memref<18x80xf32, #tpu.memory_space<vmem>>, vector<16x64xf32>
    %305 = vector.broadcast %303 : vector<1x64xf32> to vector<16x64xf32>
    %306 = arith.mulf %304, %305 : vector<16x64xf32>
    %307 = arith.addf %301, %306 : vector<16x64xf32>
    %c0_205 = arith.constant 0 : index
    %c50 = arith.constant 50 : index
    %c0_206 = arith.constant 0 : index
    %308 = vector.load %arg3[%c0_205, %c50, %c0_206] : memref<1x90x64xf32, #tpu.memory_space<vmem>>, vector<1x1x64xf32>
    %309 = vector.shape_cast %308 : vector<1x1x64xf32> to vector<1x64xf32>
    %c0_207 = arith.constant 0 : index
    %c6_208 = arith.constant 6 : index
    %310 = vector.load %arg7[%c0_207, %c6_208] : memref<18x80xf32, #tpu.memory_space<vmem>>, vector<16x64xf32>
    %311 = vector.broadcast %309 : vector<1x64xf32> to vector<16x64xf32>
    %312 = arith.mulf %310, %311 : vector<16x64xf32>
    %313 = arith.addf %307, %312 : vector<16x64xf32>
    %c0_209 = arith.constant 0 : index
    %c51 = arith.constant 51 : index
    %c0_210 = arith.constant 0 : index
    %314 = vector.load %arg3[%c0_209, %c51, %c0_210] : memref<1x90x64xf32, #tpu.memory_space<vmem>>, vector<1x1x64xf32>
    %315 = vector.shape_cast %314 : vector<1x1x64xf32> to vector<1x64xf32>
    %c0_211 = arith.constant 0 : index
    %c7_212 = arith.constant 7 : index
    %316 = vector.load %arg7[%c0_211, %c7_212] : memref<18x80xf32, #tpu.memory_space<vmem>>, vector<16x64xf32>
    %317 = vector.broadcast %315 : vector<1x64xf32> to vector<16x64xf32>
    %318 = arith.mulf %316, %317 : vector<16x64xf32>
    %319 = arith.addf %313, %318 : vector<16x64xf32>
    %c0_213 = arith.constant 0 : index
    %c52 = arith.constant 52 : index
    %c0_214 = arith.constant 0 : index
    %320 = vector.load %arg3[%c0_213, %c52, %c0_214] : memref<1x90x64xf32, #tpu.memory_space<vmem>>, vector<1x1x64xf32>
    %321 = vector.shape_cast %320 : vector<1x1x64xf32> to vector<1x64xf32>
    %c0_215 = arith.constant 0 : index
    %c8_216 = arith.constant 8 : index
    %322 = vector.load %arg7[%c0_215, %c8_216] : memref<18x80xf32, #tpu.memory_space<vmem>>, vector<16x64xf32>
    %323 = vector.broadcast %321 : vector<1x64xf32> to vector<16x64xf32>
    %324 = arith.mulf %322, %323 : vector<16x64xf32>
    %325 = arith.addf %319, %324 : vector<16x64xf32>
    %c0_217 = arith.constant 0 : index
    %c53 = arith.constant 53 : index
    %c0_218 = arith.constant 0 : index
    %326 = vector.load %arg3[%c0_217, %c53, %c0_218] : memref<1x90x64xf32, #tpu.memory_space<vmem>>, vector<1x1x64xf32>
    %327 = vector.shape_cast %326 : vector<1x1x64xf32> to vector<1x64xf32>
    %c0_219 = arith.constant 0 : index
    %c9_220 = arith.constant 9 : index
    %328 = vector.load %arg7[%c0_219, %c9_220] : memref<18x80xf32, #tpu.memory_space<vmem>>, vector<16x64xf32>
    %329 = vector.broadcast %327 : vector<1x64xf32> to vector<16x64xf32>
    %330 = arith.mulf %328, %329 : vector<16x64xf32>
    %331 = arith.addf %325, %330 : vector<16x64xf32>
    %c0_221 = arith.constant 0 : index
    %c54 = arith.constant 54 : index
    %c0_222 = arith.constant 0 : index
    %332 = vector.load %arg3[%c0_221, %c54, %c0_222] : memref<1x90x64xf32, #tpu.memory_space<vmem>>, vector<1x1x64xf32>
    %333 = vector.shape_cast %332 : vector<1x1x64xf32> to vector<1x64xf32>
    %c0_223 = arith.constant 0 : index
    %c10_224 = arith.constant 10 : index
    %334 = vector.load %arg7[%c0_223, %c10_224] : memref<18x80xf32, #tpu.memory_space<vmem>>, vector<16x64xf32>
    %335 = vector.broadcast %333 : vector<1x64xf32> to vector<16x64xf32>
    %336 = arith.mulf %334, %335 : vector<16x64xf32>
    %337 = arith.addf %331, %336 : vector<16x64xf32>
    %c0_225 = arith.constant 0 : index
    %c55 = arith.constant 55 : index
    %c0_226 = arith.constant 0 : index
    %338 = vector.load %arg3[%c0_225, %c55, %c0_226] : memref<1x90x64xf32, #tpu.memory_space<vmem>>, vector<1x1x64xf32>
    %339 = vector.shape_cast %338 : vector<1x1x64xf32> to vector<1x64xf32>
    %c0_227 = arith.constant 0 : index
    %c11_228 = arith.constant 11 : index
    %340 = vector.load %arg7[%c0_227, %c11_228] : memref<18x80xf32, #tpu.memory_space<vmem>>, vector<16x64xf32>
    %341 = vector.broadcast %339 : vector<1x64xf32> to vector<16x64xf32>
    %342 = arith.mulf %340, %341 : vector<16x64xf32>
    %343 = arith.addf %337, %342 : vector<16x64xf32>
    %c0_229 = arith.constant 0 : index
    %c56 = arith.constant 56 : index
    %c0_230 = arith.constant 0 : index
    %344 = vector.load %arg3[%c0_229, %c56, %c0_230] : memref<1x90x64xf32, #tpu.memory_space<vmem>>, vector<1x1x64xf32>
    %345 = vector.shape_cast %344 : vector<1x1x64xf32> to vector<1x64xf32>
    %c0_231 = arith.constant 0 : index
    %c12_232 = arith.constant 12 : index
    %346 = vector.load %arg7[%c0_231, %c12_232] : memref<18x80xf32, #tpu.memory_space<vmem>>, vector<16x64xf32>
    %347 = vector.broadcast %345 : vector<1x64xf32> to vector<16x64xf32>
    %348 = arith.mulf %346, %347 : vector<16x64xf32>
    %349 = arith.addf %343, %348 : vector<16x64xf32>
    %c0_233 = arith.constant 0 : index
    %c57 = arith.constant 57 : index
    %c0_234 = arith.constant 0 : index
    %350 = vector.load %arg3[%c0_233, %c57, %c0_234] : memref<1x90x64xf32, #tpu.memory_space<vmem>>, vector<1x1x64xf32>
    %351 = vector.shape_cast %350 : vector<1x1x64xf32> to vector<1x64xf32>
    %c0_235 = arith.constant 0 : index
    %c13_236 = arith.constant 13 : index
    %352 = vector.load %arg7[%c0_235, %c13_236] : memref<18x80xf32, #tpu.memory_space<vmem>>, vector<16x64xf32>
    %353 = vector.broadcast %351 : vector<1x64xf32> to vector<16x64xf32>
    %354 = arith.mulf %352, %353 : vector<16x64xf32>
    %355 = arith.addf %349, %354 : vector<16x64xf32>
    %c0_237 = arith.constant 0 : index
    %c58 = arith.constant 58 : index
    %c0_238 = arith.constant 0 : index
    %356 = vector.load %arg3[%c0_237, %c58, %c0_238] : memref<1x90x64xf32, #tpu.memory_space<vmem>>, vector<1x1x64xf32>
    %357 = vector.shape_cast %356 : vector<1x1x64xf32> to vector<1x64xf32>
    %c0_239 = arith.constant 0 : index
    %c14_240 = arith.constant 14 : index
    %358 = vector.load %arg7[%c0_239, %c14_240] : memref<18x80xf32, #tpu.memory_space<vmem>>, vector<16x64xf32>
    %359 = vector.broadcast %357 : vector<1x64xf32> to vector<16x64xf32>
    %360 = arith.mulf %358, %359 : vector<16x64xf32>
    %361 = arith.addf %355, %360 : vector<16x64xf32>
    %c0_241 = arith.constant 0 : index
    %c59 = arith.constant 59 : index
    %c0_242 = arith.constant 0 : index
    %362 = vector.load %arg3[%c0_241, %c59, %c0_242] : memref<1x90x64xf32, #tpu.memory_space<vmem>>, vector<1x1x64xf32>
    %363 = vector.shape_cast %362 : vector<1x1x64xf32> to vector<1x64xf32>
    %c0_243 = arith.constant 0 : index
    %c15_244 = arith.constant 15 : index
    %364 = vector.load %arg7[%c0_243, %c15_244] : memref<18x80xf32, #tpu.memory_space<vmem>>, vector<16x64xf32>
    %365 = vector.broadcast %363 : vector<1x64xf32> to vector<16x64xf32>
    %366 = arith.mulf %364, %365 : vector<16x64xf32>
    %367 = arith.addf %361, %366 : vector<16x64xf32>
    %c0_245 = arith.constant 0 : index
    %c60 = arith.constant 60 : index
    %c0_246 = arith.constant 0 : index
    %368 = vector.load %arg3[%c0_245, %c60, %c0_246] : memref<1x90x64xf32, #tpu.memory_space<vmem>>, vector<1x1x64xf32>
    %369 = vector.shape_cast %368 : vector<1x1x64xf32> to vector<1x64xf32>
    %c1_247 = arith.constant 1 : index
    %c1_248 = arith.constant 1 : index
    %370 = vector.load %arg7[%c1_247, %c1_248] : memref<18x80xf32, #tpu.memory_space<vmem>>, vector<16x64xf32>
    %371 = vector.broadcast %369 : vector<1x64xf32> to vector<16x64xf32>
    %372 = arith.mulf %370, %371 : vector<16x64xf32>
    %373 = arith.addf %367, %372 : vector<16x64xf32>
    %c0_249 = arith.constant 0 : index
    %c61 = arith.constant 61 : index
    %c0_250 = arith.constant 0 : index
    %374 = vector.load %arg3[%c0_249, %c61, %c0_250] : memref<1x90x64xf32, #tpu.memory_space<vmem>>, vector<1x1x64xf32>
    %375 = vector.shape_cast %374 : vector<1x1x64xf32> to vector<1x64xf32>
    %c1_251 = arith.constant 1 : index
    %c2_252 = arith.constant 2 : index
    %376 = vector.load %arg7[%c1_251, %c2_252] : memref<18x80xf32, #tpu.memory_space<vmem>>, vector<16x64xf32>
    %377 = vector.broadcast %375 : vector<1x64xf32> to vector<16x64xf32>
    %378 = arith.mulf %376, %377 : vector<16x64xf32>
    %379 = arith.addf %373, %378 : vector<16x64xf32>
    %c0_253 = arith.constant 0 : index
    %c62 = arith.constant 62 : index
    %c0_254 = arith.constant 0 : index
    %380 = vector.load %arg3[%c0_253, %c62, %c0_254] : memref<1x90x64xf32, #tpu.memory_space<vmem>>, vector<1x1x64xf32>
    %381 = vector.shape_cast %380 : vector<1x1x64xf32> to vector<1x64xf32>
    %c1_255 = arith.constant 1 : index
    %c3_256 = arith.constant 3 : index
    %382 = vector.load %arg7[%c1_255, %c3_256] : memref<18x80xf32, #tpu.memory_space<vmem>>, vector<16x64xf32>
    %383 = vector.broadcast %381 : vector<1x64xf32> to vector<16x64xf32>
    %384 = arith.mulf %382, %383 : vector<16x64xf32>
    %385 = arith.addf %379, %384 : vector<16x64xf32>
    %c0_257 = arith.constant 0 : index
    %c63 = arith.constant 63 : index
    %c0_258 = arith.constant 0 : index
    %386 = vector.load %arg3[%c0_257, %c63, %c0_258] : memref<1x90x64xf32, #tpu.memory_space<vmem>>, vector<1x1x64xf32>
    %387 = vector.shape_cast %386 : vector<1x1x64xf32> to vector<1x64xf32>
    %c1_259 = arith.constant 1 : index
    %c4_260 = arith.constant 4 : index
    %388 = vector.load %arg7[%c1_259, %c4_260] : memref<18x80xf32, #tpu.memory_space<vmem>>, vector<16x64xf32>
    %389 = vector.broadcast %387 : vector<1x64xf32> to vector<16x64xf32>
    %390 = arith.mulf %388, %389 : vector<16x64xf32>
    %391 = arith.addf %385, %390 : vector<16x64xf32>
    %c0_261 = arith.constant 0 : index
    %c64 = arith.constant 64 : index
    %c0_262 = arith.constant 0 : index
    %392 = vector.load %arg3[%c0_261, %c64, %c0_262] : memref<1x90x64xf32, #tpu.memory_space<vmem>>, vector<1x1x64xf32>
    %393 = vector.shape_cast %392 : vector<1x1x64xf32> to vector<1x64xf32>
    %c1_263 = arith.constant 1 : index
    %c5_264 = arith.constant 5 : index
    %394 = vector.load %arg7[%c1_263, %c5_264] : memref<18x80xf32, #tpu.memory_space<vmem>>, vector<16x64xf32>
    %395 = vector.broadcast %393 : vector<1x64xf32> to vector<16x64xf32>
    %396 = arith.mulf %394, %395 : vector<16x64xf32>
    %397 = arith.addf %391, %396 : vector<16x64xf32>
    %c0_265 = arith.constant 0 : index
    %c65 = arith.constant 65 : index
    %c0_266 = arith.constant 0 : index
    %398 = vector.load %arg3[%c0_265, %c65, %c0_266] : memref<1x90x64xf32, #tpu.memory_space<vmem>>, vector<1x1x64xf32>
    %399 = vector.shape_cast %398 : vector<1x1x64xf32> to vector<1x64xf32>
    %c1_267 = arith.constant 1 : index
    %c6_268 = arith.constant 6 : index
    %400 = vector.load %arg7[%c1_267, %c6_268] : memref<18x80xf32, #tpu.memory_space<vmem>>, vector<16x64xf32>
    %401 = vector.broadcast %399 : vector<1x64xf32> to vector<16x64xf32>
    %402 = arith.mulf %400, %401 : vector<16x64xf32>
    %403 = arith.addf %397, %402 : vector<16x64xf32>
    %c0_269 = arith.constant 0 : index
    %c66 = arith.constant 66 : index
    %c0_270 = arith.constant 0 : index
    %404 = vector.load %arg3[%c0_269, %c66, %c0_270] : memref<1x90x64xf32, #tpu.memory_space<vmem>>, vector<1x1x64xf32>
    %405 = vector.shape_cast %404 : vector<1x1x64xf32> to vector<1x64xf32>
    %c1_271 = arith.constant 1 : index
    %c7_272 = arith.constant 7 : index
    %406 = vector.load %arg7[%c1_271, %c7_272] : memref<18x80xf32, #tpu.memory_space<vmem>>, vector<16x64xf32>
    %407 = vector.broadcast %405 : vector<1x64xf32> to vector<16x64xf32>
    %408 = arith.mulf %406, %407 : vector<16x64xf32>
    %409 = arith.addf %403, %408 : vector<16x64xf32>
    %c0_273 = arith.constant 0 : index
    %c67 = arith.constant 67 : index
    %c0_274 = arith.constant 0 : index
    %410 = vector.load %arg3[%c0_273, %c67, %c0_274] : memref<1x90x64xf32, #tpu.memory_space<vmem>>, vector<1x1x64xf32>
    %411 = vector.shape_cast %410 : vector<1x1x64xf32> to vector<1x64xf32>
    %c1_275 = arith.constant 1 : index
    %c8_276 = arith.constant 8 : index
    %412 = vector.load %arg7[%c1_275, %c8_276] : memref<18x80xf32, #tpu.memory_space<vmem>>, vector<16x64xf32>
    %413 = vector.broadcast %411 : vector<1x64xf32> to vector<16x64xf32>
    %414 = arith.mulf %412, %413 : vector<16x64xf32>
    %415 = arith.addf %409, %414 : vector<16x64xf32>
    %c0_277 = arith.constant 0 : index
    %c68 = arith.constant 68 : index
    %c0_278 = arith.constant 0 : index
    %416 = vector.load %arg3[%c0_277, %c68, %c0_278] : memref<1x90x64xf32, #tpu.memory_space<vmem>>, vector<1x1x64xf32>
    %417 = vector.shape_cast %416 : vector<1x1x64xf32> to vector<1x64xf32>
    %c1_279 = arith.constant 1 : index
    %c9_280 = arith.constant 9 : index
    %418 = vector.load %arg7[%c1_279, %c9_280] : memref<18x80xf32, #tpu.memory_space<vmem>>, vector<16x64xf32>
    %419 = vector.broadcast %417 : vector<1x64xf32> to vector<16x64xf32>
    %420 = arith.mulf %418, %419 : vector<16x64xf32>
    %421 = arith.addf %415, %420 : vector<16x64xf32>
    %c0_281 = arith.constant 0 : index
    %c69 = arith.constant 69 : index
    %c0_282 = arith.constant 0 : index
    %422 = vector.load %arg3[%c0_281, %c69, %c0_282] : memref<1x90x64xf32, #tpu.memory_space<vmem>>, vector<1x1x64xf32>
    %423 = vector.shape_cast %422 : vector<1x1x64xf32> to vector<1x64xf32>
    %c1_283 = arith.constant 1 : index
    %c10_284 = arith.constant 10 : index
    %424 = vector.load %arg7[%c1_283, %c10_284] : memref<18x80xf32, #tpu.memory_space<vmem>>, vector<16x64xf32>
    %425 = vector.broadcast %423 : vector<1x64xf32> to vector<16x64xf32>
    %426 = arith.mulf %424, %425 : vector<16x64xf32>
    %427 = arith.addf %421, %426 : vector<16x64xf32>
    %c0_285 = arith.constant 0 : index
    %c70 = arith.constant 70 : index
    %c0_286 = arith.constant 0 : index
    %428 = vector.load %arg3[%c0_285, %c70, %c0_286] : memref<1x90x64xf32, #tpu.memory_space<vmem>>, vector<1x1x64xf32>
    %429 = vector.shape_cast %428 : vector<1x1x64xf32> to vector<1x64xf32>
    %c1_287 = arith.constant 1 : index
    %c11_288 = arith.constant 11 : index
    %430 = vector.load %arg7[%c1_287, %c11_288] : memref<18x80xf32, #tpu.memory_space<vmem>>, vector<16x64xf32>
    %431 = vector.broadcast %429 : vector<1x64xf32> to vector<16x64xf32>
    %432 = arith.mulf %430, %431 : vector<16x64xf32>
    %433 = arith.addf %427, %432 : vector<16x64xf32>
    %c0_289 = arith.constant 0 : index
    %c71 = arith.constant 71 : index
    %c0_290 = arith.constant 0 : index
    %434 = vector.load %arg3[%c0_289, %c71, %c0_290] : memref<1x90x64xf32, #tpu.memory_space<vmem>>, vector<1x1x64xf32>
    %435 = vector.shape_cast %434 : vector<1x1x64xf32> to vector<1x64xf32>
    %c1_291 = arith.constant 1 : index
    %c12_292 = arith.constant 12 : index
    %436 = vector.load %arg7[%c1_291, %c12_292] : memref<18x80xf32, #tpu.memory_space<vmem>>, vector<16x64xf32>
    %437 = vector.broadcast %435 : vector<1x64xf32> to vector<16x64xf32>
    %438 = arith.mulf %436, %437 : vector<16x64xf32>
    %439 = arith.addf %433, %438 : vector<16x64xf32>
    %c0_293 = arith.constant 0 : index
    %c72 = arith.constant 72 : index
    %c0_294 = arith.constant 0 : index
    %440 = vector.load %arg3[%c0_293, %c72, %c0_294] : memref<1x90x64xf32, #tpu.memory_space<vmem>>, vector<1x1x64xf32>
    %441 = vector.shape_cast %440 : vector<1x1x64xf32> to vector<1x64xf32>
    %c1_295 = arith.constant 1 : index
    %c13_296 = arith.constant 13 : index
    %442 = vector.load %arg7[%c1_295, %c13_296] : memref<18x80xf32, #tpu.memory_space<vmem>>, vector<16x64xf32>
    %443 = vector.broadcast %441 : vector<1x64xf32> to vector<16x64xf32>
    %444 = arith.mulf %442, %443 : vector<16x64xf32>
    %445 = arith.addf %439, %444 : vector<16x64xf32>
    %c0_297 = arith.constant 0 : index
    %c73 = arith.constant 73 : index
    %c0_298 = arith.constant 0 : index
    %446 = vector.load %arg3[%c0_297, %c73, %c0_298] : memref<1x90x64xf32, #tpu.memory_space<vmem>>, vector<1x1x64xf32>
    %447 = vector.shape_cast %446 : vector<1x1x64xf32> to vector<1x64xf32>
    %c1_299 = arith.constant 1 : index
    %c14_300 = arith.constant 14 : index
    %448 = vector.load %arg7[%c1_299, %c14_300] : memref<18x80xf32, #tpu.memory_space<vmem>>, vector<16x64xf32>
    %449 = vector.broadcast %447 : vector<1x64xf32> to vector<16x64xf32>
    %450 = arith.mulf %448, %449 : vector<16x64xf32>
    %451 = arith.addf %445, %450 : vector<16x64xf32>
    %c0_301 = arith.constant 0 : index
    %c74 = arith.constant 74 : index
    %c0_302 = arith.constant 0 : index
    %452 = vector.load %arg3[%c0_301, %c74, %c0_302] : memref<1x90x64xf32, #tpu.memory_space<vmem>>, vector<1x1x64xf32>
    %453 = vector.shape_cast %452 : vector<1x1x64xf32> to vector<1x64xf32>
    %c1_303 = arith.constant 1 : index
    %c15_304 = arith.constant 15 : index
    %454 = vector.load %arg7[%c1_303, %c15_304] : memref<18x80xf32, #tpu.memory_space<vmem>>, vector<16x64xf32>
    %455 = vector.broadcast %453 : vector<1x64xf32> to vector<16x64xf32>
    %456 = arith.mulf %454, %455 : vector<16x64xf32>
    %457 = arith.addf %451, %456 : vector<16x64xf32>
    %c0_305 = arith.constant 0 : index
    %c75 = arith.constant 75 : index
    %c0_306 = arith.constant 0 : index
    %458 = vector.load %arg3[%c0_305, %c75, %c0_306] : memref<1x90x64xf32, #tpu.memory_space<vmem>>, vector<1x1x64xf32>
    %459 = vector.shape_cast %458 : vector<1x1x64xf32> to vector<1x64xf32>
    %c2_307 = arith.constant 2 : index
    %c1_308 = arith.constant 1 : index
    %460 = vector.load %arg7[%c2_307, %c1_308] : memref<18x80xf32, #tpu.memory_space<vmem>>, vector<16x64xf32>
    %461 = vector.broadcast %459 : vector<1x64xf32> to vector<16x64xf32>
    %462 = arith.mulf %460, %461 : vector<16x64xf32>
    %463 = arith.addf %457, %462 : vector<16x64xf32>
    %c0_309 = arith.constant 0 : index
    %c76 = arith.constant 76 : index
    %c0_310 = arith.constant 0 : index
    %464 = vector.load %arg3[%c0_309, %c76, %c0_310] : memref<1x90x64xf32, #tpu.memory_space<vmem>>, vector<1x1x64xf32>
    %465 = vector.shape_cast %464 : vector<1x1x64xf32> to vector<1x64xf32>
    %c2_311 = arith.constant 2 : index
    %c2_312 = arith.constant 2 : index
    %466 = vector.load %arg7[%c2_311, %c2_312] : memref<18x80xf32, #tpu.memory_space<vmem>>, vector<16x64xf32>
    %467 = vector.broadcast %465 : vector<1x64xf32> to vector<16x64xf32>
    %468 = arith.mulf %466, %467 : vector<16x64xf32>
    %469 = arith.addf %463, %468 : vector<16x64xf32>
    %c0_313 = arith.constant 0 : index
    %c77 = arith.constant 77 : index
    %c0_314 = arith.constant 0 : index
    %470 = vector.load %arg3[%c0_313, %c77, %c0_314] : memref<1x90x64xf32, #tpu.memory_space<vmem>>, vector<1x1x64xf32>
    %471 = vector.shape_cast %470 : vector<1x1x64xf32> to vector<1x64xf32>
    %c2_315 = arith.constant 2 : index
    %c3_316 = arith.constant 3 : index
    %472 = vector.load %arg7[%c2_315, %c3_316] : memref<18x80xf32, #tpu.memory_space<vmem>>, vector<16x64xf32>
    %473 = vector.broadcast %471 : vector<1x64xf32> to vector<16x64xf32>
    %474 = arith.mulf %472, %473 : vector<16x64xf32>
    %475 = arith.addf %469, %474 : vector<16x64xf32>
    %c0_317 = arith.constant 0 : index
    %c78 = arith.constant 78 : index
    %c0_318 = arith.constant 0 : index
    %476 = vector.load %arg3[%c0_317, %c78, %c0_318] : memref<1x90x64xf32, #tpu.memory_space<vmem>>, vector<1x1x64xf32>
    %477 = vector.shape_cast %476 : vector<1x1x64xf32> to vector<1x64xf32>
    %c2_319 = arith.constant 2 : index
    %c4_320 = arith.constant 4 : index
    %478 = vector.load %arg7[%c2_319, %c4_320] : memref<18x80xf32, #tpu.memory_space<vmem>>, vector<16x64xf32>
    %479 = vector.broadcast %477 : vector<1x64xf32> to vector<16x64xf32>
    %480 = arith.mulf %478, %479 : vector<16x64xf32>
    %481 = arith.addf %475, %480 : vector<16x64xf32>
    %c0_321 = arith.constant 0 : index
    %c79 = arith.constant 79 : index
    %c0_322 = arith.constant 0 : index
    %482 = vector.load %arg3[%c0_321, %c79, %c0_322] : memref<1x90x64xf32, #tpu.memory_space<vmem>>, vector<1x1x64xf32>
    %483 = vector.shape_cast %482 : vector<1x1x64xf32> to vector<1x64xf32>
    %c2_323 = arith.constant 2 : index
    %c5_324 = arith.constant 5 : index
    %484 = vector.load %arg7[%c2_323, %c5_324] : memref<18x80xf32, #tpu.memory_space<vmem>>, vector<16x64xf32>
    %485 = vector.broadcast %483 : vector<1x64xf32> to vector<16x64xf32>
    %486 = arith.mulf %484, %485 : vector<16x64xf32>
    %487 = arith.addf %481, %486 : vector<16x64xf32>
    %c0_325 = arith.constant 0 : index
    %c80 = arith.constant 80 : index
    %c0_326 = arith.constant 0 : index
    %488 = vector.load %arg3[%c0_325, %c80, %c0_326] : memref<1x90x64xf32, #tpu.memory_space<vmem>>, vector<1x1x64xf32>
    %489 = vector.shape_cast %488 : vector<1x1x64xf32> to vector<1x64xf32>
    %c2_327 = arith.constant 2 : index
    %c6_328 = arith.constant 6 : index
    %490 = vector.load %arg7[%c2_327, %c6_328] : memref<18x80xf32, #tpu.memory_space<vmem>>, vector<16x64xf32>
    %491 = vector.broadcast %489 : vector<1x64xf32> to vector<16x64xf32>
    %492 = arith.mulf %490, %491 : vector<16x64xf32>
    %493 = arith.addf %487, %492 : vector<16x64xf32>
    %c0_329 = arith.constant 0 : index
    %c81 = arith.constant 81 : index
    %c0_330 = arith.constant 0 : index
    %494 = vector.load %arg3[%c0_329, %c81, %c0_330] : memref<1x90x64xf32, #tpu.memory_space<vmem>>, vector<1x1x64xf32>
    %495 = vector.shape_cast %494 : vector<1x1x64xf32> to vector<1x64xf32>
    %c2_331 = arith.constant 2 : index
    %c7_332 = arith.constant 7 : index
    %496 = vector.load %arg7[%c2_331, %c7_332] : memref<18x80xf32, #tpu.memory_space<vmem>>, vector<16x64xf32>
    %497 = vector.broadcast %495 : vector<1x64xf32> to vector<16x64xf32>
    %498 = arith.mulf %496, %497 : vector<16x64xf32>
    %499 = arith.addf %493, %498 : vector<16x64xf32>
    %c0_333 = arith.constant 0 : index
    %c82 = arith.constant 82 : index
    %c0_334 = arith.constant 0 : index
    %500 = vector.load %arg3[%c0_333, %c82, %c0_334] : memref<1x90x64xf32, #tpu.memory_space<vmem>>, vector<1x1x64xf32>
    %501 = vector.shape_cast %500 : vector<1x1x64xf32> to vector<1x64xf32>
    %c2_335 = arith.constant 2 : index
    %c8_336 = arith.constant 8 : index
    %502 = vector.load %arg7[%c2_335, %c8_336] : memref<18x80xf32, #tpu.memory_space<vmem>>, vector<16x64xf32>
    %503 = vector.broadcast %501 : vector<1x64xf32> to vector<16x64xf32>
    %504 = arith.mulf %502, %503 : vector<16x64xf32>
    %505 = arith.addf %499, %504 : vector<16x64xf32>
    %c0_337 = arith.constant 0 : index
    %c83 = arith.constant 83 : index
    %c0_338 = arith.constant 0 : index
    %506 = vector.load %arg3[%c0_337, %c83, %c0_338] : memref<1x90x64xf32, #tpu.memory_space<vmem>>, vector<1x1x64xf32>
    %507 = vector.shape_cast %506 : vector<1x1x64xf32> to vector<1x64xf32>
    %c2_339 = arith.constant 2 : index
    %c9_340 = arith.constant 9 : index
    %508 = vector.load %arg7[%c2_339, %c9_340] : memref<18x80xf32, #tpu.memory_space<vmem>>, vector<16x64xf32>
    %509 = vector.broadcast %507 : vector<1x64xf32> to vector<16x64xf32>
    %510 = arith.mulf %508, %509 : vector<16x64xf32>
    %511 = arith.addf %505, %510 : vector<16x64xf32>
    %c0_341 = arith.constant 0 : index
    %c84 = arith.constant 84 : index
    %c0_342 = arith.constant 0 : index
    %512 = vector.load %arg3[%c0_341, %c84, %c0_342] : memref<1x90x64xf32, #tpu.memory_space<vmem>>, vector<1x1x64xf32>
    %513 = vector.shape_cast %512 : vector<1x1x64xf32> to vector<1x64xf32>
    %c2_343 = arith.constant 2 : index
    %c10_344 = arith.constant 10 : index
    %514 = vector.load %arg7[%c2_343, %c10_344] : memref<18x80xf32, #tpu.memory_space<vmem>>, vector<16x64xf32>
    %515 = vector.broadcast %513 : vector<1x64xf32> to vector<16x64xf32>
    %516 = arith.mulf %514, %515 : vector<16x64xf32>
    %517 = arith.addf %511, %516 : vector<16x64xf32>
    %c0_345 = arith.constant 0 : index
    %c85 = arith.constant 85 : index
    %c0_346 = arith.constant 0 : index
    %518 = vector.load %arg3[%c0_345, %c85, %c0_346] : memref<1x90x64xf32, #tpu.memory_space<vmem>>, vector<1x1x64xf32>
    %519 = vector.shape_cast %518 : vector<1x1x64xf32> to vector<1x64xf32>
    %c2_347 = arith.constant 2 : index
    %c11_348 = arith.constant 11 : index
    %520 = vector.load %arg7[%c2_347, %c11_348] : memref<18x80xf32, #tpu.memory_space<vmem>>, vector<16x64xf32>
    %521 = vector.broadcast %519 : vector<1x64xf32> to vector<16x64xf32>
    %522 = arith.mulf %520, %521 : vector<16x64xf32>
    %523 = arith.addf %517, %522 : vector<16x64xf32>
    %c0_349 = arith.constant 0 : index
    %c86 = arith.constant 86 : index
    %c0_350 = arith.constant 0 : index
    %524 = vector.load %arg3[%c0_349, %c86, %c0_350] : memref<1x90x64xf32, #tpu.memory_space<vmem>>, vector<1x1x64xf32>
    %525 = vector.shape_cast %524 : vector<1x1x64xf32> to vector<1x64xf32>
    %c2_351 = arith.constant 2 : index
    %c12_352 = arith.constant 12 : index
    %526 = vector.load %arg7[%c2_351, %c12_352] : memref<18x80xf32, #tpu.memory_space<vmem>>, vector<16x64xf32>
    %527 = vector.broadcast %525 : vector<1x64xf32> to vector<16x64xf32>
    %528 = arith.mulf %526, %527 : vector<16x64xf32>
    %529 = arith.addf %523, %528 : vector<16x64xf32>
    %c0_353 = arith.constant 0 : index
    %c87 = arith.constant 87 : index
    %c0_354 = arith.constant 0 : index
    %530 = vector.load %arg3[%c0_353, %c87, %c0_354] : memref<1x90x64xf32, #tpu.memory_space<vmem>>, vector<1x1x64xf32>
    %531 = vector.shape_cast %530 : vector<1x1x64xf32> to vector<1x64xf32>
    %c2_355 = arith.constant 2 : index
    %c13_356 = arith.constant 13 : index
    %532 = vector.load %arg7[%c2_355, %c13_356] : memref<18x80xf32, #tpu.memory_space<vmem>>, vector<16x64xf32>
    %533 = vector.broadcast %531 : vector<1x64xf32> to vector<16x64xf32>
    %534 = arith.mulf %532, %533 : vector<16x64xf32>
    %535 = arith.addf %529, %534 : vector<16x64xf32>
    %c0_357 = arith.constant 0 : index
    %c88 = arith.constant 88 : index
    %c0_358 = arith.constant 0 : index
    %536 = vector.load %arg3[%c0_357, %c88, %c0_358] : memref<1x90x64xf32, #tpu.memory_space<vmem>>, vector<1x1x64xf32>
    %537 = vector.shape_cast %536 : vector<1x1x64xf32> to vector<1x64xf32>
    %c2_359 = arith.constant 2 : index
    %c14_360 = arith.constant 14 : index
    %538 = vector.load %arg7[%c2_359, %c14_360] : memref<18x80xf32, #tpu.memory_space<vmem>>, vector<16x64xf32>
    %539 = vector.broadcast %537 : vector<1x64xf32> to vector<16x64xf32>
    %540 = arith.mulf %538, %539 : vector<16x64xf32>
    %541 = arith.addf %535, %540 : vector<16x64xf32>
    %c0_361 = arith.constant 0 : index
    %c89 = arith.constant 89 : index
    %c0_362 = arith.constant 0 : index
    %542 = vector.load %arg3[%c0_361, %c89, %c0_362] : memref<1x90x64xf32, #tpu.memory_space<vmem>>, vector<1x1x64xf32>
    %543 = vector.shape_cast %542 : vector<1x1x64xf32> to vector<1x64xf32>
    %c2_363 = arith.constant 2 : index
    %c15_364 = arith.constant 15 : index
    %544 = vector.load %arg7[%c2_363, %c15_364] : memref<18x80xf32, #tpu.memory_space<vmem>>, vector<16x64xf32>
    %545 = vector.broadcast %543 : vector<1x64xf32> to vector<16x64xf32>
    %546 = arith.mulf %544, %545 : vector<16x64xf32>
    %547 = arith.addf %541, %546 : vector<16x64xf32>
    %c0_365 = arith.constant 0 : index
    %c0_366 = arith.constant 0 : index
    %548 = vector.load %arg5[%c0_365, %c0_366] : memref<16x64xf32, #tpu.memory_space<vmem>>, vector<16x64xf32>
    %549 = arith.addf %548, %547 : vector<16x64xf32>
    %c0_367 = arith.constant 0 : index
    %c0_368 = arith.constant 0 : index
    %550 = vector.load %arg5[%c0_367, %c0_368] : memref<16x64xf32, #tpu.memory_space<vmem>>, vector<16x64xf32>
    tpu.vector_store %arg5[%c0_367, %c0_368], %549 {strides = array<i32>} : memref<16x64xf32, #tpu.memory_space<vmem>>, vector<16x64xf32>,
    %c1_369 = arith.constant 1 : index
    %c8_370 = arith.constant 8 : index
    %551 = vector.load %arg6[%c1_369, %c8_370] : memref<18x80xf32, #tpu.memory_space<vmem>>, vector<16x64xf32>
    tpu.vector_store %arg6[%c1_369, %c8_370], %549 {strides = array<i32>} : memref<18x80xf32, #tpu.memory_space<vmem>>, vector<16x64xf32>,
    %c1_i32 = arith.constant 1 : i32
    %552 = arith.cmpi eq, %arg1, %c1_i32 : i32
    %553 = arith.extui %552 : i1 to i32
    %c0_i32_371 = arith.constant 0 : i32
    %554 = arith.cmpi ne, %553, %c0_i32_371 : i32
    scf.if %554 {
      %c0_372 = arith.constant 0 : index
      %c0_373 = arith.constant 0 : index
      %c0_374 = arith.constant 0 : index
      %555 = vector.load %arg4[%c0_372, %c0_373, %c0_374] : memref<1x16x64xf32, #tpu.memory_space<vmem>>, vector<1x16x64xf32>
      %556 = vector.shape_cast %555 : vector<1x16x64xf32> to vector<16x64xf32>
      %557 = vector.shape_cast %549 : vector<16x64xf32> to vector<1x16x64xf32>
      tpu.vector_store %arg4[%c0_372, %c0_373, %c0_374], %557 {strides = array<i32>} : memref<1x16x64xf32, #tpu.memory_space<vmem>>, vector<1x16x64xf32>,
    } else {
    }
    return
  }
  func.func @transform_0(%arg0: i32, %arg1: i32) -> (i32, i32, i32) {
    %c0_i32 = arith.constant 0 : i32
    %c0_i32_0 = arith.constant 0 : i32
    %c0_i32_1 = arith.constant 0 : i32
    return %arg0, %c0_i32, %c0_i32_0 : i32, i32, i32
  }
  func.func @transform_1(%arg0: i32, %arg1: i32) -> (i32, i32, i32) {
    %c0_i32 = arith.constant 0 : i32
    %c0_i32_0 = arith.constant 0 : i32
    %c0_i32_1 = arith.constant 0 : i32
    return %arg1, %c0_i32, %c0_i32_0 : i32, i32, i32
  }
  func.func @transform_2(%arg0: i32, %arg1: i32) -> (i32, i32, i32) {
    %c0_i32 = arith.constant 0 : i32
    %c0_i32_0 = arith.constant 0 : i32
    %c0_i32_1 = arith.constant 0 : i32
    return %arg0, %c0_i32, %c0_i32_0 : i32, i32, i32
  }
}

</mosaic_0001>

<bundles_post_ra>
// kernel: _run.1
= control target key start
LH: loop header
LB: loop body
LE: loop exit
PB: predicated region body
PF: predicated region fallthrough
CT: control target
= control target key end

     0   :  { %s2174_s9 = smov 0   ;;  %s2176_s10 = smov 0   ;;  %s3038_s0 = inlined_call_operand.vmem [shape: f32[2,16,64], index: 0, kind: input, shape index: {}]   ;;  %s3039_s1 = inlined_call_operand.vmem [shape: f32[2,90,64], index: 1, kind: input, shape index: {}]   ;;  %s3040_s2 = inlined_call_operand.vmem [shape: f32[2,16,64], index: 2, kind: output, shape index: {}]  }
   0x1   :  { %3103 = sst [smem:[#allocation21_spill]] %s3038_s0  ;;  %s2178_s11 = smov 0  }
   0x2   :  { %3104 = sst [smem:[#allocation22_spill]] %s3039_s1  ;;  %s2180_s12 = smov 0  }
   0x3   :  { %3105 = sst [smem:[#allocation23_spill]] %s3040_s2  ;;  %s2182_s13 = smov 0  }
   0x4 LB: > { %3106 = sst [smem:[#allocation5_spill]] %s2118_s11  ;;  %s21_s14 = sadd.s32 1, %s2118_s11  ;;  %s2126_s13 = sphi %s2182_s13, %s12_s13   ;;  %s2122_s12 = sphi %s2180_s12, %s3169_s12   ;;  %s2118_s11 = sphi %s2178_s11, %s3168_s11   ;;  %s2114_s10 = sphi %s2176_s10, %s3167_s10   ;;  %s2110_s9 = sphi %s2174_s9, %s3166_s9  }
   0x5   : > { %3107 = sst [smem:[#allocation6_spill]] %s2122_s12  ;;  %s24_s15 = sadd.s32 1, %s2122_s12 }
   0x6   : > { %3108 = sst [smem:[#allocation7_spill]] %s2126_s13  ;;  %p22_p0 = scmp.ge.s32.totalorder %s21_s14, 2 }
   0x7   : > { %p1914_p1 = scmp.ge.s32.totalorder %s2126_s13, 1  ;;  %p134_p2 = scmp.lt.s32.totalorder %s2126_s13, 5 }
   0x8   : > { %s3171_s14 = smov (%p22_p0, %s21_s14), 0  ;;  %s3173_s15 = smov (!%p22_p0, %s24_s15), %s2122_s12 }
   0x9   : > { %3109 = sst [smem:[#allocation8_spill]] %s3171_s14  ;;  %p135_p3 = pnand %p1914_p1, %p134_p2 }
   0xa   : > { %p26_p4 = scmp.ge.s32.totalorder %s3173_s15, 2 }
   0xb   : > { %138 = sbr.rel (%p135_p3) target bundleno = 1846 (0x736), region = 28 }
   0xc   : > { %s3175_s15 = smov (%p26_p4, %s3173_s15), 0 }
   0xd   : > { %3110 = sst [smem:[#allocation9_spill]] %s3175_s15 }
  0x10   : > { %p161_p5 = scmp.lt.s32.totalorder %s2114_s10, 1  ;;  %p166_p6 = scmp.lt.s32.totalorder %s2110_s9, 1 }
  0x11   : > { %s3111_s0 = sld [smem:[#allocation21_spill]]  ;;  %p1920_p7 = scmp.ne.s32.totalorder %s2110_s9, 0 }
  0x12   : > { %s3177_s10 = smov (!%p161_p5, %s2114_s10), 1  ;;  %s3112_s2 = sld [smem:[#allocation23_spill]] }
  0x13   : > { %s167_s16 = scalar_select %p166_p6, %s2110_s9, 1 }
  0x14   : > { %s1924_s17 = sshll.u32 %s3177_s10, 4  ;;  %s3114_s1 = sld [smem:[#allocation22_spill]] }
  0x15   : > { %s1926_s21 = smul.u32 96, %s167_s16  ;;  %s2128_s28 = smov (!%p1920_p7), 8  }
  0x16   : > { %179 = sbr.rel (%p1920_p7) target bundleno = 152 (0x98), region = 32 }
  0x17   : > { %s165_s20 = scalar_lea.vmem %s3111_s0, %s1924_s17 }
  0x18   : > { %s2214_s24 = scalar_lea.vmem %s3112_s2, %s1924_s17 }
  0x19   : > { %3113 = sst [smem:[#allocation10_spill]] %s2214_s24 }
  0x1a   : > { %s2219_s27 = scalar_lea.vmem %s3114_s1, %s1926_s21 }
  0x1b   : > { %v188_v0 = vld [vmem:[%s165_s20] sm:$0xff]  ;;  %vm190_vm0 = vcmask 523264   ;;  %v189_v1 = vld [vmem:[%s165_s20 + $0x8] sm:$0xff]  ;;  %vm180_vm1 = vcmask 654336   ;;  %v2129_v2 = vmov 0.0   ;;  %vm183_vm2 = vcmask 648192  }
  0x1c   : > { %195 = vrot.lane.b32.xlu0 %v188_v0, %s2128_s28  ;;  %191 = vst.msk [vmem:[#allocation2] sm:$0xff] %vm190_vm0, %v188_v0  ;;  %vm201_vm3 = vcmask 588864  }
  0x1d   : > { %192 = vst.msk [vmem:[#allocation2 + $0x8] sm:$0xff] %vm190_vm0, %v189_v1 }
  0x1e   : > { %181 = vst.msk [vmem:[#allocation3] sm:$0xff] %vm180_vm1, %v2129_v2 }
  0x1f   : > { %182 = vst.msk [vmem:[#allocation3 + $0x8] sm:$0xff] %vm180_vm1, %v2129_v2 }
  0x20   : > { %185 = vst.msk [vmem:[#allocation4] sm:$0xff] %vm180_vm1, %v2129_v2 }
  0x21   : > { %186 = vst.msk [vmem:[#allocation4 + $0x8] sm:$0xff] %vm180_vm1, %v2129_v2 }
  0x22   : > { %184 = vst.msk [vmem:[#allocation3 + $0x10] sm:$0x3] %vm183_vm2, %v2129_v2 }
  0x23   : > { %187 = vst.msk [vmem:[#allocation4 + $0x10] sm:$0x3] %vm183_vm2, %v2129_v2 }
  0x24   : > { %197 = vrot.lane.b32.xlu0 %v189_v1, %s2128_s28 }
  0x8e   : > { %v196_v3 = vpop.permute.xlu0 %195 }
  0x8f   : > { %202 = vst.msk [vmem:[#allocation3 + $0x1] sm:$0xff] %vm201_vm3, %v196_v3 }
  0x96   : > { %v198_v4 = vpop.permute.xlu0 %197 }
  0x97   : > { %203 = vst.msk [vmem:[#allocation3 + $0x9] sm:$0xff] %vm201_vm3, %v198_v4 }
  0x98 PF: > { %v1998_v5 = vld [vmem:[%s2219_s27 + $0x3] ss:$0 sm:$0xff]  ;;  %v1999_v6 = vld [vmem:[%s2219_s27] ss:$0 sm:$0xff]  ;;  %s3093_s29 = smov 4   ;;  %s3045_s30 = smov 1  }
  0x99   : > { %255 = vrot.lane.b32.xlu1 %v1998_v5, %s3093_s29  ;;  %209 = vrot.lane.b32.xlu0 %v1999_v6, %s3045_s30  ;;  %v2003_v7 = vld [vmem:[%s2219_s27 + $0x2] ss:$0 sm:$0xff]  ;;  %v2000_v8 = vld [vmem:[%s2219_s27 + $0x4] ss:$0 sm:$0xff]  ;;  %s3041_s3 = smov 3   ;;  %s3091_s4 = smov 5  }
  0x9a   : > { %237 = vrot.lane.b32.xlu2 %v2003_v7, %s3041_s3  ;;  %v2001_v9 = vld [vmem:[%s2219_s27 + $0x1] ss:$0 sm:$0xff]  ;;  %s3043_s5 = smov 2   ;;  %v2002_v10 = vld [vmem:[%s2219_s27 + $0x5] ss:$0 sm:$0xff]  ;;  %s3089_s6 = smov 6  }
  0x9b   : > { %v2004_v11 = vld [vmem:[%s2219_s27 + $0x6] ss:$0 sm:$0xff]  ;;  %s3099_s7 = smov 7   ;;  %v2005_v12 = vld [vmem:[%s2219_s27 + $0x7] ss:$0 sm:$0xff]  ;;  %s3087_s8 = smov 8  }
  0x9c   : > { %v2006_v13 = vld [vmem:[%s2219_s27 + $0x8] ss:$0 sm:$0xff]  ;;  %s3085_s10 = smov 9   ;;  %v2007_v14 = vld [vmem:[%s2219_s27 + $0x9] ss:$0 sm:$0xff]  ;;  %s3079_s16 = smov 10  }
  0x9d   : > { %v2008_v15 = vld [vmem:[%s2219_s27 + $0xa] ss:$0 sm:$0xff]  ;;  %s3077_s17 = smov 11   ;;  %v2013_v16 = vld [vmem:[%s2219_s27 + $0x10] ss:$0 sm:$0xff]  ;;  %s3083_s18 = smov 12  }
  0x9e   : > { %v2009_v17 = vld [vmem:[%s2219_s27 + $0xb] ss:$0 sm:$0xff]  ;;  %v2014_v18 = vld [vmem:[%s2219_s27 + $0x11] ss:$0 sm:$0xff]  ;;  %v2010_v19 = vld [vmem:[%s2219_s27 + $0xc] ss:$0 sm:$0xff] }
  0x9f   : > { %s3081_s19 = smov 13   ;;  %v2011_v20 = vld [vmem:[%s2219_s27 + $0xd] ss:$0 sm:$0xff]  ;;  %s3071_s20 = smov 14   ;;  %v2012_v21 = vld [vmem:[%s2219_s27 + $0xe] ss:$0 sm:$0xff] }
  0xa0   : > { %s3069_s21 = smov 15   ;;  %v2256_v22 = vld [vmem:[#allocation3] sm:$0xff]  ;;  %v2258_v23 = vld [vmem:[#allocation3 + $0x8] sm:$0xff]  ;;  %v2015_v24 = vld [vmem:[%s2219_s27 + $0xf] ss:$0 sm:$0xff]  ;;  %s3065_s22 = smov 126  }
  0xa1   : > { %273 = vrot.lane.b32.xlu1 %v2000_v8, %s3091_s4  ;;  %219 = vrot.lane.b32.xlu0 %v2001_v9, %s3043_s5  ;;  %s3059_s23 = smov 125   ;;  %s3061_s25 = smov 124   ;;  %v2292_v47 = vld [vmem:[#allocation3 + $0x9] sm:$0xff]  ;;  %vm1006_vm4 = vcmask 588864   ;;  %vm1813_vm5 = vcmask 523264  }
  0xa2   : > { %483 = vrot.lane.b32.xlu2 %v2013_v16, %s3043_s5  ;;  %s3067_s26 = smov 127   ;;  %s3063_s28 = smov 123  }
  0xa3   : > { %s3047_s5 = smov 121   ;;  %s3154_s0 = smov 5  }
  0xa4   : > { %s3155_s1 = smov 6   ;;  %s3156_s2 = smov 8  }
  0xa5   : > { %s3157_s15 = smov 9   ;;  %s3158_s14 = smov 10  }
  0xa6   : > { %s3159_s12 = smov 11   ;;  %s3160_s11 = smov 12  }
  0xa7   : > { %s3162_s13 = smov 114   ;;  %s3163_s24 = smov 7  }
  0xa8   : > { %p1921_p8 = scmp.ne.s32.totalorder %s2110_s9, 1 }
  0xa9   : > { %291 = vrot.lane.b32.xlu1 %v2002_v10, %s3089_s6 }
  0xaa   : > { %501 = vrot.lane.b32.xlu2 %v2014_v18, %s3041_s3  ;;  %s3051_s3 = smov 122   ;;  %v2018_v18 = vld [vmem:[%s2219_s27 + $0x14] ss:$0 sm:$0xff] }
  0xb1   : > { %309 = vrot.lane.b32.xlu1 %v2004_v11, %s3099_s7  ;;  %v2330_v11 = vld [vmem:[#allocation3 + $0x1] sm:$0xff] }
  0xb9   : > { %327 = vrot.lane.b32.xlu1 %v2005_v12, %s3087_s8  ;;  %v2016_v12 = vld [vmem:[%s2219_s27 + $0x12] ss:$0 sm:$0xff] }
  0xc1   : > { %345 = vrot.lane.b32.xlu1 %v2006_v13, %s3085_s10 }
  0xc9   : > { %363 = vrot.lane.b32.xlu1 %v2007_v14, %s3079_s16 }
  0xd1   : > { %381 = vrot.lane.b32.xlu1 %v2008_v15, %s3077_s17  ;;  %v2017_v15 = vld [vmem:[%s2219_s27 + $0x13] ss:$0 sm:$0xff] }
  0xd9   : > { %399 = vrot.lane.b32.xlu1 %v2009_v17, %s3083_s18 }
  0xe1   : > { %417 = vrot.lane.b32.xlu1 %v2010_v19, %s3081_s19 }
  0xe9   : > { %435 = vrot.lane.b32.xlu1 %v2011_v20, %s3071_s20  ;;  %v2019_v20 = vld [vmem:[%s2219_s27 + $0x15] ss:$0 sm:$0xff] }
  0xf1   : > { %453 = vrot.lane.b32.xlu1 %v2012_v21, %s3069_s21 }
  0xf4   : > { %v238_v25 = vpop.permute.xlu2 %237 }
  0xf5   : > { %v240_v26 = vmul.f32 %v238_v25, %v2256_v22  ;;  %v241_v27 = vmul.f32 %v238_v25, %v2258_v23 }
  0xf7   : > { %244 = vrot.lane.b32.xlu2 %v240_v26, %s3065_s22  ;;  %246 = vrot.lane.b32.xlu0 %v241_v27, %s3065_s22  ;;  %v2021_v26 = vld [vmem:[%s2219_s27 + $0x17] ss:$0 sm:$0xff] }
  0xf9   : > { %473 = vrot.lane.b32.xlu1 %v2015_v24, %s3045_s30  ;;  %s3049_s30 = smov 120   ;;  %v2020_v24 = vld [vmem:[%s2219_s27 + $0x16] ss:$0 sm:$0xff] }
  0xfc   : > { %v484_v48 = vpop.permute.xlu2 %483 }
  0xfd   : > { %v487_v49 = vmul.f32 %v484_v48, %v2292_v47  ;;  %v486_v13 = vmul.f32 %v484_v48, %v2330_v11 }
 0x104   : > { %v502_v53 = vpop.permute.xlu2 %501 }
 0x105   : > { %v505_v54 = vmul.f32 %v502_v53, %v2292_v47  ;;  %v504_v16 = vmul.f32 %v502_v53, %v2330_v11 }
 0x10b   : > { %v256_v28 = vpop.permute.xlu1 %255  ;;  %v2268_v31 = vpop.permute.xlu0 %209 }
 0x10c   : > { %v258_v29 = vmul.f32 %v256_v28, %v2256_v22  ;;  %v259_v30 = vmul.f32 %v256_v28, %v2258_v23  ;;  %v2022_v28 = vld [vmem:[%s2219_s27 + $0x18] ss:$0 sm:$0xff] }
 0x10e   : > { %262 = vrot.lane.b32.xlu2 %v258_v29, %s3059_s23  ;;  %264 = vrot.lane.b32.xlu0 %v259_v30, %s3059_s23  ;;  %v2023_v30 = vld [vmem:[%s2219_s27 + $0x19] ss:$0 sm:$0xff] }
 0x113   : > { %v274_v32 = vpop.permute.xlu1 %273  ;;  %v220_v35 = vpop.permute.xlu0 %219 }
 0x114   : > { %v276_v33 = vmul.f32 %v274_v32, %v2256_v22  ;;  %v277_v34 = vmul.f32 %v274_v32, %v2258_v23  ;;  %v222_v36 = vmul.f32 %v220_v35, %v2256_v22  ;;  %v223_v37 = vmul.f32 %v220_v35, %v2258_v23 }
 0x116   : > { %280 = vrot.lane.b32.xlu2 %v276_v33, %s3061_s25  ;;  %282 = vrot.lane.b32.xlu0 %v277_v34, %s3061_s25  ;;  %v2024_v34 = vld [vmem:[%s2219_s27 + $0x1a] ss:$0 sm:$0xff] }
 0x117   : > { %226 = vrot.lane.b32.xlu1 %v222_v36, %s3067_s26  ;;  %v2025_v36 = vld [vmem:[%s2219_s27 + $0x1b] ss:$0 sm:$0xff] }
 0x11b   : > { %v292_v38 = vpop.permute.xlu1 %291 }
 0x11c   : > { %v294_v39 = vmul.f32 %v292_v38, %v2256_v22  ;;  %v295_v40 = vmul.f32 %v292_v38, %v2258_v23 }
 0x11e   : > { %298 = vrot.lane.b32.xlu2 %v294_v39, %s3063_s28  ;;  %300 = vrot.lane.b32.xlu0 %v295_v40, %s3063_s28  ;;  %v2026_v39 = vld [vmem:[%s2219_s27 + $0x1c] ss:$0 sm:$0xff] }
 0x11f   : > { %228 = vrot.lane.b32.xlu1 %v223_v37, %s3067_s26 }
 0x123   : > { %v310_v41 = vpop.permute.xlu1 %309 }
 0x124   : > { %v312_v42 = vmul.f32 %v310_v41, %v2256_v22  ;;  %v313_v43 = vmul.f32 %v310_v41, %v2258_v23 }
 0x126   : > { %316 = vrot.lane.b32.xlu2 %v312_v42, %s3051_s3  ;;  %318 = vrot.lane.b32.xlu0 %v313_v43, %s3051_s3  ;;  %s3073_s3 = smov 117   ;;  %v2027_v42 = vld [vmem:[%s2219_s27 + $0x1d] ss:$0 sm:$0xff] }
 0x127   : > { %492 = vrot.lane.b32.xlu1 %v487_v49, %s3067_s26 }
 0x12b   : > { %v328_v44 = vpop.permute.xlu1 %327 }
 0x12c   : > { %v330_v45 = vmul.f32 %v328_v44, %v2256_v22  ;;  %v331_v46 = vmul.f32 %v328_v44, %v2258_v23 }
 0x12e   : > { %334 = vrot.lane.b32.xlu2 %v330_v45, %s3047_s5  ;;  %336 = vrot.lane.b32.xlu0 %v331_v46, %s3047_s5  ;;  %s3053_s5 = smov 119  }
 0x12f   : > { %510 = vrot.lane.b32.xlu1 %v505_v54, %s3065_s22 }
 0x133   : > { %v346_v50 = vpop.permute.xlu1 %345 }
 0x134   : > { %v348_v51 = vmul.f32 %v346_v50, %v2256_v22  ;;  %v349_v52 = vmul.f32 %v346_v50, %v2258_v23 }
 0x136   : > { %352 = vrot.lane.b32.xlu2 %v348_v51, %s3049_s30  ;;  %354 = vrot.lane.b32.xlu0 %v349_v52, %s3049_s30  ;;  %s3055_s30 = smov 118  }
 0x13b   : > { %v364_v55 = vpop.permute.xlu1 %363 }
 0x13c   : > { %v366_v56 = vmul.f32 %v364_v55, %v2256_v22  ;;  %v367_v57 = vmul.f32 %v364_v55, %v2258_v23 }
 0x13e   : > { %370 = vrot.lane.b32.xlu2 %v366_v56, %s3053_s5  ;;  %372 = vrot.lane.b32.xlu0 %v367_v57, %s3053_s5  ;;  %s3057_s5 = smov 116  }
 0x143   : > { %v382_v58 = vpop.permute.xlu1 %381 }
 0x144   : > { %v384_v59 = vmul.f32 %v382_v58, %v2256_v22  ;;  %v385_v60 = vmul.f32 %v382_v58, %v2258_v23 }
 0x146   : > { %388 = vrot.lane.b32.xlu2 %v384_v59, %s3055_s30  ;;  %390 = vrot.lane.b32.xlu0 %v385_v60, %s3055_s30  ;;  %s3075_s30 = smov 115  }
 0x14b   : > { %v400_v61 = vpop.permute.xlu1 %399 }
 0x14c   : > { %v402_v62 = vmul.f32 %v400_v61, %v2256_v22  ;;  %v403_v63 = vmul.f32 %v400_v61, %v2258_v23 }
 0x14e   : > { %406 = vrot.lane.b32.xlu2 %v402_v62, %s3073_s3  ;;  %408 = vrot.lane.b32.xlu0 %v403_v63, %s3073_s3 }
 0x151   : > { %v2322_v6 = vpop.permute.xlu2 %244 }
 0x153   : > { %v418_v0 = vpop.permute.xlu1 %417 }
 0x154   : > { %v420_v1 = vmul.f32 %v418_v0, %v2256_v22  ;;  %v421_v2 = vmul.f32 %v418_v0, %v2258_v23 }
 0x156   : > { %424 = vrot.lane.b32.xlu2 %v420_v1, %s3057_s5  ;;  %426 = vrot.lane.b32.xlu0 %v421_v2, %s3057_s5  ;;  %s3095_s5 = smov 114  }
 0x15b   : > { %v436_v3 = vpop.permute.xlu1 %435 }
 0x15c   : > { %v438_v4 = vmul.f32 %v436_v3, %v2256_v22  ;;  %v439_v5 = vmul.f32 %v436_v3, %v2258_v23 }
 0x15e   : > { %442 = vrot.lane.b32.xlu2 %v438_v4, %s3075_s30  ;;  %444 = vrot.lane.b32.xlu0 %v439_v5, %s3075_s30 }
 0x163   : > { %v454_v7 = vpop.permute.xlu1 %453 }
 0x164   : > { %v456_v8 = vmul.f32 %v454_v7, %v2256_v22  ;;  %v457_v9 = vmul.f32 %v454_v7, %v2258_v23 }
 0x166   : > { %460 = vrot.lane.b32.xlu2 %v456_v8, %s3095_s5  ;;  %462 = vrot.lane.b32.xlu0 %v457_v9, %s3095_s5 }
 0x168   : > { %v2328_v10 = vpop.permute.xlu2 %262 }
 0x169   : > { %v2368_v33 = vpop.permute.xlu0 %246 }
 0x16e   : > { %519 = vrot.lane.b32.xlu2 %v2016_v12, %s3093_s29  ;;  %490 = vrot.lane.b32.xlu0 %v486_v13, %s3067_s26  ;;  %s3119_s26 = smov 118  }
 0x170   : > { %v2336_v14 = vpop.permute.xlu2 %280 }
 0x176   : > { %537 = vrot.lane.b32.xlu2 %v2017_v15, %s3091_s4  ;;  %508 = vrot.lane.b32.xlu0 %v504_v16, %s3065_s22  ;;  %s3118_s22 = smov 119  }
 0x178   : > { %v2342_v17 = vpop.permute.xlu2 %298 }
 0x17e   : > { %555 = vrot.lane.b32.xlu2 %v2018_v18, %s3089_s6 }
 0x180   : > { %v2346_v19 = vpop.permute.xlu2 %316  ;;  %v2375_v37 = vpop.permute.xlu0 %264 }
 0x186   : > { %573 = vrot.lane.b32.xlu2 %v2019_v20, %s3099_s7 }
 0x188   : > { %v2350_v21 = vpop.permute.xlu2 %334  ;;  %v2381_v40 = vpop.permute.xlu0 %282 }
 0x18e   : > { %591 = vrot.lane.b32.xlu2 %v2020_v24, %s3087_s8 }
 0x190   : > { %v2354_v25 = vpop.permute.xlu2 %352  ;;  %v2388_v43 = vpop.permute.xlu0 %300 }
 0x196   : > { %609 = vrot.lane.b32.xlu2 %v2021_v26, %s3085_s10 }
 0x198   : > { %v2358_v27 = vpop.permute.xlu2 %370  ;;  %v2394_v49 = vpop.permute.xlu0 %318 }
 0x19e   : > { %627 = vrot.lane.b32.xlu2 %v2022_v28, %s3079_s16 }
 0x1a0   : > { %v2362_v29 = vpop.permute.xlu2 %388  ;;  %v2402_v55 = vpop.permute.xlu0 %336 }
 0x1a6   : > { %645 = vrot.lane.b32.xlu2 %v2023_v30, %s3077_s17  ;;  %v2030_v30 = vld [vmem:[%s2219_s27 + $0x1e] ss:$0 sm:$0xff] }
 0x1a8   : > { %v2366_v32 = vpop.permute.xlu2 %406  ;;  %v2410_v59 = vpop.permute.xlu0 %354 }
 0x1ae   : > { %663 = vrot.lane.b32.xlu2 %v2024_v34, %s3083_s18 }
 0x1b0   : > { %v2372_v35 = vpop.permute.xlu2 %424  ;;  %v2416_v63 = vpop.permute.xlu0 %372 }
 0x1b6   : > { %681 = vrot.lane.b32.xlu2 %v2025_v36, %s3081_s19 }
 0x1b8   : > { %v2378_v38 = vpop.permute.xlu2 %442  ;;  %v2422_v4 = vpop.permute.xlu0 %390 }
 0x1be   : > { %699 = vrot.lane.b32.xlu2 %v2026_v39, %s3071_s20  ;;  %s3121_s20 = smov 1  }
 0x1c0   : > { %v2384_v41 = vpop.permute.xlu2 %460  ;;  %v2430_v13 = vpop.permute.xlu0 %408 }
 0x1c6   : > { %717 = vrot.lane.b32.xlu2 %v2027_v42, %s3069_s21  ;;  %s3120_s21 = smov 116  }
 0x1c8   : > { %v520_v44 = vpop.permute.xlu2 %519  ;;  %v2438_v20 = vpop.permute.xlu0 %426 }
 0x1c9   : > { %v522_v45 = vmul.f32 %v520_v44, %v2330_v11  ;;  %v523_v46 = vmul.f32 %v520_v44, %v2292_v47 }
 0x1cb   : > { %526 = vrot.lane.b32.xlu0 %v522_v45, %s3059_s23  ;;  %528 = vrot.lane.b32.xlu1 %v523_v46, %s3059_s23  ;;  %s3115_s23 = smov 122  }
 0x1ce   : > { %737 = vrot.lane.b32.xlu2 %v2030_v30, %s3121_s20 }
 0x1d0   : > { %v538_v48 = vpop.permute.xlu2 %537  ;;  %v2446_v34 = vpop.permute.xlu0 %444 }
 0x1d1   : > { %v540_v50 = vmul.f32 %v538_v48, %v2330_v11  ;;  %v541_v51 = vmul.f32 %v538_v48, %v2292_v47 }
 0x1d3   : > { %544 = vrot.lane.b32.xlu0 %v540_v50, %s3061_s25  ;;  %546 = vrot.lane.b32.xlu1 %v541_v51, %s3061_s25  ;;  %s3116_s25 = smov 121   ;;  %v2028_v50 = vld [vmem:[%s2219_s27 + $0x1f] ss:$0 sm:$0xff] }
 0x1d8   : > { %v556_v52 = vpop.permute.xlu2 %555  ;;  %v2452_v45 = vpop.permute.xlu0 %462 }
 0x1d9   : > { %v558_v53 = vmul.f32 %v556_v52, %v2330_v11  ;;  %v559_v54 = vmul.f32 %v556_v52, %v2292_v47  ;;  %v2029_v52 = vld [vmem:[%s2219_s27 + $0x20] ss:$0 sm:$0xff] }
 0x1db   : > { %562 = vrot.lane.b32.xlu0 %v558_v53, %s3063_s28  ;;  %564 = vrot.lane.b32.xlu1 %v559_v54, %s3063_s28  ;;  %s3117_s28 = smov 120   ;;  %v2031_v54 = vld [vmem:[%s2219_s27 + $0x21] ss:$0 sm:$0xff] }
 0x1e0   : > { %v574_v56 = vpop.permute.xlu2 %573  ;;  %v2459_v51 = vpop.permute.xlu0 %490 }
 0x1e1   : > { %v576_v57 = vmul.f32 %v574_v56, %v2330_v11  ;;  %v577_v58 = vmul.f32 %v574_v56, %v2292_v47 }
 0x1e3   : > { %580 = vrot.lane.b32.xlu0 %v576_v57, %s3115_s23  ;;  %582 = vrot.lane.b32.xlu1 %v577_v58, %s3115_s23  ;;  %v2032_v57 = vld [vmem:[%s2219_s27 + $0x22] ss:$0 sm:$0xff] }
 0x1e8   : > { %v592_v60 = vpop.permute.xlu2 %591  ;;  %v2464_v53 = vpop.permute.xlu0 %508 }
 0x1e9   : > { %v594_v61 = vmul.f32 %v592_v60, %v2330_v11  ;;  %v595_v62 = vmul.f32 %v592_v60, %v2292_v47  ;;  %v2033_v60 = vld [vmem:[%s2219_s27 + $0x23] ss:$0 sm:$0xff] }
 0x1eb   : > { %598 = vrot.lane.b32.xlu0 %v594_v61, %s3116_s25  ;;  %600 = vrot.lane.b32.xlu1 %v595_v62, %s3116_s25  ;;  %v2034_v62 = vld [vmem:[%s2219_s27 + $0x24] ss:$0 sm:$0xff] }
 0x1f0   : > { %v610_v0 = vpop.permute.xlu2 %609 }
 0x1f1   : > { %v612_v1 = vmul.f32 %v610_v0, %v2330_v11  ;;  %v613_v2 = vmul.f32 %v610_v0, %v2292_v47 }
 0x1f3   : > { %616 = vrot.lane.b32.xlu0 %v612_v1, %s3117_s28  ;;  %618 = vrot.lane.b32.xlu1 %v613_v2, %s3117_s28  ;;  %v2035_v1 = vld [vmem:[%s2219_s27 + $0x25] ss:$0 sm:$0xff] }
 0x1f8   : > { %v628_v3 = vpop.permute.xlu2 %627 }
 0x1f9   : > { %v630_v5 = vmul.f32 %v628_v3, %v2330_v11  ;;  %v631_v7 = vmul.f32 %v628_v3, %v2292_v47  ;;  %v2036_v3 = vld [vmem:[%s2219_s27 + $0x26] ss:$0 sm:$0xff] }
 0x1fb   : > { %634 = vrot.lane.b32.xlu0 %v630_v5, %s3118_s22  ;;  %636 = vrot.lane.b32.xlu1 %v631_v7, %s3118_s22  ;;  %v2037_v7 = vld [vmem:[%s2219_s27 + $0x27] ss:$0 sm:$0xff] }
 0x200   : > { %v646_v8 = vpop.permute.xlu2 %645 }
 0x201   : > { %v648_v9 = vmul.f32 %v646_v8, %v2330_v11  ;;  %v649_v12 = vmul.f32 %v646_v8, %v2292_v47 }
 0x203   : > { %652 = vrot.lane.b32.xlu0 %v648_v9, %s3119_s26  ;;  %654 = vrot.lane.b32.xlu1 %v649_v12, %s3119_s26  ;;  %v2494_v9 = vpop.permute.xlu1 %473  ;;  %v2038_v12 = vld [vmem:[%s2219_s27 + $0x28] ss:$0 sm:$0xff] }
 0x208   : > { %v664_v15 = vpop.permute.xlu2 %663 }
 0x209   : > { %v666_v16 = vmul.f32 %v664_v15, %v2330_v11  ;;  %v667_v18 = vmul.f32 %v664_v15, %v2292_v47 }
 0x20b   : > { %670 = vrot.lane.b32.xlu0 %v666_v16, %s3073_s3  ;;  %672 = vrot.lane.b32.xlu1 %v667_v18, %s3073_s3  ;;  %s3122_s3 = smov 2   ;;  %v2039_v16 = vld [vmem:[%s2219_s27 + $0x29] ss:$0 sm:$0xff]  ;;  %v2501_v18 = vpop.permute.xlu1 %226 }
 0x210   : > { %v682_v24 = vpop.permute.xlu2 %681 }
 0x211   : > { %v684_v26 = vmul.f32 %v682_v24, %v2330_v11  ;;  %v685_v28 = vmul.f32 %v682_v24, %v2292_v47 }
 0x213   : > { %688 = vrot.lane.b32.xlu0 %v684_v26, %s3120_s21  ;;  %690 = vrot.lane.b32.xlu1 %v685_v28, %s3120_s21  ;;  %v2040_v26 = vld [vmem:[%s2219_s27 + $0x2a] ss:$0 sm:$0xff]  ;;  %v2507_v28 = vpop.permute.xlu1 %228 }
 0x218   : > { %v700_v36 = vpop.permute.xlu2 %699 }
 0x219   : > { %v702_v39 = vmul.f32 %v700_v36, %v2330_v11  ;;  %v703_v42 = vmul.f32 %v700_v36, %v2292_v47  ;;  %v2041_v36 = vld [vmem:[%s2219_s27 + $0x2b] ss:$0 sm:$0xff] }
 0x21b   : > { %706 = vrot.lane.b32.xlu0 %v702_v39, %s3075_s30  ;;  %708 = vrot.lane.b32.xlu1 %v703_v42, %s3075_s30  ;;  %s3123_s30 = smov 3   ;;  %v2513_v39 = vpop.permute.xlu1 %492 }
 0x220   : > { %v718_v44 = vpop.permute.xlu2 %717 }
 0x221   : > { %v720_v46 = vmul.f32 %v718_v44, %v2330_v11  ;;  %v721_v48 = vmul.f32 %v718_v44, %v2292_v47  ;;  %v2042_v44 = vld [vmem:[%s2219_s27 + $0x2c] ss:$0 sm:$0xff] }
 0x223   : > { %724 = vrot.lane.b32.xlu0 %v720_v46, %s3095_s5  ;;  %726 = vrot.lane.b32.xlu1 %v721_v48, %s3095_s5  ;;  %v2520_v46 = vpop.permute.xlu1 %510 }
 0x22b   : > { %747 = vrot.lane.b32.xlu0 %v2028_v50, %s3122_s3 }
 0x233   : > { %765 = vrot.lane.b32.xlu0 %v2029_v52, %s3123_s30  ;;  %v2526_v52 = vld [vmem:[#allocation3 + $0x2] sm:$0xff] }
 0x23b   : > { %783 = vrot.lane.b32.xlu0 %v2031_v54, %s3093_s29  ;;  %v2528_v54 = vld [vmem:[#allocation3 + $0xa] sm:$0xff]  ;;  %s3142_s29 = smov 115  }
 0x23d   : > { %v2468_v56 = vpop.permute.xlu0 %526  ;;  %v2524_v50 = vpop.permute.xlu1 %528 }
 0x243   : > { %801 = vrot.lane.b32.xlu0 %v2032_v57, %s3091_s4  ;;  %s3141_s4 = smov 117  }
 0x245   : > { %v2472_v58 = vpop.permute.xlu0 %544 }
 0x24b   : > { %819 = vrot.lane.b32.xlu0 %v2033_v60, %s3089_s6  ;;  %s3140_s6 = smov 123  }
 0x24d   : > { %v2476_v61 = vpop.permute.xlu0 %562 }
 0x24e   : > { %3124 = vst [vmem:[#allocation11_spill] sm:$0xff] %v2476_v61 }
 0x253   : > { %837 = vrot.lane.b32.xlu0 %v2034_v62, %s3099_s7 }
 0x255   : > { %v2480_v0 = vpop.permute.xlu0 %580 }
 0x256   : > { %3125 = vst [vmem:[#allocation12_spill] sm:$0xff] %v2480_v0 }
 0x25b   : > { %855 = vrot.lane.b32.xlu0 %v2035_v1, %s3087_s8  ;;  %s3139_s8 = smov 124  }
 0x25d   : > { %v2484_v2 = vpop.permute.xlu0 %598 }
 0x25e   : > { %3126 = vst [vmem:[#allocation13_spill] sm:$0xff] %v2484_v2 }
 0x263   : > { %873 = vrot.lane.b32.xlu0 %v2036_v3, %s3085_s10  ;;  %v2534_v3 = vpop.permute.xlu1 %546  ;;  %s3138_s10 = smov 125  }
 0x265   : > { %v2488_v5 = vpop.permute.xlu0 %616 }
 0x266   : > { %3127 = vst [vmem:[#allocation14_spill] sm:$0xff] %v2488_v5 }
 0x26b   : > { %891 = vrot.lane.b32.xlu0 %v2037_v7, %s3079_s16  ;;  %s3134_s16 = smov 15  }
 0x26d   : > { %v2492_v8 = vpop.permute.xlu0 %634 }
 0x26e   : > { %3128 = vst [vmem:[#allocation15_spill] sm:$0xff] %v2492_v8 }
 0x273   : > { %909 = vrot.lane.b32.xlu0 %v2038_v12, %s3077_s17  ;;  %s3132_s17 = smov 14  }
 0x275   : > { %v2498_v15 = vpop.permute.xlu0 %652 }
 0x276   : > { %3129 = vst [vmem:[#allocation16_spill] sm:$0xff] %v2498_v15 }
 0x27b   : > { %927 = vrot.lane.b32.xlu0 %v2039_v16, %s3083_s18  ;;  %s3137_s18 = smov 126  }
 0x27d   : > { %v2504_v24 = vpop.permute.xlu0 %670 }
 0x27e   : > { %3130 = vst [vmem:[#allocation17_spill] sm:$0xff] %v2504_v24 }
 0x283   : > { %945 = vrot.lane.b32.xlu0 %v2040_v26, %s3081_s19  ;;  %s3136_s19 = smov 127  }
 0x285   : > { %v2510_v30 = vpop.permute.xlu0 %688 }
 0x286   : > { %3131 = vst [vmem:[#allocation18_spill] sm:$0xff] %v2510_v30 }
 0x28b   : > { %963 = vrot.lane.b32.xlu0 %v2041_v36, %s3132_s17 }
 0x28d   : > { %v2516_v42 = vpop.permute.xlu0 %706 }
 0x28e   : > { %3133 = vst [vmem:[#allocation19_spill] sm:$0xff] %v2516_v42 }
 0x293   : > { %981 = vrot.lane.b32.xlu0 %v2042_v44, %s3134_s16  ;;  %v2542_v44 = vpop.permute.xlu1 %564 }
 0x295   : > { %v2522_v48 = vpop.permute.xlu0 %724 }
 0x296   : > { %3135 = vst [vmem:[#allocation20_spill] sm:$0xff] %v2522_v48 }
 0x29d   : > { %v748_v57 = vpop.permute.xlu0 %747 }
 0x29e   : > { %v750_v60 = vmul.f32 %v748_v57, %v2526_v52  ;;  %v751_v62 = vmul.f32 %v748_v57, %v2528_v54 }
 0x2a0   : > { %756 = vrot.lane.b32.xlu2 %v751_v62, %s3136_s19  ;;  %754 = vrot.lane.b32.xlu1 %v750_v60, %s3136_s19 }
 0x2a5   : > { %v766_v1 = vpop.permute.xlu0 %765 }
 0x2a6   : > { %v768_v7 = vmul.f32 %v766_v1, %v2526_v52  ;;  %v769_v12 = vmul.f32 %v766_v1, %v2528_v54  ;;  %v2550_v1 = vpop.permute.xlu1 %582 }
 0x2a8   : > { %774 = vrot.lane.b32.xlu2 %v769_v12, %s3137_s18  ;;  %772 = vrot.lane.b32.xlu1 %v768_v7, %s3137_s18 }
 0x2ad   : > { %v784_v16 = vpop.permute.xlu0 %783 }
 0x2ae   : > { %v786_v26 = vmul.f32 %v784_v16, %v2526_v52  ;;  %v787_v36 = vmul.f32 %v784_v16, %v2528_v54 }
 0x2b0   : > { %792 = vrot.lane.b32.xlu2 %v787_v36, %s3138_s10  ;;  %790 = vrot.lane.b32.xlu1 %v786_v26, %s3138_s10  ;;  %v2556_v26 = vpop.permute.xlu1 %600 }
 0x2b5   : > { %v802_v57 = vpop.permute.xlu0 %801 }
 0x2b6   : > { %v804_v60 = vmul.f32 %v802_v57, %v2526_v52  ;;  %v805_v62 = vmul.f32 %v802_v57, %v2528_v54 }
 0x2b8   : > { %810 = vrot.lane.b32.xlu2 %v805_v62, %s3139_s8  ;;  %808 = vrot.lane.b32.xlu1 %v804_v60, %s3139_s8  ;;  %v2562_v48 = vpop.permute.xlu1 %618 }
 0x2bd   : > { %v820_v7 = vpop.permute.xlu0 %819 }
 0x2be   : > { %v822_v12 = vmul.f32 %v820_v7, %v2526_v52  ;;  %v823_v16 = vmul.f32 %v820_v7, %v2528_v54 }
 0x2c0   : > { %828 = vrot.lane.b32.xlu2 %v823_v16, %s3140_s6  ;;  %826 = vrot.lane.b32.xlu1 %v822_v12, %s3140_s6  ;;  %v2570_v30 = vpop.permute.xlu1 %636 }
 0x2c5   : > { %v838_v36 = vpop.permute.xlu0 %837 }
 0x2c6   : > { %v840_v57 = vmul.f32 %v838_v36, %v2526_v52  ;;  %v841_v62 = vmul.f32 %v838_v36, %v2528_v54 }
 0x2c8   : > { %846 = vrot.lane.b32.xlu2 %v841_v62, %s3115_s23  ;;  %844 = vrot.lane.b32.xlu1 %v840_v57, %s3115_s23 }
 0x2cd   : > { %v856_v60 = vpop.permute.xlu0 %855 }
 0x2ce   : > { %v858_v7 = vmul.f32 %v856_v60, %v2526_v52  ;;  %v859_v16 = vmul.f32 %v856_v60, %v2528_v54 }
 0x2d0   : > { %864 = vrot.lane.b32.xlu2 %v859_v16, %s3116_s25  ;;  %862 = vrot.lane.b32.xlu1 %v858_v7, %s3116_s25  ;;  %v2578_v7 = vpop.permute.xlu1 %654 }
 0x2d5   : > { %v874_v12 = vpop.permute.xlu0 %873 }
 0x2d6   : > { %v876_v42 = vmul.f32 %v874_v12, %v2526_v52  ;;  %v877_v36 = vmul.f32 %v874_v12, %v2528_v54 }
 0x2d8   : > { %882 = vrot.lane.b32.xlu2 %v877_v36, %s3117_s28  ;;  %880 = vrot.lane.b32.xlu1 %v876_v42, %s3117_s28  ;;  %v2584_v42 = vpop.permute.xlu1 %672 }
 0x2dd   : > { %v892_v57 = vpop.permute.xlu0 %891 }
 0x2de   : > { %v894_v62 = vmul.f32 %v892_v57, %v2526_v52  ;;  %v895_v60 = vmul.f32 %v892_v57, %v2528_v54 }
 0x2e0   : > { %900 = vrot.lane.b32.xlu2 %v895_v60, %s3118_s22  ;;  %898 = vrot.lane.b32.xlu1 %v894_v62, %s3118_s22  ;;  %v2590_v62 = vpop.permute.xlu2 %737  ;;  %v2592_v8 = vpop.permute.xlu1 %690 }
 0x2e5   : > { %v910_v16 = vpop.permute.xlu0 %909 }
 0x2e6   : > { %v912_v12 = vmul.f32 %v910_v16, %v2526_v52  ;;  %v913_v24 = vmul.f32 %v910_v16, %v2528_v54 }
 0x2e8   : > { %918 = vrot.lane.b32.xlu2 %v913_v24, %s3119_s26  ;;  %916 = vrot.lane.b32.xlu1 %v912_v12, %s3119_s26  ;;  %v213_v12 = vmul.f32 %v2268_v31, %v2258_v23  ;;  %v2606_v61 = vpop.permute.xlu1 %708 }
 0x2ed   : > { %v928_v36 = vpop.permute.xlu0 %927 }
 0x2ee   : > { %v930_v57 = vmul.f32 %v928_v36, %v2526_v52  ;;  %v931_v60 = vmul.f32 %v928_v36, %v2528_v54 }
 0x2f0   : > { %936 = vrot.lane.b32.xlu2 %v931_v60, %s3141_s4  ;;  %934 = vrot.lane.b32.xlu1 %v930_v57, %s3141_s4  ;;  %v233_v57 = vadd.f32 %v2507_v28, %v213_v12 }
 0x2f2   : > { %v251_v0 = vadd.f32 %v2368_v33, %v233_v57  ;;  %v727_v33 = vpop.permute.xlu1 %726 }
 0x2f5   : > { %v946_v15 = vpop.permute.xlu0 %945 }
 0x2f6   : > { %v948_v24 = vmul.f32 %v946_v15, %v2526_v52  ;;  %v949_v16 = vmul.f32 %v946_v15, %v2528_v54  ;;  %v269_v15 = vadd.f32 %v2375_v37, %v251_v0 }
 0x2f8   : > { %954 = vrot.lane.b32.xlu2 %v949_v16, %s3120_s21  ;;  %952 = vrot.lane.b32.xlu1 %v948_v24, %s3120_s21  ;;  %v287_v12 = vadd.f32 %v2381_v40, %v269_v15 }
 0x2fa   : > { %v2600_v36 = vpop.permute.xlu2 %756 }
 0x2fd   : > { %v964_v60 = vpop.permute.xlu0 %963 }
 0x2fe   : > { %v966_v5 = vmul.f32 %v964_v60, %v2526_v52  ;;  %v967_v2 = vmul.f32 %v964_v60, %v2528_v54 }
 0x300   : > { %972 = vrot.lane.b32.xlu2 %v967_v2, %s3142_s29  ;;  %970 = vrot.lane.b32.xlu1 %v966_v5, %s3142_s29  ;;  %v305_v2 = vadd.f32 %v2388_v43, %v287_v12  ;;  %v212_v5 = vmul.f32 %v2268_v31, %v2256_v22 }
 0x302   : > { %v2610_v23 = vpop.permute.xlu2 %774  ;;  %v323_v37 = vadd.f32 %v2394_v49, %v305_v2  ;;  %v232_v0 = vadd.f32 %v2501_v18, %v212_v5 }
 0x304   : > { %v341_v60 = vadd.f32 %v2402_v55, %v323_v37 }
 0x305   : > { %v982_v24 = vpop.permute.xlu0 %981 }
 0x306   : > { %v984_v28 = vmul.f32 %v982_v24, %v2526_v52  ;;  %v985_v16 = vmul.f32 %v982_v24, %v2528_v54  ;;  %v359_v15 = vadd.f32 %v2410_v59, %v341_v60 }
 0x308   : > { %990 = vrot.lane.b32.xlu2 %v985_v16, %s3095_s5  ;;  %988 = vrot.lane.b32.xlu1 %v984_v28, %s3095_s5  ;;  %v250_v28 = vadd.f32 %v2322_v6, %v232_v0  ;;  %v377_v16 = vadd.f32 %v2416_v63, %v359_v15  ;;  %v477_v6 = vmul.f32 %v2494_v9, %v2292_v47  ;;  %s3153_s5 = smov 4  }
 0x30a   : > { %v2618_v57 = vpop.permute.xlu2 %792  ;;  %v395_v43 = vadd.f32 %v2422_v4, %v377_v16  ;;  %v268_v22 = vadd.f32 %v2328_v10, %v250_v28 }
 0x30c   : > { %v413_v31 = vadd.f32 %v2430_v13, %v395_v43  ;;  %v286_v12 = vadd.f32 %v2336_v14, %v268_v22  ;;  %v476_v22 = vmul.f32 %v2494_v9, %v2330_v11  ;;  %v741_v11 = vmul.f32 %v2590_v62, %v2528_v54 }
 0x30e   : > { %v431_v55 = vadd.f32 %v2438_v20, %v413_v31  ;;  %v304_v63 = vadd.f32 %v2342_v17, %v286_v12  ;;  %v3143_v12 = vld [vmem:[#allocation11_spill] sm:$0xff] }
 0x310   : > { %v449_v2 = vadd.f32 %v2446_v34, %v431_v55  ;;  %v322_v5 = vadd.f32 %v2346_v19, %v304_v63 }
 0x312   : > { %v2626_v24 = vpop.permute.xlu1 %754  ;;  %v2628_v40 = vpop.permute.xlu2 %810  ;;  %v467_v59 = vadd.f32 %v2452_v45, %v449_v2  ;;  %v340_v20 = vadd.f32 %v2350_v21, %v322_v5 }
 0x314   : > { %v479_v13 = vadd.f32 %v477_v6, %v467_v59  ;;  %v358_v47 = vadd.f32 %v2354_v25, %v340_v20 }
 0x316   : > { %v497_v37 = vadd.f32 %v2513_v39, %v479_v13  ;;  %v376_v60 = vadd.f32 %v2358_v27, %v358_v47 }
 0x318   : > { %v515_v0 = vadd.f32 %v2520_v46, %v497_v37  ;;  %v394_v21 = vadd.f32 %v2362_v29, %v376_v60  ;;  %v3149_v60 = vld [vmem:[#allocation17_spill] sm:$0xff] }
 0x31a   : > { %v2636_v49 = vpop.permute.xlu1 %772  ;;  %v829_v18 = vpop.permute.xlu2 %828  ;;  %v533_v45 = vadd.f32 %v2524_v50, %v515_v0  ;;  %v412_v16 = vadd.f32 %v2366_v32, %v394_v21 }
 0x31c   : > { %v551_v17 = vadd.f32 %v2534_v3, %v533_v45  ;;  %v430_v25 = vadd.f32 %v2372_v35, %v412_v16 }
 0x31e   : > { %v569_v15 = vadd.f32 %v2542_v44, %v551_v17  ;;  %v448_v3 = vadd.f32 %v2378_v38, %v430_v25 }
 0x320   : > { %v587_v28 = vadd.f32 %v2550_v1, %v569_v15  ;;  %v466_v29 = vadd.f32 %v2384_v41, %v448_v3 }
 0x322   : > { %v2645_v4 = vpop.permute.xlu1 %790  ;;  %v847_v10 = vpop.permute.xlu2 %846  ;;  %v605_v46 = vadd.f32 %v2556_v26, %v587_v28  ;;  %v478_v26 = vadd.f32 %v476_v22, %v466_v29 }
 0x324   : > { %v623_v50 = vadd.f32 %v2562_v48, %v605_v46  ;;  %v496_v48 = vadd.f32 %v2459_v51, %v478_v26  ;;  %v3151_v46 = vld [vmem:[#allocation19_spill] sm:$0xff] }
 0x326   : > { %v641_v27 = vadd.f32 %v2570_v30, %v623_v50  ;;  %v514_v55 = vadd.f32 %v2464_v53, %v496_v48  ;;  %v3145_v53 = vld [vmem:[#allocation13_spill] sm:$0xff] }
 0x328   : > { %v659_v1 = vadd.f32 %v2578_v7, %v641_v27  ;;  %v532_v41 = vadd.f32 %v2468_v56, %v514_v55 }
 0x32a   : > { %v2650_v14 = vpop.permute.xlu1 %808  ;;  %v865_v34 = vpop.permute.xlu2 %864  ;;  %v677_v32 = vadd.f32 %v2584_v42, %v659_v1  ;;  %v550_v7 = vadd.f32 %v2472_v58, %v532_v41  ;;  %v3147_v58 = vld [vmem:[#allocation15_spill] sm:$0xff] }
 0x32c   : > { %v695_v35 = vadd.f32 %v2592_v8, %v677_v32  ;;  %v568_v2 = vadd.f32 %v3143_v12, %v550_v7 }
 0x32e   : > { %v713_v38 = vadd.f32 %v2606_v61, %v695_v35  ;;  %v3144_v61 = vld [vmem:[#allocation12_spill] sm:$0xff] }
 0x32f   : > { %v586_v59 = vadd.f32 %v3144_v61, %v568_v2  ;;  %v2044_v2 = vld [vmem:[%s2219_s27 + $0x2f] ss:$0 sm:$0xff]  ;;  %v2049_v61 = vld [vmem:[%s2219_s27 + $0x33] ss:$0 sm:$0xff] }
 0x330   : > { %v731_v9 = vadd.f32 %v727_v33, %v713_v38  ;;  %v3146_v33 = vld [vmem:[#allocation14_spill] sm:$0xff] }
 0x331   : > { %v604_v13 = vadd.f32 %v3145_v53, %v586_v59  ;;  %v2050_v59 = vld [vmem:[%s2219_s27 + $0x34] ss:$0 sm:$0xff]  ;;  %v2052_v53 = vld [vmem:[%s2219_s27 + $0x36] ss:$0 sm:$0xff] }
 0x332   : > { %v2658_v19 = vpop.permute.xlu1 %826  ;;  %v883_v39 = vpop.permute.xlu2 %882  ;;  %v743_v42 = vadd.f32 %v741_v11, %v731_v9 }
 0x333   : > { %v622_v5 = vadd.f32 %v3146_v33, %v604_v13  ;;  %v2053_v13 = vld [vmem:[%s2219_s27 + $0x37] ss:$0 sm:$0xff] }
 0x334   : > { %v761_v8 = vadd.f32 %v2600_v36, %v743_v42  ;;  %v3148_v36 = vld [vmem:[#allocation16_spill] sm:$0xff] }
 0x335   : > { %v640_v37 = vadd.f32 %v3147_v58, %v622_v5  ;;  %v2046_v42 = vld [vmem:[%s2219_s27 + $0x2d] ss:$0 sm:$0xff]  ;;  %v2055_v5 = vld [vmem:[%s2219_s27 + $0x39] ss:$0 sm:$0xff]  ;;  %v2057_v58 = vld [vmem:[%s2219_s27 + $0x3b] ss:$0 sm:$0xff] }
 0x336   : > { %v779_v63 = vadd.f32 %v2610_v23, %v761_v8  ;;  %v3150_v23 = vld [vmem:[#allocation18_spill] sm:$0xff]  ;;  %1014 = vrot.lane.b32.xlu2 %v2046_v42, %s3121_s20  ;;  %v2045_v8 = vld [vmem:[%s2219_s27 + $0x30] ss:$0 sm:$0xff] }
 0x337   : > { %v658_v45 = vadd.f32 %v3148_v36, %v640_v37 }
 0x338   : > { %v797_v54 = vadd.f32 %v2618_v57, %v779_v63  ;;  %v2051_v63 = vld [vmem:[%s2219_s27 + $0x35] ss:$0 sm:$0xff] }
 0x339   : > { %v676_v15 = vadd.f32 %v3149_v60, %v658_v45 }
 0x33a   : > { %v845_v44 = vpop.permute.xlu1 %844  ;;  %v901_v43 = vpop.permute.xlu2 %900  ;;  %v815_v56 = vadd.f32 %v2628_v40, %v797_v54  ;;  %v740_v40 = vmul.f32 %v2590_v62, %v2526_v52  ;;  %v2054_v54 = vld [vmem:[%s2219_s27 + $0x38] ss:$0 sm:$0xff] }
 0x33b   : > { %v694_v28 = vadd.f32 %v3150_v23, %v676_v15 }
 0x33c   : > { %v833_v20 = vadd.f32 %v829_v18, %v815_v56  ;;  %v3152_v18 = vld [vmem:[#allocation20_spill] sm:$0xff]  ;;  %v2056_v56 = vld [vmem:[%s2219_s27 + $0x3a] ss:$0 sm:$0xff] }
 0x33d   : > { %v712_v57 = vadd.f32 %v3151_v46, %v694_v28 }
 0x33e   : > { %v851_v17 = vadd.f32 %v847_v10, %v833_v20  ;;  %v2058_v20 = vld [vmem:[%s2219_s27 + $0x3c] ss:$0 sm:$0xff] }
 0x33f   : > { %v730_v27 = vadd.f32 %v3152_v18, %v712_v57 }
 0x340   : > { %v869_v21 = vadd.f32 %v865_v34, %v851_v17 }
 0x341   : > { %v742_v1 = vadd.f32 %v740_v40, %v730_v27 }
 0x342   : > { %v863_v31 = vpop.permute.xlu1 %862  ;;  %v919_v30 = vpop.permute.xlu2 %918  ;;  %v887_v16 = vadd.f32 %v883_v39, %v869_v21 }
 0x343   : > { %v760_v32 = vadd.f32 %v2626_v24, %v742_v1 }
 0x344   : > { %v905_v25 = vadd.f32 %v901_v43, %v887_v16 }
 0x345   : > { %v778_v39 = vadd.f32 %v2636_v49, %v760_v32 }
 0x346   : > { %v923_v22 = vadd.f32 %v919_v30, %v905_v25 }
 0x347   : > { %v796_v48 = vadd.f32 %v2645_v4, %v778_v39 }
 0x349   : > { %v814_v52 = vadd.f32 %v2650_v14, %v796_v48 }
 0x34a   : > { %v881_v51 = vpop.permute.xlu1 %880  ;;  %v937_v6 = vpop.permute.xlu2 %936 }
 0x34b   : > { %v941_v29 = vadd.f32 %v937_v6, %v923_v22  ;;  %v832_v62 = vadd.f32 %v2658_v19, %v814_v52  ;;  %v2048_v6 = vld [vmem:[%s2219_s27 + $0x32] ss:$0 sm:$0xff] }
 0x34d   : > { %v850_v55 = vadd.f32 %v845_v44, %v832_v62 }
 0x34f   : > { %v868_v24 = vadd.f32 %v863_v31, %v850_v55  ;;  %v2043_v31 = vld [vmem:[%s2219_s27 + $0x2e] ss:$0 sm:$0xff] }
 0x351   : > { %v886_v11 = vadd.f32 %v881_v51, %v868_v24  ;;  %v2047_v51 = vld [vmem:[%s2219_s27 + $0x31] ss:$0 sm:$0xff] }
 0x352   : > { %v899_v0 = vpop.permute.xlu1 %898  ;;  %v955_v47 = vpop.permute.xlu2 %954 }
 0x353   : > { %v959_v10 = vadd.f32 %v955_v47, %v941_v29  ;;  %v904_v9 = vadd.f32 %v899_v0, %v886_v11 }
 0x35a   : > { %v917_v50 = vpop.permute.xlu1 %916  ;;  %v973_v3 = vpop.permute.xlu2 %972 }
 0x35b   : > { %v977_v34 = vadd.f32 %v973_v3, %v959_v10  ;;  %v922_v41 = vadd.f32 %v917_v50, %v904_v9 }
 0x362   : > { %v935_v26 = vpop.permute.xlu1 %934  ;;  %v991_v35 = vpop.permute.xlu2 %990 }
 0x363   : > { %v995_v43 = vadd.f32 %v991_v35, %v977_v34  ;;  %v940_v7 = vadd.f32 %v935_v26, %v922_v41 }
 0x365   : > { %v997_v38 = vmax.f32 %v995_v43, 0.0 }
 0x367   : > { %1002 = vrot.lane.b32.xlu1 %v997_v38, %s3099_s7 }
 0x36a   : > { %v953_v30 = vpop.permute.xlu1 %952 }
 0x36b   : > { %v958_v4 = vadd.f32 %v953_v30, %v940_v7 }
 0x372   : > { %v971_v49 = vpop.permute.xlu1 %970 }
 0x373   : > { %v976_v14 = vadd.f32 %v971_v49, %v958_v4 }
 0x37a   : > { %v989_v19 = vpop.permute.xlu1 %988 }
 0x37b   : > { %v994_v12 = vadd.f32 %v989_v19, %v976_v14 }
 0x37d   : > { %v996_v44 = vmax.f32 %v994_v12, 0.0 }
 0x37f   : > { %1000 = vrot.lane.b32.xlu0 %v996_v44, %s3099_s7 }
 0x387   : > { %1024 = vrot.lane.b32.xlu0 %v2043_v31, %s3122_s3 }
 0x38f   : > { %1042 = vrot.lane.b32.xlu0 %v2044_v2, %s3123_s30 }
 0x390   : > { %v1015_v24 = vpop.permute.xlu2 %1014 }
 0x397   : > { %1060 = vrot.lane.b32.xlu0 %v2045_v8, %s3153_s5 }
 0x39f   : > { %1078 = vrot.lane.b32.xlu0 %v2047_v51, %s3154_s0 }
 0x3a7   : > { %1096 = vrot.lane.b32.xlu0 %v2048_v6, %s3155_s1 }
 0x3af   : > { %1114 = vrot.lane.b32.xlu0 %v2049_v61, %s3099_s7  ;;  %s3161_s7 = smov 13   ;;  %v2059_v61 = vld [vmem:[%s2219_s27 + $0x3d] ss:$0 sm:$0xff] }
 0x3b7   : > { %1132 = vrot.lane.b32.xlu0 %v2050_v59, %s3156_s2 }
 0x3bf   : > { %1150 = vrot.lane.b32.xlu0 %v2051_v63, %s3157_s15 }
 0x3c7   : > { %1168 = vrot.lane.b32.xlu0 %v2052_v53, %s3158_s14 }
 0x3cf   : > { %1186 = vrot.lane.b32.xlu0 %v2053_v13, %s3159_s12  ;;  %v2060_v13 = vld [vmem:[%s2219_s27 + $0x3e] ss:$0 sm:$0xff] }
 0x3d7   : > { %1204 = vrot.lane.b32.xlu0 %v2054_v54, %s3160_s11 }
 0x3d9   : > { %v1003_v33 = vpop.permute.xlu1 %1002 }
 0x3da   : > { %1008 = vst.msk [vmem:[#allocation4 + $0x9] sm:$0xff] %vm1006_vm4, %v1003_v33 }
 0x3df   : > { %1222 = vrot.lane.b32.xlu0 %v2055_v5, %s3161_s7 }
 0x3e7   : > { %1240 = vrot.lane.b32.xlu0 %v2056_v56, %s3132_s17 }
 0x3ef   : > { %1258 = vrot.lane.b32.xlu0 %v2057_v58, %s3134_s16 }
 0x3f1   : > { %v1001_v37 = vpop.permute.xlu0 %1000 }
 0x3f2   : > { %1007 = vst.msk [vmem:[#allocation4 + $0x1] sm:$0xff] %vm1006_vm4, %v1001_v37 }
 0x3f7   : > { %1278 = vrot.lane.b32.xlu0 %v2058_v20, %s3121_s20  ;;  %v2061_v20 = vld [vmem:[%s2219_s27 + $0x3f] ss:$0 sm:$0xff] }
 0x3f9   : > { %v2738_v0 = vld [vmem:[#allocation4] sm:$0xff]  ;;  %v2740_v47 = vld [vmem:[#allocation4 + $0x8] sm:$0xff]  ;;  %v1025_v36 = vpop.permute.xlu0 %1024 }
 0x3fa   : > { %v1027_v45 = vmul.f32 %v1025_v36, %v2738_v0  ;;  %v1028_v17 = vmul.f32 %v1025_v36, %v2740_v47  ;;  %v1018_v14 = vmul.f32 %v1015_v24, %v2740_v47  ;;  %v1017_v54 = vmul.f32 %v1015_v24, %v2738_v0 }
 0x3fc   : > { %1031 = vrot.lane.b32.xlu1 %v1027_v45, %s3136_s19  ;;  %1033 = vrot.lane.b32.xlu2 %v1028_v17, %s3136_s19 }
 0x401   : > { %v1043_v60 = vpop.permute.xlu0 %1042 }
 0x402   : > { %v1045_v15 = vmul.f32 %v1043_v60, %v2738_v0  ;;  %v1046_v21 = vmul.f32 %v1043_v60, %v2740_v47  ;;  %v2062_v60 = vld [vmem:[%s2219_s27 + $0x40] ss:$0 sm:$0xff] }
 0x404   : > { %1049 = vrot.lane.b32.xlu1 %v1045_v15, %s3137_s18  ;;  %1051 = vrot.lane.b32.xlu2 %v1046_v21, %s3137_s18 }
 0x409   : > { %v1061_v23 = vpop.permute.xlu0 %1060 }
 0x40a   : > { %v1063_v28 = vmul.f32 %v1061_v23, %v2738_v0  ;;  %v1064_v16 = vmul.f32 %v1061_v23, %v2740_v47 }
 0x40c   : > { %1067 = vrot.lane.b32.xlu1 %v1063_v28, %s3138_s10  ;;  %1069 = vrot.lane.b32.xlu2 %v1064_v16, %s3138_s10  ;;  %v2063_v28 = vld [vmem:[%s2219_s27 + $0x41] ss:$0 sm:$0xff] }
 0x411   : > { %v1079_v46 = vpop.permute.xlu0 %1078 }
 0x412   : > { %v1081_v57 = vmul.f32 %v1079_v46, %v2738_v0  ;;  %v1082_v25 = vmul.f32 %v1079_v46, %v2740_v47 }
 0x414   : > { %1085 = vrot.lane.b32.xlu1 %v1081_v57, %s3139_s8  ;;  %1087 = vrot.lane.b32.xlu2 %v1082_v25, %s3139_s8 }
 0x419   : > { %v1097_v50 = vpop.permute.xlu0 %1096 }
 0x41a   : > { %v1099_v3 = vmul.f32 %v1097_v50, %v2738_v0  ;;  %v1100_v40 = vmul.f32 %v1097_v50, %v2740_v47  ;;  %v2064_v50 = vld [vmem:[%s2219_s27 + $0x42] ss:$0 sm:$0xff] }
 0x41c   : > { %1103 = vrot.lane.b32.xlu1 %v1099_v3, %s3140_s6  ;;  %1105 = vrot.lane.b32.xlu2 %v1100_v40, %s3140_s6 }
 0x421   : > { %v1115_v18 = vpop.permute.xlu0 %1114 }
 0x422   : > { %v1117_v27 = vmul.f32 %v1115_v18, %v2738_v0  ;;  %v1118_v22 = vmul.f32 %v1115_v18, %v2740_v47 }
 0x424   : > { %1121 = vrot.lane.b32.xlu1 %v1117_v27, %s3115_s23  ;;  %1123 = vrot.lane.b32.xlu2 %v1118_v22, %s3115_s23  ;;  %v2065_v22 = vld [vmem:[%s2219_s27 + $0x43] ss:$0 sm:$0xff] }
 0x429   : > { %v1133_v29 = vpop.permute.xlu0 %1132 }
 0x42a   : > { %v1135_v1 = vmul.f32 %v1133_v29, %v2738_v0  ;;  %v1136_v10 = vmul.f32 %v1133_v29, %v2740_v47 }
 0x42c   : > { %1139 = vrot.lane.b32.xlu1 %v1135_v1, %s3116_s25  ;;  %1141 = vrot.lane.b32.xlu2 %v1136_v10, %s3116_s25 }
 0x431   : > { %v1151_v32 = vpop.permute.xlu0 %1150 }
 0x432   : > { %v1153_v34 = vmul.f32 %v1151_v32, %v2738_v0  ;;  %v1154_v26 = vmul.f32 %v1151_v32, %v2740_v47 }
 0x434   : > { %1157 = vrot.lane.b32.xlu1 %v1153_v34, %s3117_s28  ;;  %1159 = vrot.lane.b32.xlu2 %v1154_v26, %s3117_s28  ;;  %v2066_v34 = vld [vmem:[%s2219_s27 + $0x44] ss:$0 sm:$0xff] }
 0x439   : > { %v1169_v35 = vpop.permute.xlu0 %1168 }
 0x43a   : > { %v1171_v39 = vmul.f32 %v1169_v35, %v2738_v0  ;;  %v1172_v43 = vmul.f32 %v1169_v35, %v2740_v47 }
 0x43c   : > { %1175 = vrot.lane.b32.xlu1 %v1171_v39, %s3118_s22  ;;  %1177 = vrot.lane.b32.xlu2 %v1172_v43, %s3118_s22 }
 0x441   : > { %v1187_v48 = vpop.permute.xlu0 %1186 }
 0x442   : > { %v1189_v38 = vmul.f32 %v1187_v48, %v2738_v0  ;;  %v1190_v52 = vmul.f32 %v1187_v48, %v2740_v47  ;;  %v2067_v48 = vld [vmem:[%s2219_s27 + $0x47] ss:$0 sm:$0xff] }
 0x444   : > { %1193 = vrot.lane.b32.xlu1 %v1189_v38, %s3119_s26  ;;  %1195 = vrot.lane.b32.xlu2 %v1190_v52, %s3119_s26 }
 0x449   : > { %v1205_v62 = vpop.permute.xlu0 %1204 }
 0x44a   : > { %v1207_v30 = vmul.f32 %v1205_v62, %v2738_v0  ;;  %v1208_v55 = vmul.f32 %v1205_v62, %v2740_v47 }
 0x44c   : > { %1211 = vrot.lane.b32.xlu1 %v1207_v30, %s3141_s4  ;;  %1213 = vrot.lane.b32.xlu2 %v1208_v55, %s3141_s4  ;;  %v2068_v55 = vld [vmem:[%s2219_s27 + $0x4a] ss:$0 sm:$0xff] }
 0x451   : > { %v1223_v11 = vpop.permute.xlu0 %1222 }
 0x452   : > { %v1225_v9 = vmul.f32 %v1223_v11, %v2738_v0  ;;  %v1226_v49 = vmul.f32 %v1223_v11, %v2740_v47 }
 0x454   : > { %1229 = vrot.lane.b32.xlu1 %v1225_v9, %s3120_s21  ;;  %1231 = vrot.lane.b32.xlu2 %v1226_v49, %s3120_s21 }
 0x456   : > { %v1034_v41 = vpop.permute.xlu2 %1033 }
 0x457   : > { %v1038_v19 = vadd.f32 %v1034_v41, %v1018_v14  ;;  %v2069_v41 = vld [vmem:[%s2219_s27 + $0x4e] ss:$0 sm:$0xff] }
 0x459   : > { %v1241_v7 = vpop.permute.xlu0 %1240 }
 0x45a   : > { %v1243_v4 = vmul.f32 %v1241_v7, %v2738_v0  ;;  %v1244_v42 = vmul.f32 %v1241_v7, %v2740_v47 }
 0x45c   : > { %1247 = vrot.lane.b32.xlu1 %v1243_v4, %s3142_s29  ;;  %1249 = vrot.lane.b32.xlu2 %v1244_v42, %s3142_s29  ;;  %v2070_v42 = vld [vmem:[%s2219_s27 + $0x51] ss:$0 sm:$0xff] }
 0x45e   : > { %v1052_v12 = vpop.permute.xlu2 %1051 }
 0x45f   : > { %v1056_v44 = vadd.f32 %v1052_v12, %v1038_v19  ;;  %v2071_v12 = vld [vmem:[%s2219_s27 + $0x54] ss:$0 sm:$0xff] }
 0x461   : > { %v1259_v31 = vpop.permute.xlu0 %1258 }
 0x462   : > { %v1261_v2 = vmul.f32 %v1259_v31, %v2738_v0  ;;  %v1262_v8 = vmul.f32 %v1259_v31, %v2740_v47 }
 0x464   : > { %1265 = vrot.lane.b32.xlu1 %v1261_v2, %s3162_s13  ;;  %1267 = vrot.lane.b32.xlu2 %v1262_v8, %s3162_s13  ;;  %v2072_v2 = vld [vmem:[%s2219_s27 + $0x57] ss:$0 sm:$0xff] }
 0x466   : > { %v1070_v51 = vpop.permute.xlu2 %1069 }
 0x467   : > { %v1074_v6 = vadd.f32 %v1070_v51, %v1056_v44 }
 0x46c   : > { %1288 = vrot.lane.b32.xlu1 %v2059_v61, %s3122_s3  ;;  %v2834_v61 = vld [vmem:[#allocation4 + $0x1] sm:$0xff] }
 0x46e   : > { %v1088_v59 = vpop.permute.xlu2 %1087  ;;  %v1032_v63 = vpop.permute.xlu1 %1031 }
 0x46f   : > { %v1092_v53 = vadd.f32 %v1088_v59, %v1074_v6  ;;  %v1037_v33 = vadd.f32 %v1032_v63, %v1017_v54  ;;  %v2832_v6 = vld [vmem:[#allocation4 + $0x9] sm:$0xff] }
 0x474   : > { %1306 = vrot.lane.b32.xlu1 %v2060_v13, %s3123_s30 }
 0x476   : > { %v1106_v5 = vpop.permute.xlu2 %1105  ;;  %v1050_v56 = vpop.permute.xlu1 %1049 }
 0x477   : > { %v1110_v58 = vadd.f32 %v1106_v5, %v1092_v53  ;;  %v1055_v37 = vadd.f32 %v1050_v56, %v1037_v33 }
 0x47c   : > { %1324 = vrot.lane.b32.xlu1 %v2061_v20, %s3153_s5 }
 0x47e   : > { %v1124_v47 = vpop.permute.xlu2 %1123  ;;  %v1068_v36 = vpop.permute.xlu1 %1067 }
 0x47f   : > { %v1128_v45 = vadd.f32 %v1124_v47, %v1110_v58  ;;  %v1073_v17 = vadd.f32 %v1068_v36, %v1055_v37 }
 0x484   : > { %1342 = vrot.lane.b32.xlu1 %v2062_v60, %s3154_s0 }
 0x486   : > { %v1142_v0 = vpop.permute.xlu2 %1141  ;;  %v1086_v15 = vpop.permute.xlu1 %1085 }
 0x487   : > { %v1146_v21 = vadd.f32 %v1142_v0, %v1128_v45  ;;  %v1091_v23 = vadd.f32 %v1086_v15, %v1073_v17 }
 0x48c   : > { %1360 = vrot.lane.b32.xlu1 %v2063_v28, %s3155_s1 }
 0x48e   : > { %v1160_v16 = vpop.permute.xlu2 %1159  ;;  %v1104_v46 = vpop.permute.xlu1 %1103 }
 0x48f   : > { %v1164_v57 = vadd.f32 %v1160_v16, %v1146_v21  ;;  %v1109_v25 = vadd.f32 %v1104_v46, %v1091_v23  ;;  %v2073_v16 = vld [vmem:[%s2219_s27 + $0x46] ss:$0 sm:$0xff]  ;;  %v2074_v46 = vld [vmem:[%s2219_s27 + $0x45] ss:$0 sm:$0xff] }
 0x494   : > { %1378 = vrot.lane.b32.xlu1 %v2064_v50, %s3163_s24  ;;  %v2075_v50 = vld [vmem:[%s2219_s27 + $0x49] ss:$0 sm:$0xff] }
 0x496   : > { %v1178_v3 = vpop.permute.xlu2 %1177  ;;  %v1122_v40 = vpop.permute.xlu1 %1121 }
 0x497   : > { %v1182_v18 = vadd.f32 %v1178_v3, %v1164_v57  ;;  %v1127_v27 = vadd.f32 %v1122_v40, %v1109_v25  ;;  %v2076_v3 = vld [vmem:[%s2219_s27 + $0x48] ss:$0 sm:$0xff]  ;;  %v2077_v40 = vld [vmem:[%s2219_s27 + $0x4d] ss:$0 sm:$0xff] }
 0x49c   : > { %1396 = vrot.lane.b32.xlu1 %v2065_v22, %s3156_s2  ;;  %v2080_v22 = vld [vmem:[%s2219_s27 + $0x4f] ss:$0 sm:$0xff] }
 0x49e   : > { %v1196_v29 = vpop.permute.xlu2 %1195  ;;  %v1140_v1 = vpop.permute.xlu1 %1139 }
 0x49f   : > { %v1200_v10 = vadd.f32 %v1196_v29, %v1182_v18  ;;  %v1145_v32 = vadd.f32 %v1140_v1, %v1127_v27  ;;  %v2078_v18 = vld [vmem:[%s2219_s27 + $0x4c] ss:$0 sm:$0xff]  ;;  %v2079_v27 = vld [vmem:[%s2219_s27 + $0x50] ss:$0 sm:$0xff]  ;;  %v1279_v1 = vpop.permute.xlu0 %1278 }
 0x4a4   : > { %1414 = vrot.lane.b32.xlu1 %v2066_v34, %s3157_s15  ;;  %v1281_v34 = vmul.f32 %v1279_v1, %v2834_v61 }
 0x4a6   : > { %v1214_v26 = vpop.permute.xlu2 %1213  ;;  %v1158_v35 = vpop.permute.xlu1 %1157 }
 0x4a7   : > { %v1218_v39 = vadd.f32 %v1214_v26, %v1200_v10  ;;  %v1163_v43 = vadd.f32 %v1158_v35, %v1145_v32  ;;  %v2081_v10 = vld [vmem:[%s2219_s27 + $0x53] ss:$0 sm:$0xff]  ;;  %v2082_v32 = vld [vmem:[%s2219_s27 + $0x52] ss:$0 sm:$0xff] }
 0x4ac   : > { %1468 = vrot.lane.b32.xlu1 %v2067_v48, %s3160_s11  ;;  %v2084_v48 = vld [vmem:[%s2219_s27 + $0x55] ss:$0 sm:$0xff] }
 0x4ae   : > { %v1232_v38 = vpop.permute.xlu2 %1231  ;;  %v1176_v52 = vpop.permute.xlu1 %1175 }
 0x4af   : > { %v1236_v62 = vadd.f32 %v1232_v38, %v1218_v39  ;;  %v1181_v30 = vadd.f32 %v1176_v52, %v1163_v43  ;;  %v2083_v43 = vld [vmem:[%s2219_s27 + $0x56] ss:$0 sm:$0xff] }
 0x4b4   : > { %1522 = vrot.lane.b32.xlu1 %v2068_v55, %s3134_s16 }
 0x4b6   : > { %v1250_v24 = vpop.permute.xlu2 %1249  ;;  %v1194_v11 = vpop.permute.xlu1 %1193 }
 0x4b7   : > { %v2820_v9 = vadd.f32 %v1250_v24, %v1236_v62  ;;  %v1199_v49 = vadd.f32 %v1194_v11, %v1181_v30  ;;  %v2085_v62 = vld [vmem:[%s2219_s27 + $0x58] ss:$0 sm:$0xff]  ;;  %v2086_v11 = vld [vmem:[%s2219_s27 + $0x59] ss:$0 sm:$0xff] }
 0x4bc   : > { %1588 = vrot.lane.b32.xlu1 %v2069_v41, %s3153_s5  ;;  %v1282_v41 = vmul.f32 %v1279_v1, %v2832_v6 }
 0x4be   : > { %v1212_v7 = vpop.permute.xlu1 %1211  ;;  %v1268_v29 = vpop.permute.xlu2 %1267 }
 0x4bf   : > { %v1217_v4 = vadd.f32 %v1212_v7, %v1199_v49  ;;  %v1272_v49 = vadd.f32 %v1268_v29, %v2820_v9  ;;  %v2926_v29 = vld [vmem:[#allocation4 + $0x2] sm:$0xff] }
 0x4c4   : > { %1642 = vrot.lane.b32.xlu1 %v2070_v42, %s3163_s24 }
 0x4c6   : > { %v1230_v14 = vpop.permute.xlu1 %1229 }
 0x4c7   : > { %v1235_v19 = vadd.f32 %v1230_v14, %v1217_v4  ;;  %v1284_v4 = vadd.f32 %v1282_v41, %v1272_v49 }
 0x4cc   : > { %1696 = vrot.lane.b32.xlu1 %v2071_v12, %s3158_s14 }
 0x4ce   : > { %v1248_v44 = vpop.permute.xlu1 %1247 }
 0x4cf   : > { %v1253_v31 = vadd.f32 %v1248_v44, %v1235_v19 }
 0x4d4   : > { %1750 = vrot.lane.b32.xlu1 %v2072_v2, %s3161_s7 }
 0x4d6   : > { %v1266_v8 = vpop.permute.xlu1 %1265 }
 0x4d7   : > { %v2830_v51 = vadd.f32 %v1266_v8, %v1253_v31 }
 0x4d9   : > { %v1283_v26 = vadd.f32 %v1281_v34, %v2830_v51  ;;  %v2934_v34 = vld [vmem:[#allocation4 + $0xa] sm:$0xff] }
 0x4de   : > { %v1289_v59 = vpop.permute.xlu1 %1288 }
 0x4df   : > { %v1291_v63 = vmul.f32 %v1289_v59, %v2834_v61  ;;  %v1292_v53 = vmul.f32 %v1289_v59, %v2832_v6 }
 0x4e1   : > { %1297 = vrot.lane.b32.xlu0 %v1292_v53, %s3136_s19  ;;  %1295 = vrot.lane.b32.xlu2 %v1291_v63, %s3136_s19 }
 0x4e6   : > { %v1307_v13 = vpop.permute.xlu1 %1306 }
 0x4e7   : > { %v1309_v54 = vmul.f32 %v1307_v13, %v2834_v61  ;;  %v1310_v33 = vmul.f32 %v1307_v13, %v2832_v6 }
 0x4e9   : > { %1315 = vrot.lane.b32.xlu0 %v1310_v33, %s3137_s18  ;;  %1313 = vrot.lane.b32.xlu2 %v1309_v54, %s3137_s18 }
 0x4ee   : > { %v1325_v5 = vpop.permute.xlu1 %1324 }
 0x4ef   : > { %v1327_v56 = vmul.f32 %v1325_v5, %v2834_v61  ;;  %v1328_v58 = vmul.f32 %v1325_v5, %v2832_v6 }
 0x4f1   : > { %1333 = vrot.lane.b32.xlu0 %v1328_v58, %s3138_s10  ;;  %1331 = vrot.lane.b32.xlu2 %v1327_v56, %s3138_s10 }
 0x4f6   : > { %v1343_v37 = vpop.permute.xlu1 %1342 }
 0x4f7   : > { %v1345_v20 = vmul.f32 %v1343_v37, %v2834_v61  ;;  %v1346_v47 = vmul.f32 %v1343_v37, %v2832_v6 }
 0x4f9   : > { %1351 = vrot.lane.b32.xlu0 %v1346_v47, %s3139_s8  ;;  %1349 = vrot.lane.b32.xlu2 %v1345_v20, %s3139_s8 }
 0x4fe   : > { %v1361_v36 = vpop.permute.xlu1 %1360 }
 0x4ff   : > { %v1363_v45 = vmul.f32 %v1361_v36, %v2834_v61  ;;  %v1364_v17 = vmul.f32 %v1361_v36, %v2832_v6 }
 0x501   : > { %1369 = vrot.lane.b32.xlu0 %v1364_v17, %s3140_s6  ;;  %1367 = vrot.lane.b32.xlu2 %v1363_v45, %s3140_s6 }
 0x506   : > { %v1379_v60 = vpop.permute.xlu1 %1378 }
 0x507   : > { %v1381_v0 = vmul.f32 %v1379_v60, %v2834_v61  ;;  %v1382_v15 = vmul.f32 %v1379_v60, %v2832_v6 }
 0x509   : > { %1387 = vrot.lane.b32.xlu0 %v1382_v15, %s3115_s23  ;;  %1385 = vrot.lane.b32.xlu2 %v1381_v0, %s3115_s23 }
 0x50e   : > { %v1397_v21 = vpop.permute.xlu1 %1396 }
 0x50f   : > { %v1399_v23 = vmul.f32 %v1397_v21, %v2834_v61  ;;  %v1400_v28 = vmul.f32 %v1397_v21, %v2832_v6 }
 0x511   : > { %1405 = vrot.lane.b32.xlu0 %v1400_v28, %s3116_s25  ;;  %1403 = vrot.lane.b32.xlu2 %v1399_v23, %s3116_s25 }
 0x516   : > { %v1415_v57 = vpop.permute.xlu1 %1414 }
 0x517   : > { %v1418_v25 = vmul.f32 %v1415_v57, %v2832_v6  ;;  %v1417_v30 = vmul.f32 %v1415_v57, %v2834_v61 }
 0x519   : > { %1450 = vrot.lane.b32.xlu0 %v2073_v16, %s3159_s12  ;;  %1432 = vrot.lane.b32.xlu2 %v2074_v46, %s3158_s14 }
 0x51a   : > { %1423 = vrot.lane.b32.xlu1 %v1418_v25, %s3117_s28 }
 0x51e   : > { %v1469_v7 = vpop.permute.xlu1 %1468 }
 0x51f   : > { %v1471_v0 = vmul.f32 %v1469_v7, %v2834_v61  ;;  %v1472_v1 = vmul.f32 %v1469_v7, %v2832_v6 }
 0x521   : > { %1504 = vrot.lane.b32.xlu0 %v2075_v50, %s3132_s17  ;;  %1486 = vrot.lane.b32.xlu2 %v2076_v3, %s3161_s7 }
 0x526   : > { %v1523_v2 = vpop.permute.xlu1 %1522 }
 0x529   : > { %1570 = vrot.lane.b32.xlu0 %v2077_v40, %s3123_s30  ;;  %1552 = vrot.lane.b32.xlu2 %v2078_v18, %s3122_s3  ;;  %v1525_v40 = vmul.f32 %v1523_v2, %v2834_v61 }
 0x52e   : > { %v2900_v9 = vpop.permute.xlu1 %1588 }
 0x52f   : > { %v1591_v41 = vmul.f32 %v2900_v9, %v2926_v29  ;;  %v1592_v7 = vmul.f32 %v2900_v9, %v2934_v34 }
 0x531   : > { %1624 = vrot.lane.b32.xlu0 %v2079_v27, %s3155_s1  ;;  %1606 = vrot.lane.b32.xlu2 %v2080_v22, %s3154_s0  ;;  %s3164_s0 = sld [smem:[#allocation10_spill]] (!%p1921_p8) }
 0x536   : > { %v2904_v58 = vpop.permute.xlu1 %1642 }
 0x539   : > { %1678 = vrot.lane.b32.xlu0 %v2081_v10, %s3157_s15  ;;  %1660 = vrot.lane.b32.xlu2 %v2082_v32, %s3156_s2 }
 0x53b   : > { %v1296_v35 = vpop.permute.xlu2 %1295 }
 0x53c   : > { %v1301_v39 = vadd.f32 %v1296_v35, %v1283_v26 }
 0x53e   : > { %v2910_v17 = vpop.permute.xlu1 %1696 }
 0x53f   : > { %v1699_v9 = vmul.f32 %v2910_v17, %v2926_v29 }
 0x541   : > { %1732 = vrot.lane.b32.xlu0 %v2083_v43, %s3160_s11  ;;  %1714 = vrot.lane.b32.xlu2 %v2084_v48, %s3159_s12 }
 0x543   : > { %v1314_v38 = vpop.permute.xlu2 %1313 }
 0x544   : > { %v1319_v52 = vadd.f32 %v1314_v38, %v1301_v39  ;;  %v2087_v38 = vld [vmem:[%s2219_s27 + $0x4b] ss:$0 sm:$0xff] }
 0x546   : > { %v2914_v28 = vpop.permute.xlu1 %1750 }
 0x549   : > { %1768 = vrot.lane.b32.xlu2 %v2085_v62, %s3132_s17  ;;  %1421 = vrot.lane.b32.xlu0 %v1417_v30, %s3117_s28  ;;  %v1526_v62 = vmul.f32 %v1523_v2, %v2832_v6  ;;  %v1645_v2 = vmul.f32 %v2904_v58, %v2926_v29 }
 0x54b   : > { %v1332_v55 = vpop.permute.xlu2 %1331 }
 0x54c   : > { %v1337_v24 = vadd.f32 %v1332_v55, %v1319_v52 }
 0x551   : > { %1786 = vrot.lane.b32.xlu2 %v2086_v11, %s3134_s16 }
 0x553   : > { %v1298_v42 = vpop.permute.xlu0 %1297  ;;  %v1350_v14 = vpop.permute.xlu2 %1349 }
 0x554   : > { %v1302_v19 = vadd.f32 %v1298_v42, %v1284_v4  ;;  %v1355_v12 = vadd.f32 %v1350_v14, %v1337_v24 }
 0x55b   : > { %v1316_v44 = vpop.permute.xlu0 %1315  ;;  %v1368_v31 = vpop.permute.xlu2 %1367 }
 0x55c   : > { %v1320_v8 = vadd.f32 %v1316_v44, %v1302_v19  ;;  %v1373_v51 = vadd.f32 %v1368_v31, %v1355_v12 }
 0x563   : > { %v1334_v59 = vpop.permute.xlu0 %1333  ;;  %v1386_v63 = vpop.permute.xlu2 %1385 }
 0x564   : > { %v1338_v53 = vadd.f32 %v1334_v59, %v1320_v8  ;;  %v1391_v13 = vadd.f32 %v1386_v63, %v1373_v51  ;;  %v1646_v8 = vmul.f32 %v2904_v58, %v2934_v34 }
 0x56b   : > { %v1352_v54 = vpop.permute.xlu0 %1351  ;;  %v1404_v33 = vpop.permute.xlu2 %1403 }
 0x56c   : > { %v1356_v5 = vadd.f32 %v1352_v54, %v1338_v53  ;;  %v2902_v56 = vadd.f32 %v1404_v33, %v1391_v13  ;;  %v1700_v54 = vmul.f32 %v2910_v17, %v2934_v34 }
 0x573   : > { %v1370_v37 = vpop.permute.xlu0 %1369  ;;  %v1433_v20 = vpop.permute.xlu2 %1432 }
 0x574   : > { %v1374_v47 = vadd.f32 %v1370_v37, %v1356_v5  ;;  %v1435_v36 = vmul.f32 %v1433_v20, %v2834_v61  ;;  %v1436_v45 = vmul.f32 %v1433_v20, %v2832_v6  ;;  %v1753_v20 = vmul.f32 %v2914_v28, %v2926_v29 }
 0x576   : > { %1441 = vrot.lane.b32.xlu1 %v1436_v45, %s3118_s22  ;;  %1439 = vrot.lane.b32.xlu0 %v1435_v36, %s3118_s22 }
 0x57b   : > { %v1388_v60 = vpop.permute.xlu0 %1387  ;;  %v1487_v21 = vpop.permute.xlu2 %1486 }
 0x57c   : > { %v1392_v15 = vadd.f32 %v1388_v60, %v1374_v47  ;;  %v1490_v16 = vmul.f32 %v1487_v21, %v2832_v6  ;;  %v1489_v10 = vmul.f32 %v1487_v21, %v2834_v61  ;;  %v1754_v47 = vmul.f32 %v2914_v28, %v2934_v34 }
 0x57e   : > { %1475 = vrot.lane.b32.xlu1 %v1471_v0, %s3141_s4 }
 0x583   : > { %v1406_v23 = vpop.permute.xlu0 %1405  ;;  %v1553_v27 = vpop.permute.xlu2 %1552 }
 0x584   : > { %v1410_v46 = vadd.f32 %v1406_v23, %v1392_v15  ;;  %v1555_v32 = vmul.f32 %v1553_v27, %v2926_v29  ;;  %v1556_v55 = vmul.f32 %v1553_v27, %v2934_v34 }
 0x586   : > { %1495 = vrot.lane.b32.xlu1 %v1490_v16, %s3120_s21 }
 0x58b   : > { %v1451_v57 = vpop.permute.xlu0 %1450  ;;  %v1607_v48 = vpop.permute.xlu2 %1606 }
 0x58c   : > { %v1453_v25 = vmul.f32 %v1451_v57, %v2834_v61  ;;  %v1454_v50 = vmul.f32 %v1451_v57, %v2832_v6  ;;  %v1424_v3 = vpop.permute.xlu1 %1423  ;;  %v1609_v30 = vmul.f32 %v1607_v48, %v2926_v29  ;;  %v1610_v14 = vmul.f32 %v1607_v48, %v2934_v34 }
 0x58d   : > { %v2921_v18 = vadd.f32 %v1424_v3, %v1410_v46 }
 0x58e   : > { %1457 = vrot.lane.b32.xlu2 %v1453_v25, %s3119_s26  ;;  %1459 = vrot.lane.b32.xlu0 %v1454_v50, %s3119_s26 }
 0x58f   : > { %1529 = vrot.lane.b32.xlu1 %v1525_v40, %s3162_s13 }
 0x593   : > { %v1505_v22 = vpop.permute.xlu0 %1504 }
 0x594   : > { %v1507_v35 = vmul.f32 %v1505_v22, %v2834_v61  ;;  %v1508_v39 = vmul.f32 %v1505_v22, %v2832_v6  ;;  %v1661_v6 = vpop.permute.xlu2 %1660 }
 0x595   : > { %v1663_v4 = vmul.f32 %v1661_v6, %v2926_v29  ;;  %v1664_v59 = vmul.f32 %v1661_v6, %v2934_v34 }
 0x596   : > { %1493 = vrot.lane.b32.xlu0 %v1489_v10, %s3120_s21  ;;  %1477 = vrot.lane.b32.xlu2 %v1472_v1, %s3141_s4 }
 0x597   : > { %1559 = vrot.lane.b32.xlu1 %v1555_v32, %s3136_s19 }
 0x59b   : > { %v1571_v26 = vpop.permute.xlu0 %1570 }
 0x59c   : > { %v1574_v43 = vmul.f32 %v1571_v26, %v2934_v34  ;;  %v1573_v24 = vmul.f32 %v1571_v26, %v2926_v29  ;;  %v1715_v31 = vpop.permute.xlu2 %1714 }
 0x59d   : > { %v1717_v51 = vmul.f32 %v1715_v31, %v2926_v29 }
 0x59e   : > { %1513 = vrot.lane.b32.xlu0 %v1508_v39, %s3142_s29  ;;  %1511 = vrot.lane.b32.xlu2 %v1507_v35, %s3142_s29 }
 0x59f   : > { %1579 = vrot.lane.b32.xlu1 %v1574_v43, %s3137_s18 }
 0x5a3   : > { %v1625_v52 = vpop.permute.xlu0 %1624 }
 0x5a4   : > { %v1628_v11 = vmul.f32 %v1625_v52, %v2934_v34  ;;  %v1627_v19 = vmul.f32 %v1625_v52, %v2926_v29  ;;  %v1769_v13 = vpop.permute.xlu2 %1768 }
 0x5a5   : > { %v1771_v33 = vmul.f32 %v1769_v13, %v2926_v29  ;;  %v1772_v21 = vmul.f32 %v1769_v13, %v2934_v34 }
 0x5a6   : > { %1542 = vrot.lane.b32.xlu0 %v2087_v38, %s3121_s20  ;;  %1531 = vrot.lane.b32.xlu2 %v1526_v62, %s3162_s13 }
 0x5a7   : > { %1613 = vrot.lane.b32.xlu1 %v1609_v30, %s3139_s8 }
 0x5ab   : > { %v1679_v61 = vpop.permute.xlu0 %1678 }
 0x5ac   : > { %v1682_v44 = vmul.f32 %v1679_v61, %v2934_v34  ;;  %v1681_v63 = vmul.f32 %v1679_v61, %v2926_v29  ;;  %v1787_v5 = vpop.permute.xlu2 %1786 }
 0x5ad   : > { %v1790_v37 = vmul.f32 %v1787_v5, %v2934_v34  ;;  %v1789_v23 = vmul.f32 %v1787_v5, %v2926_v29 }
 0x5ae   : > { %1577 = vrot.lane.b32.xlu0 %v1573_v24, %s3137_s18  ;;  %1561 = vrot.lane.b32.xlu2 %v1556_v55, %s3136_s19 }
 0x5af   : > { %1633 = vrot.lane.b32.xlu1 %v1628_v11, %s3140_s6 }
 0x5b3   : > { %v1733_v49 = vpop.permute.xlu0 %1732 }
 0x5b4   : > { %v1736_v53 = vmul.f32 %v1733_v49, %v2934_v34  ;;  %v1735_v58 = vmul.f32 %v1733_v49, %v2926_v29 }
 0x5b6   : > { %1597 = vrot.lane.b32.xlu0 %v1592_v7, %s3138_s10  ;;  %1595 = vrot.lane.b32.xlu2 %v1591_v41, %s3138_s10 }
 0x5b7   : > { %1667 = vrot.lane.b32.xlu1 %v1663_v4, %s3116_s25 }
 0x5bb   : > { %v1422_v42 = vpop.permute.xlu0 %1421 }
 0x5bc   : > { %v1427_v12 = vadd.f32 %v1422_v42, %v2902_v56  ;;  %v1718_v56 = vmul.f32 %v1715_v31, %v2934_v34 }
 0x5be   : > { %1631 = vrot.lane.b32.xlu0 %v1627_v19, %s3140_s6  ;;  %1615 = vrot.lane.b32.xlu2 %v1610_v14, %s3139_s8 }
 0x5bf   : > { %1687 = vrot.lane.b32.xlu1 %v1682_v44, %s3117_s28 }
 0x5c6   : > { %1651 = vrot.lane.b32.xlu0 %v1646_v8, %s3115_s23  ;;  %1649 = vrot.lane.b32.xlu2 %v1645_v2, %s3115_s23 }
 0x5c7   : > { %1721 = vrot.lane.b32.xlu1 %v1717_v51, %s3119_s26 }
 0x5ce   : > { %1685 = vrot.lane.b32.xlu0 %v1681_v63, %s3117_s28  ;;  %1669 = vrot.lane.b32.xlu2 %v1664_v59, %s3116_s25 }
 0x5cf   : > { %1741 = vrot.lane.b32.xlu1 %v1736_v53, %s3141_s4 }
 0x5d6   : > { %1705 = vrot.lane.b32.xlu0 %v1700_v54, %s3118_s22  ;;  %1703 = vrot.lane.b32.xlu2 %v1699_v9, %s3118_s22 }
 0x5d7   : > { %1775 = vrot.lane.b32.xlu1 %v1771_v33, %s3142_s29 }
 0x5de   : > { %1739 = vrot.lane.b32.xlu0 %v1735_v58, %s3141_s4  ;;  %1723 = vrot.lane.b32.xlu2 %v1718_v56, %s3119_s26 }
 0x5df   : > { %1795 = vrot.lane.b32.xlu1 %v1790_v37, %s3162_s13 }
 0x5e6   : > { %1759 = vrot.lane.b32.xlu0 %v1754_v47, %s3120_s21  ;;  %1757 = vrot.lane.b32.xlu2 %v1753_v20, %s3120_s21 }
 0x5e8   : > { %v1458_v36 = vpop.permute.xlu2 %1457  ;;  %v1440_v45 = vpop.permute.xlu0 %1439 }
 0x5e9   : > { %v1445_v17 = vadd.f32 %v1440_v45, %v1427_v12  ;;  %v1442_v60 = vpop.permute.xlu1 %1441 }
 0x5ea   : > { %v1446_v0 = vadd.f32 %v1442_v60, %v2921_v18 }
 0x5eb   : > { %v1463_v15 = vadd.f32 %v1458_v36, %v1445_v17 }
 0x5ee   : > { %1793 = vrot.lane.b32.xlu0 %v1789_v23, %s3162_s13  ;;  %1777 = vrot.lane.b32.xlu2 %v1772_v21, %s3142_s29 }
 0x5f0   : > { %v1478_v28 = vpop.permute.xlu2 %1477 }
 0x5f1   : > { %v1476_v16 = vpop.permute.xlu1 %1475 }
 0x5f2   : > { %v1481_v46 = vadd.f32 %v1476_v16, %v1463_v15 }
 0x5f8   : > { %v1512_v57 = vpop.permute.xlu2 %1511 }
 0x5f9   : > { %v1496_v25 = vpop.permute.xlu1 %1495 }
 0x600   : > { %v1460_v50 = vpop.permute.xlu0 %1459  ;;  %v1532_v3 = vpop.permute.xlu2 %1531 }
 0x601   : > { %v1530_v40 = vpop.permute.xlu1 %1529  ;;  %v1464_v48 = vadd.f32 %v1460_v50, %v1446_v0 }
 0x603   : > { %v1482_v52 = vadd.f32 %v1478_v28, %v1464_v48  ;;  %v1802_v48 = vld [vmem:[#allocation2 + $0x8] sm:$0xff] }
 0x605   : > { %v1500_v55 = vadd.f32 %v1496_v25, %v1482_v52 }
 0x608   : > { %v1494_v27 = vpop.permute.xlu0 %1493  ;;  %v1562_v18 = vpop.permute.xlu2 %1561 }
 0x609   : > { %v1560_v22 = vpop.permute.xlu1 %1559  ;;  %v1499_v61 = vadd.f32 %v1494_v27, %v1481_v46 }
 0x60b   : > { %v1517_v6 = vadd.f32 %v1512_v57, %v1499_v61 }
 0x60d   : > { %v1535_v42 = vadd.f32 %v1530_v40, %v1517_v6 }
 0x610   : > { %v1514_v1 = vpop.permute.xlu0 %1513  ;;  %v1596_v32 = vpop.permute.xlu2 %1595 }
 0x611   : > { %v1580_v10 = vpop.permute.xlu1 %1579  ;;  %v1518_v11 = vadd.f32 %v1514_v1, %v1500_v55 }
 0x613   : > { %v1536_v41 = vadd.f32 %v1532_v3, %v1518_v11 }
 0x618   : > { %v1543_v26 = vpop.permute.xlu0 %1542  ;;  %v1616_v39 = vpop.permute.xlu2 %1615 }
 0x619   : > { %v1614_v35 = vpop.permute.xlu1 %1613  ;;  %v1546_v49 = vmul.f32 %v1543_v26, %v2934_v34  ;;  %v1545_v7 = vmul.f32 %v1543_v26, %v2926_v29 }
 0x61b   : > { %v1548_v14 = vadd.f32 %v1546_v49, %v1536_v41  ;;  %v1547_v12 = vadd.f32 %v1545_v7, %v1535_v42 }
 0x61d   : > { %v1566_v31 = vadd.f32 %v1562_v18, %v1548_v14  ;;  %v1565_v2 = vadd.f32 %v1560_v22, %v1547_v12 }
 0x61f   : > { %v1584_v59 = vadd.f32 %v1580_v10, %v1566_v31 }
 0x620   : > { %v1578_v43 = vpop.permute.xlu0 %1577  ;;  %v1650_v62 = vpop.permute.xlu2 %1649 }
 0x621   : > { %v1634_v38 = vpop.permute.xlu1 %1633  ;;  %v1583_v51 = vadd.f32 %v1578_v43, %v1565_v2 }
 0x623   : > { %v1601_v13 = vadd.f32 %v1596_v32, %v1583_v51 }
 0x625   : > { %v1619_v33 = vadd.f32 %v1614_v35, %v1601_v13  ;;  %v1801_v35 = vld [vmem:[#allocation2] sm:$0xff] }
 0x628   : > { %v1598_v30 = vpop.permute.xlu0 %1597  ;;  %v1670_v19 = vpop.permute.xlu2 %1669 }
 0x629   : > { %v1668_v24 = vpop.permute.xlu1 %1667  ;;  %v1602_v63 = vadd.f32 %v1598_v30, %v1584_v59 }
 0x62b   : > { %v1620_v54 = vadd.f32 %v1616_v39, %v1602_v63 }
 0x62d   : > { %v1638_v29 = vadd.f32 %v1634_v38, %v1620_v54 }
 0x630   : > { %v1632_v4 = vpop.permute.xlu0 %1631  ;;  %v1704_v53 = vpop.permute.xlu2 %1703 }
 0x631   : > { %v1688_v44 = vpop.permute.xlu1 %1687  ;;  %v1637_v5 = vadd.f32 %v1632_v4, %v1619_v33 }
 0x633   : > { %v1655_v37 = vadd.f32 %v1650_v62, %v1637_v5 }
 0x635   : > { %v1673_v45 = vadd.f32 %v1668_v24, %v1655_v37 }
 0x638   : > { %v1652_v8 = vpop.permute.xlu0 %1651  ;;  %v1724_v58 = vpop.permute.xlu2 %1723 }
 0x639   : > { %v1722_v9 = vpop.permute.xlu1 %1721  ;;  %v1656_v56 = vadd.f32 %v1652_v8, %v1638_v29 }
 0x63b   : > { %v1674_v36 = vadd.f32 %v1670_v19, %v1656_v56 }
 0x63d   : > { %v1692_v60 = vadd.f32 %v1688_v44, %v1674_v36 }
 0x640   : > { %v1686_v34 = vpop.permute.xlu0 %1685  ;;  %v1758_v15 = vpop.permute.xlu2 %1757 }
 0x641   : > { %v1742_v20 = vpop.permute.xlu1 %1741  ;;  %v1691_v17 = vadd.f32 %v1686_v34, %v1673_v45 }
 0x643   : > { %v1709_v23 = vadd.f32 %v1704_v53, %v1691_v17 }
 0x645   : > { %v1727_v46 = vadd.f32 %v1722_v9, %v1709_v23 }
 0x648   : > { %v1706_v47 = vpop.permute.xlu0 %1705  ;;  %v1778_v40 = vpop.permute.xlu2 %1777 }
 0x649   : > { %v1710_v0 = vadd.f32 %v1706_v47, %v1692_v60  ;;  %v1776_v28 = vpop.permute.xlu1 %1775 }
 0x64b   : > { %v1728_v16 = vadd.f32 %v1724_v58, %v1710_v0 }
 0x64d   : > { %v1746_v25 = vadd.f32 %v1742_v20, %v1728_v16 }
 0x650   : > { %v1740_v21 = vpop.permute.xlu0 %1739 }
 0x651   : > { %v1745_v57 = vadd.f32 %v1740_v21, %v1727_v46  ;;  %v1796_v18 = vpop.permute.xlu1 %1795 }
 0x653   : > { %v1763_v27 = vadd.f32 %v1758_v15, %v1745_v57 }
 0x655   : > { %v1781_v10 = vadd.f32 %v1776_v28, %v1763_v27 }
 0x658   : > { %v1760_v50 = vpop.permute.xlu0 %1759 }
 0x659   : > { %v1764_v3 = vadd.f32 %v1760_v50, %v1746_v25 }
 0x65b   : > { %v1782_v22 = vadd.f32 %v1778_v40, %v1764_v3 }
 0x65d   : > { %v1800_v1 = vadd.f32 %v1796_v18, %v1782_v22 }
 0x65f   : > { %1807 = vrot.lane.b32.xlu0 %v1800_v1, %s3136_s19 }
 0x660   : > { %v1794_v32 = vpop.permute.xlu0 %1793 }
 0x661   : > { %v1799_v26 = vadd.f32 %v1794_v32, %v1781_v10 }
 0x663   : > { %1805 = vrot.lane.b32.xlu2 %v1799_v26, %s3136_s19 }
 0x6bd   : > { %v1806_v39 = vpop.permute.xlu2 %1805 }
 0x6be   : > { %v1811_v43 = vadd.f32 %v1806_v39, %v1801_v35 }
 0x6c0   : > { %1814 = vst.msk [vmem:[#allocation2] sm:$0xff] %vm1813_vm5, %v1811_v43  ;;  %1818 = vrot.lane.b32.xlu1 %v1811_v43, %s3156_s2 }
 0x6d1   : > { %v1808_v38 = vpop.permute.xlu0 %1807 }
 0x6d2   : > { %v1812_v52 = vadd.f32 %v1808_v38, %v1802_v48 }
 0x6d4   : > { %1815 = vst.msk [vmem:[#allocation2 + $0x8] sm:$0xff] %vm1813_vm5, %v1812_v52  ;;  %1820 = vrot.lane.b32.xlu2 %v1812_v52, %s3156_s2 }
 0x72e   : > { %v1821_v62 = vpop.permute.xlu2 %1820 }
 0x72f   : > { %1825 = vst.msk [vmem:[#allocation3 + $0x9] sm:$0xff] %vm1006_vm4, %v1821_v62  ;;  %1829 = sbr.rel (%p1921_p8) target bundleno = 1846 (0x736), region = 36 }
 0x732   : > { %v1819_v30 = vpop.permute.xlu1 %1818 }
 0x733   : > { %1824 = vst.msk [vmem:[#allocation3 + $0x1] sm:$0xff] %vm1006_vm4, %v1819_v30 }
 0x734   : > { %1830 = vst.msk [vmem:[%s3164_s0] sm:$0xff] %vm1813_vm5, %v1811_v43 }
 0x735   : > { %1831 = vst.msk [vmem:[%s3164_s0 + $0x8] sm:$0xff] %vm1813_vm5, %v1812_v52 }
 0x736 PF: > { %s3165_s1 = sld [smem:[#allocation7_spill]] }
 0x737   : > { %s3166_s9 = sld [smem:[#allocation5_spill]] }
 0x738   : > { %s3167_s10 = sld [smem:[#allocation6_spill]] }
 0x739   : > { %s3168_s11 = sld [smem:[#allocation8_spill]] }
 0x73a   : > { %s3169_s12 = sld [smem:[#allocation9_spill]] }
 0x73c   : > { %s12_s13 = sadd.s32 1, %s3165_s1  }
 0x73d   : > { %p9_p9 = scmp.ge.s32.totalorder %s12_s13, 6  }
 0x73f   :  { %11 = sbr.rel (!%p9_p9) target bundleno = 4 (0x4), region = 69 }

</bundles_post_ra>
